<compile_context>
chip_gen: v6e
topology: v6e:2x2x1
jax: 0.10.0
libtpu: 0.0.40
codegen_flags: <defaults>
</compile_context>

<pallas_src>
import functools

import numpy as np
import jax
import jax.numpy as jnp
from jax.experimental import pallas as pl
from jax.experimental.pallas import tpu as pltpu


# ----------------------------- Pallas kernels ------------------------------

def _stem_kernel(w_ref, a_ref, b_ref, o_ref):
    # (cout, K) @ (K, M) on the MXU; bf16 inputs, f32 accumulate, fused
    # BN-bias + ReLU epilogue, bf16 output (next consumer is bf16 anyway).
    acc = jnp.dot(w_ref[...], a_ref[...], preferred_element_type=jnp.float32)
    o_ref[...] = jnp.maximum(acc + b_ref[...], 0.0).astype(o_ref.dtype)


def _fused_kernel(has_down, x_ref, *refs):
    """Whole residual backbone + head in one kernel.

    Activations are (B_total, C*H*W) row-vectors with features on the lane
    dim; every conv layer is a precomputed dense matrix (BN scale folded in).
    """
    h_ref, z_ref = refs[-2], refs[-1]
    it = iter(refs[:-2])

    x16 = x_ref[...]                       # (Bt, F0) bf16
    x32 = x16.astype(jnp.float32)

    for down in has_down:                  # 8 BasicBlocks, unrolled at trace time
        w1 = next(it); b1 = next(it); w2 = next(it); b2 = next(it)
        if down:
            wd = next(it); bd = next(it)
            sc = jnp.dot(x16, wd[...], preferred_element_type=jnp.float32) + bd[...]
        else:
            sc = x32                       # identity shortcut kept in f32
        y = jnp.dot(x16, w1[...], preferred_element_type=jnp.float32) + b1[...]
        y = jnp.maximum(y, 0.0).astype(jnp.bfloat16)
        y = jnp.dot(y, w2[...], preferred_element_type=jnp.float32) + b2[...]
        x32 = jnp.maximum(y + sc, 0.0)
        x16 = x32.astype(jnp.bfloat16)

    fcw = next(it); fcb = next(it)
    p1w = next(it); p1b = next(it)
    p2w = next(it); p2b = next(it)

    # Global average pool over the final 1x1 feature map is the identity.
    # TODO(synk): generalize GAP if the final spatial size is > 1x1.
    h = jnp.dot(x32, fcw[...], preferred_element_type=jnp.float32) + fcb[...]
    h_ref[...] = h

    z = jnp.dot(h, p1w[...], preferred_element_type=jnp.float32) + p1b[...]
    z = jnp.maximum(z, 0.0)
    z = jnp.dot(z, p2w[...], preferred_element_type=jnp.float32) + p2b[...]
    nrm = jnp.sqrt(jnp.sum(z * z, axis=1, keepdims=True))
    # matches torch.nn.functional.normalize(p=2, dim=1, eps=1e-12)
    z_ref[...] = z / jnp.maximum(nrm, 1e-12)


_VMEM = pl.BlockSpec(memory_space=pltpu.MemorySpace.VMEM)


def stem_conv(w2, cols, bias):
    """Single-step lane-dense stem matmul: (cout, K) @ (K, B*Ho*Wo)."""
    cout = w2.shape[0]
    M = cols.shape[1]
    return pl.pallas_call(
        _stem_kernel,
        out_shape=jax.ShapeDtypeStruct((cout, M), jnp.bfloat16),
        in_specs=[_VMEM, _VMEM, _VMEM],
        out_specs=_VMEM,
    )(w2, cols, bias)


def fused_backbone_head(x0, flat, has_down, h_dim, z_dim):
    """One pallas_call for stage1..stage4 + GAP + fc + projection + L2 norm."""
    Bt = x0.shape[0]
    kernel = functools.partial(_fused_kernel, tuple(has_down))
    return pl.pallas_call(
        kernel,
        out_shape=(jax.ShapeDtypeStruct((Bt, h_dim), jnp.float32),
                   jax.ShapeDtypeStruct((Bt, z_dim), jnp.float32)),
        in_specs=[_VMEM] * (1 + len(flat)),
        out_specs=(_VMEM, _VMEM),
    )(x0, *flat)


# ------------------------------- XLA glue ----------------------------------

def conv_patches_t(x_t, k, stride, pad):
    """x_t: (C, B, H, W) -> im2col patches (k*k*C, B*Ho*Wo); K ordered (di, dj, c)."""
    C, B, H, W = x_t.shape
    xp = jnp.pad(x_t, ((0, 0), (0, 0), (pad, pad), (pad, pad)))
    Ho = (H + 2 * pad - k) // stride + 1
    Wo = (W + 2 * pad - k) // stride + 1
    taps = [xp[:, :, i:i + stride * Ho:stride, j:j + stride * Wo:stride]
            for i in range(k) for j in range(k)]
    cols = jnp.stack(taps, axis=0).reshape(k * k * C, B * Ho * Wo)
    return cols, Ho, Wo


def maxpool_3x3_s2(x4):
    """x4: (C, B, H, W) -> (C, B, Ho, Wo), 3x3 window, stride 2, pad 1."""
    C, B, H, W = x4.shape
    neg = jnp.finfo(x4.dtype).min
    xp = jnp.pad(x4, ((0, 0), (0, 0), (1, 1), (1, 1)), constant_values=neg)
    Ho = (H + 2 - 3) // 2 + 1
    Wo = (W + 2 - 3) // 2 + 1
    taps = [xp[:, :, i:i + 2 * Ho:2, j:j + 2 * Wo:2]
            for i in range(3) for j in range(3)]
    return jnp.max(jnp.stack(taps, axis=0), axis=0)


def stcrl_forward(params, x_pre, x_post):
    """Mirrors STCRL_Net.forward: returns (h_pre, h_post, z_pre, z_post)."""
    Bh = x_pre.shape[0]
    base = params["base"]
    x = jnp.concatenate([x_pre, x_post], axis=0).astype(jnp.float32)   # (Bt,3,H,W)
    Bt = x.shape[0]

    # --- stem: im2col in XLA (only layer with a patch buffer), Pallas matmul.
    x_t = jnp.transpose(x, (1, 0, 2, 3))                               # (3,Bt,H,W)
    cols, Ho, Wo = conv_patches_t(x_t, 7, 2, 3)
    cols = jnp.pad(cols, ((0, params["stem_kpad"]), (0, 0))).astype(jnp.bfloat16)
    y = stem_conv(params["stem_w"], cols, params["stem_b"])            # (base, Bt*Ho*Wo)

    # --- maxpool 3x3/s2 (XLA glue on a tiny tensor).
    y4 = y.reshape(base, Bt, Ho, Wo)
    pooled = maxpool_3x3_s2(y4)                                        # (base, Bt, 8, 8)

    # --- stack to (Bt, C*H*W) row-vectors, feature ordering (c, h, w).
    x0 = jnp.transpose(pooled, (1, 0, 2, 3)).reshape(Bt, -1).astype(jnp.bfloat16)

    h, z = fused_backbone_head(x0, params["flat"], params["has_down"],
                               params["h_dim"], params["z_dim"])
    return h[:Bh], h[Bh:], z[:Bh], z[Bh:]


# --------------------- deterministic parameter construction -----------------

def _conv_matrix_np(w, scale, Hi, Wi, stride, pad):
    """Lower a conv (+ folded BN scale) to a dense matrix acting on the stacked
    (ci*Hi*Wi) feature vector.  Row order (co, ho, wo), col order (ci, hi, wi)."""
    co, ci, kh, kw = w.shape
    Ho = (Hi + 2 * pad - kh) // stride + 1
    Wo = (Wi + 2 * pad - kw) // stride + 1
    M = np.zeros((co, Ho, Wo, ci, Hi, Wi), np.float32)
    for ho in range(Ho):
        for di in range(kh):
            hi = ho * stride + di - pad
            if hi < 0 or hi >= Hi:
                continue
            for wo in range(Wo):
                for dj in range(kw):
                    wi = wo * stride + dj - pad
                    if wi < 0 or wi >= Wi:
                        continue
                    M[:, ho, wo, :, hi, wi] += w[:, :, di, dj]
    M = M.reshape(co * Ho * Wo, ci * Hi * Wi)
    M = M * np.repeat(scale, Ho * Wo)[:, None]     # fold BN scale in f32
    return M, Ho, Wo


def init_params(seed=42, base=8, h_dim=64, z_dim=32, in_ch=3, img=32):
    rng = np.random.default_rng(seed)

    def conv_bn(cin, cout, k):
        w = (rng.normal(size=(cout, cin, k, k)) * (2.0 / (cin * k * k)) ** 0.5
             ).astype(np.float32)
        gamma = (1.0 + 0.1 * rng.normal(size=cout)).astype(np.float32)
        beta = (0.1 * rng.normal(size=cout)).astype(np.float32)
        mean = (0.05 * rng.normal(size=cout)).astype(np.float32)
        var = (1.0 + 0.1 * np.abs(rng.normal(size=cout))).astype(np.float32)
        scale = gamma / np.sqrt(var + 1e-5)        # eval-mode BatchNorm fold
        bias = beta - mean * scale
        return w, scale.astype(np.float32), bias.astype(np.float32)

    def linear(din, dout):
        w = (rng.normal(size=(dout, din)) * (1.0 / din) ** 0.5).astype(np.float32)
        b = (0.1 * rng.normal(size=dout)).astype(np.float32)
        return w, b

    params = {"base": base, "h_dim": h_dim, "z_dim": z_dim}

    # --- stem conv: pack (cout, K) with K ordered (di, dj, cin); fold BN scale
    #     in f32, zero-pad K 147 -> 160 for clean bf16 sublane packing.
    ws, ss, bs = conv_bn(in_ch, base, 7)
    w2 = ws.transpose(0, 2, 3, 1).reshape(base, -1) * ss[:, None]
    kpad = (-w2.shape[1]) % 16
    w2 = np.pad(w2, ((0, 0), (0, kpad)))
    params["stem_w"] = jnp.asarray(w2, jnp.bfloat16)
    params["stem_b"] = jnp.asarray(bs.reshape(base, 1), jnp.float32)
    params["stem_kpad"] = int(kpad)

    # --- residual stages lowered to dense stacked-feature matrices.
    Hi = (img + 2 * 3 - 7) // 2 + 1            # after 7x7/s2 stem
    Hi = (Hi + 2 - 3) // 2 + 1                 # after 3x3/s2 maxpool
    Wi = Hi
    cin = base
    flat, has_down = [], []
    for cout, stride0 in [(base, 1), (2 * base, 2), (4 * base, 2), (8 * base, 2)]:
        for bidx in range(2):
            s = stride0 if bidx == 0 else 1
            w1, s1, bb1 = conv_bn(cin, cout, 3)
            M1, Ho, Wo = _conv_matrix_np(w1, s1, Hi, Wi, s, 1)
            w2c, s2, bb2 = conv_bn(cout, cout, 3)
            M2, _, _ = _conv_matrix_np(w2c, s2, Ho, Wo, 1, 1)
            flat += [jnp.asarray(M1.T, jnp.bfloat16),
                     jnp.asarray(np.repeat(bb1, Ho * Wo)[None, :], jnp.float32),
                     jnp.asarray(M2.T, jnp.bfloat16),
                     jnp.asarray(np.repeat(bb2, Ho * Wo)[None, :], jnp.float32)]
            down = (s != 1) or (cin != cout)
            has_down.append(down)
            if down:
                wd, sd, bd = conv_bn(cin, cout, 1)
                Md, _, _ = _conv_matrix_np(wd, sd, Hi, Wi, s, 0)
                flat += [jnp.asarray(Md.T, jnp.bfloat16),
                         jnp.asarray(np.repeat(bd, Ho * Wo)[None, :], jnp.float32)]
            cin, Hi, Wi = cout, Ho, Wo
    assert Hi == 1 and Wi == 1, "fused kernel assumes a 1x1 final feature map"

    # --- encoder fc + projection head (kept f32; tiny).
    fcw, fcb = linear(cin, h_dim)
    p1w, p1b = linear(h_dim, h_dim // 2)
    p2w, p2b = linear(h_dim // 2, z_dim)
    flat += [jnp.asarray(fcw.T, jnp.float32), jnp.asarray(fcb[None, :], jnp.float32),
             jnp.asarray(p1w.T, jnp.float32), jnp.asarray(p1b[None, :], jnp.float32),
             jnp.asarray(p2w.T, jnp.float32), jnp.asarray(p2b[None, :], jnp.float32)]

    params["flat"] = tuple(flat)
    params["has_down"] = tuple(has_down)
    return params


# ---------------------------------- main ------------------------------------

if __name__ == "__main__":
    H_DIM, Z_DIM, BASE = 64, 32, 8

    key = jax.random.PRNGKey(0)
    kx1, kx2 = jax.random.split(key)
    x_pre = jax.random.normal(kx1, (2, 3, 32, 32), jnp.float32)   # NCHW like PyTorch
    x_post = jax.random.normal(kx2, (2, 3, 32, 32), jnp.float32)

    params = init_params(seed=42, base=BASE, h_dim=H_DIM, z_dim=Z_DIM)

    # Static config (block structure, kernel sizes) bound via closure.
    forward = jax.jit(functools.partial(stcrl_forward, params))

    h_pre, h_post, z_pre, z_post = forward(x_pre, x_post)
    jax.block_until_ready((h_pre, h_post, z_pre, z_post))

    assert h_pre.shape == (2, H_DIM) and h_post.shape == (2, H_DIM)
    assert z_pre.shape == (2, Z_DIM) and z_post.shape == (2, Z_DIM)
    # z vectors are L2-normalized
    assert bool(jnp.allclose(jnp.sum(z_pre * z_pre, axis=1), 1.0, atol=1e-4))
    assert bool(jnp.allclose(jnp.sum(z_post * z_post, axis=1), 1.0, atol=1e-4))
    assert bool(jnp.all(jnp.isfinite(h_pre))) and bool(jnp.all(jnp.isfinite(h_post)))

    print("KERNEL_OK")
</pallas_src>

<mosaic_0001>
module attributes {stable_mosaic.version = 11 : i64} {
  func.func @_stem_kernel(%arg0: memref<8x160xbf16, #tpu.memory_space<vmem>>, %arg1: memref<160x1024xbf16, #tpu.memory_space<vmem>>, %arg2: memref<8x1xf32, #tpu.memory_space<vmem>>, %arg3: memref<8x1024xbf16, #tpu.memory_space<vmem>>) attributes {dimension_semantics = [], scalar_prefetch = 0 : i64, scratch_operands = 0 : i64, tpu.core_type = #tpu.core_type<tc>} {
    %c0 = arith.constant 0 : index
    %c0_0 = arith.constant 0 : index
    %0 = vector.load %arg0[%c0, %c0_0] : memref<8x160xbf16, #tpu.memory_space<vmem>>, vector<8x160xbf16>
    %c0_1 = arith.constant 0 : index
    %c0_2 = arith.constant 0 : index
    %1 = vector.load %arg1[%c0_1, %c0_2] : memref<160x1024xbf16, #tpu.memory_space<vmem>>, vector<160x1024xbf16>
    %cst = arith.constant dense<0.000000e+00> : vector<8x1024xf32>
    %2 = tpu.matmul %0, %1, %cst {dimension_numbers = #tpu.dot_dimension_numbers<[1], [0], [0], [1], [0, 0, 1, 1], [], []>} : vector<8x160xbf16>, vector<160x1024xbf16>, vector<8x1024xf32> -> vector<8x1024xf32>
    %c0_3 = arith.constant 0 : index
    %c0_4 = arith.constant 0 : index
    %3 = vector.load %arg2[%c0_3, %c0_4] : memref<8x1xf32, #tpu.memory_space<vmem>>, vector<8x1xf32>
    %4 = vector.broadcast %3 : vector<8x1xf32> to vector<8x1024xf32>
    %5 = arith.addf %2, %4 : vector<8x1024xf32>
    %cst_5 = arith.constant 0.000000e+00 : f32
    %6 = vector.broadcast %cst_5 : f32 to vector<8x1024xf32>
    %7 = arith.maximumf %5, %6 : vector<8x1024xf32>
    %8 = arith.truncf %7 : vector<8x1024xf32> to vector<8x1024xbf16>
    %c0_6 = arith.constant 0 : index
    %c0_7 = arith.constant 0 : index
    %9 = vector.load %arg3[%c0_6, %c0_7] : memref<8x1024xbf16, #tpu.memory_space<vmem>>, vector<8x1024xbf16>
    tpu.vector_store %arg3[%c0_6, %c0_7], %8 {strides = array<i32>} : memref<8x1024xbf16, #tpu.memory_space<vmem>>, vector<8x1024xbf16>,
    return
  }
}

module attributes {stable_mosaic.version = 11 : i64} {
  func.func @_fused_kernel(%arg0: memref<4x512xbf16, #tpu.memory_space<vmem>>, %arg1: memref<512x512xbf16, #tpu.memory_space<vmem>>, %arg2: memref<1x512xf32, #tpu.memory_space<vmem>>, %arg3: memref<512x512xbf16, #tpu.memory_space<vmem>>, %arg4: memref<1x512xf32, #tpu.memory_space<vmem>>, %arg5: memref<512x512xbf16, #tpu.memory_space<vmem>>, %arg6: memref<1x512xf32, #tpu.memory_space<vmem>>, %arg7: memref<512x512xbf16, #tpu.memory_space<vmem>>, %arg8: memref<1x512xf32, #tpu.memory_space<vmem>>, %arg9: memref<512x256xbf16, #tpu.memory_space<vmem>>, %arg10: memref<1x256xf32, #tpu.memory_space<vmem>>, %arg11: memref<256x256xbf16, #tpu.memory_space<vmem>>, %arg12: memref<1x256xf32, #tpu.memory_space<vmem>>, %arg13: memref<512x256xbf16, #tpu.memory_space<vmem>>, %arg14: memref<1x256xf32, #tpu.memory_space<vmem>>, %arg15: memref<256x256xbf16, #tpu.memory_space<vmem>>, %arg16: memref<1x256xf32, #tpu.memory_space<vmem>>, %arg17: memref<256x256xbf16, #tpu.memory_space<vmem>>, %arg18: memref<1x256xf32, #tpu.memory_space<vmem>>, %arg19: memref<256x128xbf16, #tpu.memory_space<vmem>>, %arg20: memref<1x128xf32, #tpu.memory_space<vmem>>, %arg21: memref<128x128xbf16, #tpu.memory_space<vmem>>, %arg22: memref<1x128xf32, #tpu.memory_space<vmem>>, %arg23: memref<256x128xbf16, #tpu.memory_space<vmem>>, %arg24: memref<1x128xf32, #tpu.memory_space<vmem>>, %arg25: memref<128x128xbf16, #tpu.memory_space<vmem>>, %arg26: memref<1x128xf32, #tpu.memory_space<vmem>>, %arg27: memref<128x128xbf16, #tpu.memory_space<vmem>>, %arg28: memref<1x128xf32, #tpu.memory_space<vmem>>, %arg29: memref<128x64xbf16, #tpu.memory_space<vmem>>, %arg30: memref<1x64xf32, #tpu.memory_space<vmem>>, %arg31: memref<64x64xbf16, #tpu.memory_space<vmem>>, %arg32: memref<1x64xf32, #tpu.memory_space<vmem>>, %arg33: memref<128x64xbf16, #tpu.memory_space<vmem>>, %arg34: memref<1x64xf32, #tpu.memory_space<vmem>>, %arg35: memref<64x64xbf16, #tpu.memory_space<vmem>>, %arg36: memref<1x64xf32, #tpu.memory_space<vmem>>, %arg37: memref<64x64xbf16, #tpu.memory_space<vmem>>, %arg38: memref<1x64xf32, #tpu.memory_space<vmem>>, %arg39: memref<64x64xf32, #tpu.memory_space<vmem>>, %arg40: memref<1x64xf32, #tpu.memory_space<vmem>>, %arg41: memref<64x32xf32, #tpu.memory_space<vmem>>, %arg42: memref<1x32xf32, #tpu.memory_space<vmem>>, %arg43: memref<32x32xf32, #tpu.memory_space<vmem>>, %arg44: memref<1x32xf32, #tpu.memory_space<vmem>>, %arg45: memref<4x64xf32, #tpu.memory_space<vmem>>, %arg46: memref<4x32xf32, #tpu.memory_space<vmem>>) attributes {dimension_semantics = [], scalar_prefetch = 0 : i64, scratch_operands = 0 : i64, tpu.core_type = #tpu.core_type<tc>} {
    %c0 = arith.constant 0 : index
    %c0_0 = arith.constant 0 : index
    %0 = vector.load %arg0[%c0, %c0_0] : memref<4x512xbf16, #tpu.memory_space<vmem>>, vector<4x512xbf16>
    %1 = arith.extf %0 : vector<4x512xbf16> to vector<4x512xf32>
    %c0_1 = arith.constant 0 : index
    %c0_2 = arith.constant 0 : index
    %2 = vector.load %arg1[%c0_1, %c0_2] : memref<512x512xbf16, #tpu.memory_space<vmem>>, vector<512x512xbf16>
    %cst = arith.constant dense<0.000000e+00> : vector<4x512xf32>
    %3 = tpu.matmul %0, %2, %cst {dimension_numbers = #tpu.dot_dimension_numbers<[1], [0], [0], [1], [0, 0, 1, 1], [], []>} : vector<4x512xbf16>, vector<512x512xbf16>, vector<4x512xf32> -> vector<4x512xf32>
    %c0_3 = arith.constant 0 : index
    %c0_4 = arith.constant 0 : index
    %4 = vector.load %arg2[%c0_3, %c0_4] : memref<1x512xf32, #tpu.memory_space<vmem>>, vector<1x512xf32>
    %5 = vector.broadcast %4 : vector<1x512xf32> to vector<4x512xf32>
    %6 = arith.addf %3, %5 : vector<4x512xf32>
    %cst_5 = arith.constant 0.000000e+00 : f32
    %7 = vector.broadcast %cst_5 : f32 to vector<4x512xf32>
    %8 = arith.maximumf %6, %7 : vector<4x512xf32>
    %9 = arith.truncf %8 : vector<4x512xf32> to vector<4x512xbf16>
    %c0_6 = arith.constant 0 : index
    %c0_7 = arith.constant 0 : index
    %10 = vector.load %arg3[%c0_6, %c0_7] : memref<512x512xbf16, #tpu.memory_space<vmem>>, vector<512x512xbf16>
    %cst_8 = arith.constant dense<0.000000e+00> : vector<4x512xf32>
    %11 = tpu.matmul %9, %10, %cst_8 {dimension_numbers = #tpu.dot_dimension_numbers<[1], [0], [0], [1], [0, 0, 1, 1], [], []>} : vector<4x512xbf16>, vector<512x512xbf16>, vector<4x512xf32> -> vector<4x512xf32>
    %c0_9 = arith.constant 0 : index
    %c0_10 = arith.constant 0 : index
    %12 = vector.load %arg4[%c0_9, %c0_10] : memref<1x512xf32, #tpu.memory_space<vmem>>, vector<1x512xf32>
    %13 = vector.broadcast %12 : vector<1x512xf32> to vector<4x512xf32>
    %14 = arith.addf %11, %13 : vector<4x512xf32>
    %15 = arith.addf %14, %1 : vector<4x512xf32>
    %cst_11 = arith.constant 0.000000e+00 : f32
    %16 = vector.broadcast %cst_11 : f32 to vector<4x512xf32>
    %17 = arith.maximumf %15, %16 : vector<4x512xf32>
    %18 = arith.truncf %17 : vector<4x512xf32> to vector<4x512xbf16>
    %c0_12 = arith.constant 0 : index
    %c0_13 = arith.constant 0 : index
    %19 = vector.load %arg5[%c0_12, %c0_13] : memref<512x512xbf16, #tpu.memory_space<vmem>>, vector<512x512xbf16>
    %cst_14 = arith.constant dense<0.000000e+00> : vector<4x512xf32>
    %20 = tpu.matmul %18, %19, %cst_14 {dimension_numbers = #tpu.dot_dimension_numbers<[1], [0], [0], [1], [0, 0, 1, 1], [], []>} : vector<4x512xbf16>, vector<512x512xbf16>, vector<4x512xf32> -> vector<4x512xf32>
    %c0_15 = arith.constant 0 : index
    %c0_16 = arith.constant 0 : index
    %21 = vector.load %arg6[%c0_15, %c0_16] : memref<1x512xf32, #tpu.memory_space<vmem>>, vector<1x512xf32>
    %22 = vector.broadcast %21 : vector<1x512xf32> to vector<4x512xf32>
    %23 = arith.addf %20, %22 : vector<4x512xf32>
    %cst_17 = arith.constant 0.000000e+00 : f32
    %24 = vector.broadcast %cst_17 : f32 to vector<4x512xf32>
    %25 = arith.maximumf %23, %24 : vector<4x512xf32>
    %26 = arith.truncf %25 : vector<4x512xf32> to vector<4x512xbf16>
    %c0_18 = arith.constant 0 : index
    %c0_19 = arith.constant 0 : index
    %27 = vector.load %arg7[%c0_18, %c0_19] : memref<512x512xbf16, #tpu.memory_space<vmem>>, vector<512x512xbf16>
    %cst_20 = arith.constant dense<0.000000e+00> : vector<4x512xf32>
    %28 = tpu.matmul %26, %27, %cst_20 {dimension_numbers = #tpu.dot_dimension_numbers<[1], [0], [0], [1], [0, 0, 1, 1], [], []>} : vector<4x512xbf16>, vector<512x512xbf16>, vector<4x512xf32> -> vector<4x512xf32>
    %c0_21 = arith.constant 0 : index
    %c0_22 = arith.constant 0 : index
    %29 = vector.load %arg8[%c0_21, %c0_22] : memref<1x512xf32, #tpu.memory_space<vmem>>, vector<1x512xf32>
    %30 = vector.broadcast %29 : vector<1x512xf32> to vector<4x512xf32>
    %31 = arith.addf %28, %30 : vector<4x512xf32>
    %32 = arith.addf %31, %17 : vector<4x512xf32>
    %cst_23 = arith.constant 0.000000e+00 : f32
    %33 = vector.broadcast %cst_23 : f32 to vector<4x512xf32>
    %34 = arith.maximumf %32, %33 : vector<4x512xf32>
    %35 = arith.truncf %34 : vector<4x512xf32> to vector<4x512xbf16>
    %c0_24 = arith.constant 0 : index
    %c0_25 = arith.constant 0 : index
    %36 = vector.load %arg13[%c0_24, %c0_25] : memref<512x256xbf16, #tpu.memory_space<vmem>>, vector<512x256xbf16>
    %cst_26 = arith.constant dense<0.000000e+00> : vector<4x256xf32>
    %37 = tpu.matmul %35, %36, %cst_26 {dimension_numbers = #tpu.dot_dimension_numbers<[1], [0], [0], [1], [0, 0, 1, 1], [], []>} : vector<4x512xbf16>, vector<512x256xbf16>, vector<4x256xf32> -> vector<4x256xf32>
    %c0_27 = arith.constant 0 : index
    %c0_28 = arith.constant 0 : index
    %38 = vector.load %arg14[%c0_27, %c0_28] : memref<1x256xf32, #tpu.memory_space<vmem>>, vector<1x256xf32>
    %39 = vector.broadcast %38 : vector<1x256xf32> to vector<4x256xf32>
    %40 = arith.addf %37, %39 : vector<4x256xf32>
    %c0_29 = arith.constant 0 : index
    %c0_30 = arith.constant 0 : index
    %41 = vector.load %arg9[%c0_29, %c0_30] : memref<512x256xbf16, #tpu.memory_space<vmem>>, vector<512x256xbf16>
    %cst_31 = arith.constant dense<0.000000e+00> : vector<4x256xf32>
    %42 = tpu.matmul %35, %41, %cst_31 {dimension_numbers = #tpu.dot_dimension_numbers<[1], [0], [0], [1], [0, 0, 1, 1], [], []>} : vector<4x512xbf16>, vector<512x256xbf16>, vector<4x256xf32> -> vector<4x256xf32>
    %c0_32 = arith.constant 0 : index
    %c0_33 = arith.constant 0 : index
    %43 = vector.load %arg10[%c0_32, %c0_33] : memref<1x256xf32, #tpu.memory_space<vmem>>, vector<1x256xf32>
    %44 = vector.broadcast %43 : vector<1x256xf32> to vector<4x256xf32>
    %45 = arith.addf %42, %44 : vector<4x256xf32>
    %cst_34 = arith.constant 0.000000e+00 : f32
    %46 = vector.broadcast %cst_34 : f32 to vector<4x256xf32>
    %47 = arith.maximumf %45, %46 : vector<4x256xf32>
    %48 = arith.truncf %47 : vector<4x256xf32> to vector<4x256xbf16>
    %c0_35 = arith.constant 0 : index
    %c0_36 = arith.constant 0 : index
    %49 = vector.load %arg11[%c0_35, %c0_36] : memref<256x256xbf16, #tpu.memory_space<vmem>>, vector<256x256xbf16>
    %cst_37 = arith.constant dense<0.000000e+00> : vector<4x256xf32>
    %50 = tpu.matmul %48, %49, %cst_37 {dimension_numbers = #tpu.dot_dimension_numbers<[1], [0], [0], [1], [0, 0, 1, 1], [], []>} : vector<4x256xbf16>, vector<256x256xbf16>, vector<4x256xf32> -> vector<4x256xf32>
    %c0_38 = arith.constant 0 : index
    %c0_39 = arith.constant 0 : index
    %51 = vector.load %arg12[%c0_38, %c0_39] : memref<1x256xf32, #tpu.memory_space<vmem>>, vector<1x256xf32>
    %52 = vector.broadcast %51 : vector<1x256xf32> to vector<4x256xf32>
    %53 = arith.addf %50, %52 : vector<4x256xf32>
    %54 = arith.addf %53, %40 : vector<4x256xf32>
    %cst_40 = arith.constant 0.000000e+00 : f32
    %55 = vector.broadcast %cst_40 : f32 to vector<4x256xf32>
    %56 = arith.maximumf %54, %55 : vector<4x256xf32>
    %57 = arith.truncf %56 : vector<4x256xf32> to vector<4x256xbf16>
    %c0_41 = arith.constant 0 : index
    %c0_42 = arith.constant 0 : index
    %58 = vector.load %arg15[%c0_41, %c0_42] : memref<256x256xbf16, #tpu.memory_space<vmem>>, vector<256x256xbf16>
    %cst_43 = arith.constant dense<0.000000e+00> : vector<4x256xf32>
    %59 = tpu.matmul %57, %58, %cst_43 {dimension_numbers = #tpu.dot_dimension_numbers<[1], [0], [0], [1], [0, 0, 1, 1], [], []>} : vector<4x256xbf16>, vector<256x256xbf16>, vector<4x256xf32> -> vector<4x256xf32>
    %c0_44 = arith.constant 0 : index
    %c0_45 = arith.constant 0 : index
    %60 = vector.load %arg16[%c0_44, %c0_45] : memref<1x256xf32, #tpu.memory_space<vmem>>, vector<1x256xf32>
    %61 = vector.broadcast %60 : vector<1x256xf32> to vector<4x256xf32>
    %62 = arith.addf %59, %61 : vector<4x256xf32>
    %cst_46 = arith.constant 0.000000e+00 : f32
    %63 = vector.broadcast %cst_46 : f32 to vector<4x256xf32>
    %64 = arith.maximumf %62, %63 : vector<4x256xf32>
    %65 = arith.truncf %64 : vector<4x256xf32> to vector<4x256xbf16>
    %c0_47 = arith.constant 0 : index
    %c0_48 = arith.constant 0 : index
    %66 = vector.load %arg17[%c0_47, %c0_48] : memref<256x256xbf16, #tpu.memory_space<vmem>>, vector<256x256xbf16>
    %cst_49 = arith.constant dense<0.000000e+00> : vector<4x256xf32>
    %67 = tpu.matmul %65, %66, %cst_49 {dimension_numbers = #tpu.dot_dimension_numbers<[1], [0], [0], [1], [0, 0, 1, 1], [], []>} : vector<4x256xbf16>, vector<256x256xbf16>, vector<4x256xf32> -> vector<4x256xf32>
    %c0_50 = arith.constant 0 : index
    %c0_51 = arith.constant 0 : index
    %68 = vector.load %arg18[%c0_50, %c0_51] : memref<1x256xf32, #tpu.memory_space<vmem>>, vector<1x256xf32>
    %69 = vector.broadcast %68 : vector<1x256xf32> to vector<4x256xf32>
    %70 = arith.addf %67, %69 : vector<4x256xf32>
    %71 = arith.addf %70, %56 : vector<4x256xf32>
    %cst_52 = arith.constant 0.000000e+00 : f32
    %72 = vector.broadcast %cst_52 : f32 to vector<4x256xf32>
    %73 = arith.maximumf %71, %72 : vector<4x256xf32>
    %74 = arith.truncf %73 : vector<4x256xf32> to vector<4x256xbf16>
    %c0_53 = arith.constant 0 : index
    %c0_54 = arith.constant 0 : index
    %75 = vector.load %arg23[%c0_53, %c0_54] : memref<256x128xbf16, #tpu.memory_space<vmem>>, vector<256x128xbf16>
    %cst_55 = arith.constant dense<0.000000e+00> : vector<4x128xf32>
    %76 = tpu.matmul %74, %75, %cst_55 {dimension_numbers = #tpu.dot_dimension_numbers<[1], [0], [0], [1], [0, 0, 1, 1], [], []>} : vector<4x256xbf16>, vector<256x128xbf16>, vector<4x128xf32> -> vector<4x128xf32>
    %c0_56 = arith.constant 0 : index
    %c0_57 = arith.constant 0 : index
    %77 = vector.load %arg24[%c0_56, %c0_57] : memref<1x128xf32, #tpu.memory_space<vmem>>, vector<1x128xf32>
    %78 = vector.broadcast %77 : vector<1x128xf32> to vector<4x128xf32>
    %79 = arith.addf %76, %78 : vector<4x128xf32>
    %c0_58 = arith.constant 0 : index
    %c0_59 = arith.constant 0 : index
    %80 = vector.load %arg19[%c0_58, %c0_59] : memref<256x128xbf16, #tpu.memory_space<vmem>>, vector<256x128xbf16>
    %cst_60 = arith.constant dense<0.000000e+00> : vector<4x128xf32>
    %81 = tpu.matmul %74, %80, %cst_60 {dimension_numbers = #tpu.dot_dimension_numbers<[1], [0], [0], [1], [0, 0, 1, 1], [], []>} : vector<4x256xbf16>, vector<256x128xbf16>, vector<4x128xf32> -> vector<4x128xf32>
    %c0_61 = arith.constant 0 : index
    %c0_62 = arith.constant 0 : index
    %82 = vector.load %arg20[%c0_61, %c0_62] : memref<1x128xf32, #tpu.memory_space<vmem>>, vector<1x128xf32>
    %83 = vector.broadcast %82 : vector<1x128xf32> to vector<4x128xf32>
    %84 = arith.addf %81, %83 : vector<4x128xf32>
    %cst_63 = arith.constant 0.000000e+00 : f32
    %85 = vector.broadcast %cst_63 : f32 to vector<4x128xf32>
    %86 = arith.maximumf %84, %85 : vector<4x128xf32>
    %87 = arith.truncf %86 : vector<4x128xf32> to vector<4x128xbf16>
    %c0_64 = arith.constant 0 : index
    %c0_65 = arith.constant 0 : index
    %88 = vector.load %arg21[%c0_64, %c0_65] : memref<128x128xbf16, #tpu.memory_space<vmem>>, vector<128x128xbf16>
    %cst_66 = arith.constant dense<0.000000e+00> : vector<4x128xf32>
    %89 = tpu.matmul %87, %88, %cst_66 {dimension_numbers = #tpu.dot_dimension_numbers<[1], [0], [0], [1], [0, 0, 1, 1], [], []>} : vector<4x128xbf16>, vector<128x128xbf16>, vector<4x128xf32> -> vector<4x128xf32>
    %c0_67 = arith.constant 0 : index
    %c0_68 = arith.constant 0 : index
    %90 = vector.load %arg22[%c0_67, %c0_68] : memref<1x128xf32, #tpu.memory_space<vmem>>, vector<1x128xf32>
    %91 = vector.broadcast %90 : vector<1x128xf32> to vector<4x128xf32>
    %92 = arith.addf %89, %91 : vector<4x128xf32>
    %93 = arith.addf %92, %79 : vector<4x128xf32>
    %cst_69 = arith.constant 0.000000e+00 : f32
    %94 = vector.broadcast %cst_69 : f32 to vector<4x128xf32>
    %95 = arith.maximumf %93, %94 : vector<4x128xf32>
    %96 = arith.truncf %95 : vector<4x128xf32> to vector<4x128xbf16>
    %c0_70 = arith.constant 0 : index
    %c0_71 = arith.constant 0 : index
    %97 = vector.load %arg25[%c0_70, %c0_71] : memref<128x128xbf16, #tpu.memory_space<vmem>>, vector<128x128xbf16>
    %cst_72 = arith.constant dense<0.000000e+00> : vector<4x128xf32>
    %98 = tpu.matmul %96, %97, %cst_72 {dimension_numbers = #tpu.dot_dimension_numbers<[1], [0], [0], [1], [0, 0, 1, 1], [], []>} : vector<4x128xbf16>, vector<128x128xbf16>, vector<4x128xf32> -> vector<4x128xf32>
    %c0_73 = arith.constant 0 : index
    %c0_74 = arith.constant 0 : index
    %99 = vector.load %arg26[%c0_73, %c0_74] : memref<1x128xf32, #tpu.memory_space<vmem>>, vector<1x128xf32>
    %100 = vector.broadcast %99 : vector<1x128xf32> to vector<4x128xf32>
    %101 = arith.addf %98, %100 : vector<4x128xf32>
    %cst_75 = arith.constant 0.000000e+00 : f32
    %102 = vector.broadcast %cst_75 : f32 to vector<4x128xf32>
    %103 = arith.maximumf %101, %102 : vector<4x128xf32>
    %104 = arith.truncf %103 : vector<4x128xf32> to vector<4x128xbf16>
    %c0_76 = arith.constant 0 : index
    %c0_77 = arith.constant 0 : index
    %105 = vector.load %arg27[%c0_76, %c0_77] : memref<128x128xbf16, #tpu.memory_space<vmem>>, vector<128x128xbf16>
    %cst_78 = arith.constant dense<0.000000e+00> : vector<4x128xf32>
    %106 = tpu.matmul %104, %105, %cst_78 {dimension_numbers = #tpu.dot_dimension_numbers<[1], [0], [0], [1], [0, 0, 1, 1], [], []>} : vector<4x128xbf16>, vector<128x128xbf16>, vector<4x128xf32> -> vector<4x128xf32>
    %c0_79 = arith.constant 0 : index
    %c0_80 = arith.constant 0 : index
    %107 = vector.load %arg28[%c0_79, %c0_80] : memref<1x128xf32, #tpu.memory_space<vmem>>, vector<1x128xf32>
    %108 = vector.broadcast %107 : vector<1x128xf32> to vector<4x128xf32>
    %109 = arith.addf %106, %108 : vector<4x128xf32>
    %110 = arith.addf %109, %95 : vector<4x128xf32>
    %cst_81 = arith.constant 0.000000e+00 : f32
    %111 = vector.broadcast %cst_81 : f32 to vector<4x128xf32>
    %112 = arith.maximumf %110, %111 : vector<4x128xf32>
    %113 = arith.truncf %112 : vector<4x128xf32> to vector<4x128xbf16>
    %c0_82 = arith.constant 0 : index
    %c0_83 = arith.constant 0 : index
    %114 = vector.load %arg33[%c0_82, %c0_83] : memref<128x64xbf16, #tpu.memory_space<vmem>>, vector<128x64xbf16>
    %cst_84 = arith.constant dense<0.000000e+00> : vector<4x64xf32>
    %115 = tpu.matmul %113, %114, %cst_84 {dimension_numbers = #tpu.dot_dimension_numbers<[1], [0], [0], [1], [0, 0, 1, 1], [], []>} : vector<4x128xbf16>, vector<128x64xbf16>, vector<4x64xf32> -> vector<4x64xf32>
    %c0_85 = arith.constant 0 : index
    %c0_86 = arith.constant 0 : index
    %116 = vector.load %arg34[%c0_85, %c0_86] : memref<1x64xf32, #tpu.memory_space<vmem>>, vector<1x64xf32>
    %117 = vector.broadcast %116 : vector<1x64xf32> to vector<4x64xf32>
    %118 = arith.addf %115, %117 : vector<4x64xf32>
    %c0_87 = arith.constant 0 : index
    %c0_88 = arith.constant 0 : index
    %119 = vector.load %arg29[%c0_87, %c0_88] : memref<128x64xbf16, #tpu.memory_space<vmem>>, vector<128x64xbf16>
    %cst_89 = arith.constant dense<0.000000e+00> : vector<4x64xf32>
    %120 = tpu.matmul %113, %119, %cst_89 {dimension_numbers = #tpu.dot_dimension_numbers<[1], [0], [0], [1], [0, 0, 1, 1], [], []>} : vector<4x128xbf16>, vector<128x64xbf16>, vector<4x64xf32> -> vector<4x64xf32>
    %c0_90 = arith.constant 0 : index
    %c0_91 = arith.constant 0 : index
    %121 = vector.load %arg30[%c0_90, %c0_91] : memref<1x64xf32, #tpu.memory_space<vmem>>, vector<1x64xf32>
    %122 = vector.broadcast %121 : vector<1x64xf32> to vector<4x64xf32>
    %123 = arith.addf %120, %122 : vector<4x64xf32>
    %cst_92 = arith.constant 0.000000e+00 : f32
    %124 = vector.broadcast %cst_92 : f32 to vector<4x64xf32>
    %125 = arith.maximumf %123, %124 : vector<4x64xf32>
    %126 = arith.truncf %125 : vector<4x64xf32> to vector<4x64xbf16>
    %c0_93 = arith.constant 0 : index
    %c0_94 = arith.constant 0 : index
    %127 = vector.load %arg31[%c0_93, %c0_94] : memref<64x64xbf16, #tpu.memory_space<vmem>>, vector<64x64xbf16>
    %cst_95 = arith.constant dense<0.000000e+00> : vector<4x64xf32>
    %128 = tpu.matmul %126, %127, %cst_95 {dimension_numbers = #tpu.dot_dimension_numbers<[1], [0], [0], [1], [0, 0, 1, 1], [], []>} : vector<4x64xbf16>, vector<64x64xbf16>, vector<4x64xf32> -> vector<4x64xf32>
    %c0_96 = arith.constant 0 : index
    %c0_97 = arith.constant 0 : index
    %129 = vector.load %arg32[%c0_96, %c0_97] : memref<1x64xf32, #tpu.memory_space<vmem>>, vector<1x64xf32>
    %130 = vector.broadcast %129 : vector<1x64xf32> to vector<4x64xf32>
    %131 = arith.addf %128, %130 : vector<4x64xf32>
    %132 = arith.addf %131, %118 : vector<4x64xf32>
    %cst_98 = arith.constant 0.000000e+00 : f32
    %133 = vector.broadcast %cst_98 : f32 to vector<4x64xf32>
    %134 = arith.maximumf %132, %133 : vector<4x64xf32>
    %135 = arith.truncf %134 : vector<4x64xf32> to vector<4x64xbf16>
    %c0_99 = arith.constant 0 : index
    %c0_100 = arith.constant 0 : index
    %136 = vector.load %arg35[%c0_99, %c0_100] : memref<64x64xbf16, #tpu.memory_space<vmem>>, vector<64x64xbf16>
    %cst_101 = arith.constant dense<0.000000e+00> : vector<4x64xf32>
    %137 = tpu.matmul %135, %136, %cst_101 {dimension_numbers = #tpu.dot_dimension_numbers<[1], [0], [0], [1], [0, 0, 1, 1], [], []>} : vector<4x64xbf16>, vector<64x64xbf16>, vector<4x64xf32> -> vector<4x64xf32>
    %c0_102 = arith.constant 0 : index
    %c0_103 = arith.constant 0 : index
    %138 = vector.load %arg36[%c0_102, %c0_103] : memref<1x64xf32, #tpu.memory_space<vmem>>, vector<1x64xf32>
    %139 = vector.broadcast %138 : vector<1x64xf32> to vector<4x64xf32>
    %140 = arith.addf %137, %139 : vector<4x64xf32>
    %cst_104 = arith.constant 0.000000e+00 : f32
    %141 = vector.broadcast %cst_104 : f32 to vector<4x64xf32>
    %142 = arith.maximumf %140, %141 : vector<4x64xf32>
    %143 = arith.truncf %142 : vector<4x64xf32> to vector<4x64xbf16>
    %c0_105 = arith.constant 0 : index
    %c0_106 = arith.constant 0 : index
    %144 = vector.load %arg37[%c0_105, %c0_106] : memref<64x64xbf16, #tpu.memory_space<vmem>>, vector<64x64xbf16>
    %cst_107 = arith.constant dense<0.000000e+00> : vector<4x64xf32>
    %145 = tpu.matmul %143, %144, %cst_107 {dimension_numbers = #tpu.dot_dimension_numbers<[1], [0], [0], [1], [0, 0, 1, 1], [], []>} : vector<4x64xbf16>, vector<64x64xbf16>, vector<4x64xf32> -> vector<4x64xf32>
    %c0_108 = arith.constant 0 : index
    %c0_109 = arith.constant 0 : index
    %146 = vector.load %arg38[%c0_108, %c0_109] : memref<1x64xf32, #tpu.memory_space<vmem>>, vector<1x64xf32>
    %147 = vector.broadcast %146 : vector<1x64xf32> to vector<4x64xf32>
    %148 = arith.addf %145, %147 : vector<4x64xf32>
    %149 = arith.addf %148, %134 : vector<4x64xf32>
    %cst_110 = arith.constant 0.000000e+00 : f32
    %150 = vector.broadcast %cst_110 : f32 to vector<4x64xf32>
    %151 = arith.maximumf %149, %150 : vector<4x64xf32>
    %c0_111 = arith.constant 0 : index
    %c0_112 = arith.constant 0 : index
    %152 = vector.load %arg39[%c0_111, %c0_112] : memref<64x64xf32, #tpu.memory_space<vmem>>, vector<64x64xf32>
    %cst_113 = arith.constant dense<0.000000e+00> : vector<4x64xf32>
    %153 = tpu.matmul %151, %152, %cst_113 {dimension_numbers = #tpu.dot_dimension_numbers<[1], [0], [0], [1], [0, 0, 1, 1], [], []>} : vector<4x64xf32>, vector<64x64xf32>, vector<4x64xf32> -> vector<4x64xf32>
    %c0_114 = arith.constant 0 : index
    %c0_115 = arith.constant 0 : index
    %154 = vector.load %arg40[%c0_114, %c0_115] : memref<1x64xf32, #tpu.memory_space<vmem>>, vector<1x64xf32>
    %155 = vector.broadcast %154 : vector<1x64xf32> to vector<4x64xf32>
    %156 = arith.addf %153, %155 : vector<4x64xf32>
    %c0_116 = arith.constant 0 : index
    %c0_117 = arith.constant 0 : index
    %157 = vector.load %arg45[%c0_116, %c0_117] : memref<4x64xf32, #tpu.memory_space<vmem>>, vector<4x64xf32>
    tpu.vector_store %arg45[%c0_116, %c0_117], %156 {strides = array<i32>} : memref<4x64xf32, #tpu.memory_space<vmem>>, vector<4x64xf32>,
    %c0_118 = arith.constant 0 : index
    %c0_119 = arith.constant 0 : index
    %158 = vector.load %arg41[%c0_118, %c0_119] : memref<64x32xf32, #tpu.memory_space<vmem>>, vector<64x32xf32>
    %cst_120 = arith.constant dense<0.000000e+00> : vector<4x32xf32>
    %159 = tpu.matmul %156, %158, %cst_120 {dimension_numbers = #tpu.dot_dimension_numbers<[1], [0], [0], [1], [0, 0, 1, 1], [], []>} : vector<4x64xf32>, vector<64x32xf32>, vector<4x32xf32> -> vector<4x32xf32>
    %c0_121 = arith.constant 0 : index
    %c0_122 = arith.constant 0 : index
    %160 = vector.load %arg42[%c0_121, %c0_122] : memref<1x32xf32, #tpu.memory_space<vmem>>, vector<1x32xf32>
    %161 = vector.broadcast %160 : vector<1x32xf32> to vector<4x32xf32>
    %162 = arith.addf %159, %161 : vector<4x32xf32>
    %cst_123 = arith.constant 0.000000e+00 : f32
    %163 = vector.broadcast %cst_123 : f32 to vector<4x32xf32>
    %164 = arith.maximumf %162, %163 : vector<4x32xf32>
    %c0_124 = arith.constant 0 : index
    %c0_125 = arith.constant 0 : index
    %165 = vector.load %arg43[%c0_124, %c0_125] : memref<32x32xf32, #tpu.memory_space<vmem>>, vector<32x32xf32>
    %cst_126 = arith.constant dense<0.000000e+00> : vector<4x32xf32>
    %166 = tpu.matmul %164, %165, %cst_126 {dimension_numbers = #tpu.dot_dimension_numbers<[1], [0], [0], [1], [0, 0, 1, 1], [], []>} : vector<4x32xf32>, vector<32x32xf32>, vector<4x32xf32> -> vector<4x32xf32>
    %c0_127 = arith.constant 0 : index
    %c0_128 = arith.constant 0 : index
    %167 = vector.load %arg44[%c0_127, %c0_128] : memref<1x32xf32, #tpu.memory_space<vmem>>, vector<1x32xf32>
    %168 = vector.broadcast %167 : vector<1x32xf32> to vector<4x32xf32>
    %169 = arith.addf %166, %168 : vector<4x32xf32>
    %170 = arith.mulf %169, %169 : vector<4x32xf32>
    %cst_129 = arith.constant dense<0.000000e+00> : vector<4xf32>
    %171 = vector.multi_reduction <add>, %170, %cst_129 [1] : vector<4x32xf32> to vector<4xf32>
    %172 = vector.shape_cast %171 : vector<4xf32> to vector<4x1xf32>
    %173 = math.sqrt %172 : vector<4x1xf32>
    %cst_130 = arith.constant 9.99999996E-13 : f32
    %174 = vector.broadcast %cst_130 : f32 to vector<4x1xf32>
    %175 = arith.maximumf %173, %174 : vector<4x1xf32>
    %176 = vector.broadcast %175 : vector<4x1xf32> to vector<4x32xf32>
    %177 = arith.divf %169, %176 : vector<4x32xf32>
    %c0_131 = arith.constant 0 : index
    %c0_132 = arith.constant 0 : index
    %178 = vector.load %arg46[%c0_131, %c0_132] : memref<4x32xf32, #tpu.memory_space<vmem>>, vector<4x32xf32>
    tpu.vector_store %arg46[%c0_131, %c0_132], %177 {strides = array<i32>} : memref<4x32xf32, #tpu.memory_space<vmem>>, vector<4x32xf32>,
    return
  }
}

</mosaic_0001>

<bundles_post_ra>
// kernel: stcrl_forward.2
= control target key start
LH: loop header
LB: loop body
LE: loop exit
PB: predicated region body
PF: predicated region fallthrough
CT: control target
= control target key end

     0   :  { %v822_v3 = vmov 0   ;;  %vm508_vm0 = vcmask 261120   ;;  %s1123_s1 = inlined_call_operand.vmem [shape: bf16[160,1024], index: 1, kind: input, shape index: {}]   ;;  %s1124_s0 = inlined_call_operand.vmem [shape: bf16[8,160], index: 0, kind: input, shape index: {}]   ;;  %s1125_s2 = inlined_call_operand.vmem [shape: f32[8,1], index: 2, kind: input, shape index: {}]   ;;  %s1126_s3 = inlined_call_operand.vmem [shape: bf16[8,1024], index: 3, kind: output, shape index: {}]  }
   0x1   :  { %v72_v0 = vld [vmem:[%s1123_s1 + $0x1c0] sm:$0xff]  ;;  %v73_v2 = vld [vmem:[%s1123_s1 + $0x1c8] sm:$0xff]  ;;  %819 = vset.pattern.permute.xlu0 %v822_v3 }
   0x2   :  { %v76_v1 = vld [vmem:[%s1123_s1 + $0x1e0] sm:$0xff]  ;;  %v77_v5 = vld [vmem:[%s1123_s1 + $0x1e8] sm:$0xff] }
   0x3   :  { %v783_v4 = vcombine.high %v72_v0, %v76_v1  ;;  %v782_v6 = vcombine.low %v72_v0, %v76_v1  ;;  %v64_v7 = vld [vmem:[%s1123_s1 + $0x180] sm:$0xff]  ;;  %v785_v9 = vcombine.high %v73_v2, %v77_v5  ;;  %v784_v10 = vcombine.low %v73_v2, %v77_v5  ;;  %v65_v12 = vld [vmem:[%s1123_s1 + $0x188] sm:$0xff] }
   0x4   :  { %v68_v8 = vld [vmem:[%s1123_s1 + $0x1a0] sm:$0xff]  ;;  %v69_v13 = vld [vmem:[%s1123_s1 + $0x1a8] sm:$0xff] }
   0x5   :  { %v775_v11 = vcombine.high %v64_v7, %v68_v8  ;;  %v56_v14 = vld [vmem:[%s1123_s1 + $0x140] sm:$0xff]  ;;  %512 = vmatprep.subr.bf16.mxu0 %v783_v4  ;;  %v777_v15 = vcombine.high %v65_v12, %v69_v13  ;;  %v57_v17 = vld [vmem:[%s1123_s1 + $0x148] sm:$0xff]  ;;  %553 = vmatprep.subr.bf16.mxu1 %v785_v9  ;;  %v774_v19 = vcombine.low %v64_v7, %v68_v8 }
   0x6   :  { %v60_v16 = vld [vmem:[%s1123_s1 + $0x160] sm:$0xff]  ;;  %v61_v18 = vld [vmem:[%s1123_s1 + $0x168] sm:$0xff]  ;;  %513 = vmatpush1.bf16.msra.mxu0 %v782_v6  ;;  %554 = vmatpush1.bf16.msra.mxu1 %v784_v10  ;;  %v776_v20 = vcombine.low %v65_v12, %v69_v13 }
   0x7   :  { %514 = vmatprep.subr.bf16.mxu0 %v775_v11  ;;  %v767_v21 = vcombine.high %v56_v14, %v60_v16  ;;  %555 = vmatprep.subr.bf16.mxu1 %v777_v15  ;;  %v769_v22 = vcombine.high %v57_v17, %v61_v18  ;;  %v48_v23 = vld [vmem:[%s1123_s1 + $0x100] sm:$0xff]  ;;  %v49_v25 = vld [vmem:[%s1123_s1 + $0x108] sm:$0xff]  ;;  %v766_v27 = vcombine.low %v56_v14, %v60_v16 }
   0x8   :  { %v52_v24 = vld [vmem:[%s1123_s1 + $0x120] sm:$0xff]  ;;  %v53_v26 = vld [vmem:[%s1123_s1 + $0x128] sm:$0xff]  ;;  %v768_v28 = vcombine.low %v57_v17, %v61_v18  ;;  %v74_v18 = vld [vmem:[%s1123_s1 + $0x1d0] sm:$0xff] }
   0x9   :  { %v759_v29 = vcombine.high %v48_v23, %v52_v24  ;;  %v761_v30 = vcombine.high %v49_v25, %v53_v26  ;;  %v40_v31 = vld [vmem:[%s1123_s1 + $0xc0] sm:$0xff]  ;;  %v41_v33 = vld [vmem:[%s1123_s1 + $0xc8] sm:$0xff]  ;;  %v758_v35 = vcombine.low %v48_v23, %v52_v24  ;;  %v760_v36 = vcombine.low %v49_v25, %v53_v26  ;;  %v66_v26 = vld [vmem:[%s1123_s1 + $0x190] sm:$0xff] }
   0xa   :  { %515 = vmatpush1.bf16.msra.mxu0 %v774_v19  ;;  %556 = vmatpush1.bf16.msra.mxu1 %v776_v20  ;;  %v44_v32 = vld [vmem:[%s1123_s1 + $0xe0] sm:$0xff]  ;;  %v45_v34 = vld [vmem:[%s1123_s1 + $0xe8] sm:$0xff]  ;;  %v78_v19 = vld [vmem:[%s1123_s1 + $0x1f0] sm:$0xff] }
   0xb   :  { %516 = vmatprep.subr.bf16.mxu0 %v767_v21  ;;  %557 = vmatprep.subr.bf16.mxu1 %v769_v22  ;;  %v751_v37 = vcombine.high %v40_v31, %v44_v32  ;;  %v906_v38 = vld [vmem:[%s1124_s0] sm:$0xff]  ;;  %v753_v39 = vcombine.high %v41_v33, %v45_v34  ;;  %v33_v43 = vld [vmem:[%s1123_s1 + $0x88] sm:$0xff]  ;;  %v750_v45 = vcombine.low %v40_v31, %v44_v32  ;;  %v75_v20 = vld [vmem:[%s1123_s1 + $0x1d8] sm:$0xff] }
   0xc   :  { %v32_v40 = vld [vmem:[%s1123_s1 + $0x80] sm:$0xff]  ;;  %v916_v42 = vcombine.high %v906_v38, %v906_v38  ;;  %v37_v44 = vld [vmem:[%s1123_s1 + $0xa8] sm:$0xff]  ;;  %v752_v46 = vcombine.low %v41_v33, %v45_v34  ;;  %v79_v21 = vld [vmem:[%s1123_s1 + $0x1f8] sm:$0xff]  ;;  %v787_v24 = vcombine.high %v74_v18, %v78_v19  ;;  %v786_v31 = vcombine.low %v74_v18, %v78_v19 }
   0xd   :  { %v36_v41 = vld [vmem:[%s1123_s1 + $0xa0] sm:$0xff]  ;;  %v745_v48 = vcombine.high %v33_v43, %v37_v44  ;;  %v25_v51 = vld [vmem:[%s1123_s1 + $0x48] sm:$0xff]  ;;  %v744_v54 = vcombine.low %v33_v43, %v37_v44  ;;  %v789_v25 = vcombine.high %v75_v20, %v79_v21  ;;  %v788_v32 = vcombine.low %v75_v20, %v79_v21  ;;  %v50_v44 = vld [vmem:[%s1123_s1 + $0x110] sm:$0xff] }
   0xe   :  { %517 = vmatpush1.bf16.msra.mxu0 %v766_v27  ;;  %558 = vmatpush1.bf16.msra.mxu1 %v768_v28  ;;  %v743_v47 = vcombine.high %v32_v40, %v36_v41  ;;  %v24_v49 = vld [vmem:[%s1123_s1 + $0x40] sm:$0xff]  ;;  %v29_v52 = vld [vmem:[%s1123_s1 + $0x68] sm:$0xff]  ;;  %v742_v53 = vcombine.low %v32_v40, %v36_v41  ;;  %v70_v27 = vld [vmem:[%s1123_s1 + $0x1b0] sm:$0xff]  ;;  %v999_v28 = vcombine.low %v906_v38, %v906_v38 }
   0xf   :  { %518 = vmatprep.subr.bf16.mxu0 %v759_v29  ;;  %559 = vmatprep.subr.bf16.mxu1 %v761_v30  ;;  %v28_v50 = vld [vmem:[%s1123_s1 + $0x60] sm:$0xff]  ;;  %v737_v56 = vcombine.high %v25_v51, %v29_v52  ;;  %v17_v59 = vld [vmem:[%s1123_s1 + $0x8] sm:$0xff]  ;;  %v736_v62 = vcombine.low %v25_v51, %v29_v52  ;;  %v67_v29 = vld [vmem:[%s1123_s1 + $0x198] sm:$0xff]  ;;  %v779_v33 = vcombine.high %v66_v26, %v70_v27 }
  0x10   :  { %806 = vmatprep.mubr.msk.bf16.mxu0 %vm508_vm0, %v916_v42  ;;  %807 = vmatprep.mubr.msk.bf16.mxu1 %vm508_vm0, %v916_v42  ;;  %v735_v55 = vcombine.high %v24_v49, %v28_v50  ;;  %v16_v57 = vld [vmem:[%s1123_s1] sm:$0xff]  ;;  %v21_v60 = vld [vmem:[%s1123_s1 + $0x28] sm:$0xff]  ;;  %v734_v61 = vcombine.low %v24_v49, %v28_v50  ;;  %v71_v30 = vld [vmem:[%s1123_s1 + $0x1b8] sm:$0xff] }
  0x11   :  { %v20_v58 = vld [vmem:[%s1123_s1 + $0x20] sm:$0xff]  ;;  %v729_v0 = vcombine.high %v17_v59, %v21_v60  ;;  %v89_v3 = vld [vmem:[%s1123_s1 + $0x248] sm:$0xff]  ;;  %v728_v7 = vcombine.low %v17_v59, %v21_v60  ;;  %v781_v34 = vcombine.high %v67_v29, %v71_v30  ;;  %v63_v38 = vld [vmem:[%s1123_s1 + $0x178] sm:$0xff]  ;;  %v780_v40 = vcombine.low %v67_v29, %v71_v30 }
  0x12   :  { %519 = vmatpush1.bf16.msra.mxu0 %v758_v35  ;;  %560 = vmatpush1.bf16.msra.mxu1 %v760_v36  ;;  %v727_v63 = vcombine.high %v16_v57, %v20_v58  ;;  %v88_v1 = vld [vmem:[%s1123_s1 + $0x240] sm:$0xff]  ;;  %v93_v4 = vld [vmem:[%s1123_s1 + $0x268] sm:$0xff]  ;;  %v726_v6 = vcombine.low %v16_v57, %v20_v58  ;;  %v58_v35 = vld [vmem:[%s1123_s1 + $0x150] sm:$0xff] }
  0x13   :  { %520 = vmatprep.subr.bf16.mxu0 %v751_v37  ;;  %561 = vmatprep.subr.bf16.mxu1 %v753_v39  ;;  %v92_v2 = vld [vmem:[%s1123_s1 + $0x260] sm:$0xff]  ;;  %v801_v9 = vcombine.high %v89_v3, %v93_v4  ;;  %v81_v12 = vld [vmem:[%s1123_s1 + $0x208] sm:$0xff]  ;;  %v800_v15 = vcombine.low %v89_v3, %v93_v4  ;;  %v62_v36 = vld [vmem:[%s1123_s1 + $0x170] sm:$0xff]  ;;  %v778_v39 = vcombine.low %v66_v26, %v70_v27 }
  0x14   :  { %v96_v5 = vld [vmem:[%s1125_s2] sm:$0xff]  ;;  %v799_v8 = vcombine.high %v88_v1, %v92_v2  ;;  %v85_v13 = vld [vmem:[%s1123_s1 + $0x228] sm:$0xff]  ;;  %v798_v14 = vcombine.low %v88_v1, %v92_v2  ;;  %v59_v37 = vld [vmem:[%s1123_s1 + $0x158] sm:$0xff]  ;;  %v771_v41 = vcombine.high %v58_v35, %v62_v36 }
  0x15   :  { %99 = vperm.xlu0 %819, %v96_v5   ;;  %v80_v10 = vld [vmem:[%s1123_s1 + $0x200] sm:$0xff]  ;;  %v793_v17 = vcombine.high %v81_v12, %v85_v13  ;;  %v792_v23 = vcombine.low %v81_v12, %v85_v13  ;;  %v773_v43 = vcombine.high %v59_v37, %v63_v38  ;;  %v772_v49 = vcombine.low %v59_v37, %v63_v38  ;;  %v42_v52 = vld [vmem:[%s1123_s1 + $0xd0] sm:$0xff]  ;;  %v27_v5 = vld [vmem:[%s1123_s1 + $0x58] sm:$0xff] }
  0x16   :  { %521 = vmatpush1.bf16.msra.mxu0 %v750_v45  ;;  %562 = vmatpush1.bf16.msra.mxu1 %v752_v46  ;;  %v84_v11 = vld [vmem:[%s1123_s1 + $0x220] sm:$0xff]  ;;  %v54_v45 = vld [vmem:[%s1123_s1 + $0x130] sm:$0xff]  ;;  %v51_v46 = vld [vmem:[%s1123_s1 + $0x118] sm:$0xff] }
  0x17   :  { %522 = vmatprep.subr.bf16.mxu0 %v743_v47  ;;  %563 = vmatprep.subr.bf16.mxu1 %v745_v48  ;;  %v791_v16 = vcombine.high %v80_v10, %v84_v11  ;;  %v790_v22 = vcombine.low %v80_v10, %v84_v11  ;;  %v55_v47 = vld [vmem:[%s1123_s1 + $0x138] sm:$0xff]  ;;  %v770_v48 = vcombine.low %v58_v35, %v62_v36  ;;  %v34_v59 = vld [vmem:[%s1123_s1 + $0x90] sm:$0xff] }
  0x18   :  { %v763_v50 = vcombine.high %v50_v44, %v54_v45  ;;  %v765_v51 = vcombine.high %v51_v46, %v55_v47  ;;  %v38_v60 = vld [vmem:[%s1123_s1 + $0xb0] sm:$0xff]  ;;  %v19_v13 = vld [vmem:[%s1123_s1 + $0x18] sm:$0xff] }
  0x19   :  { %v747_v1 = vcombine.high %v34_v59, %v38_v60  ;;  %v26_v3 = vld [vmem:[%s1123_s1 + $0x50] sm:$0xff]  ;;  %v91_v21 = vld [vmem:[%s1123_s1 + $0x258] sm:$0xff] }
  0x1a   :  { %523 = vmatpush1.bf16.msra.mxu0 %v742_v53  ;;  %564 = vmatpush1.bf16.msra.mxu1 %v744_v54  ;;  %v46_v53 = vld [vmem:[%s1123_s1 + $0xf0] sm:$0xff]  ;;  %v47_v54 = vld [vmem:[%s1123_s1 + $0xf8] sm:$0xff] }
  0x1b   :  { %524 = vmatprep.subr.bf16.mxu0 %v735_v55  ;;  %565 = vmatprep.subr.bf16.mxu1 %v737_v56  ;;  %v762_v55 = vcombine.low %v50_v44, %v54_v45  ;;  %v764_v56 = vcombine.low %v51_v46, %v55_v47  ;;  %v755_v57 = vcombine.high %v42_v52, %v46_v53  ;;  %v30_v4 = vld [vmem:[%s1123_s1 + $0x70] sm:$0xff]  ;;  %v83_v30 = vld [vmem:[%s1123_s1 + $0x218] sm:$0xff] }
  0x1c   :  { %v18_v11 = vld [vmem:[%s1123_s1 + $0x10] sm:$0xff] }
  0x1d   :  { %v22_v12 = vld [vmem:[%s1123_s1 + $0x30] sm:$0xff] }
  0x1e   :  { %525 = vmatpush1.bf16.msra.mxu0 %v734_v61  ;;  %566 = vmatpush1.bf16.msra.mxu1 %v736_v62  ;;  %v35_v61 = vld [vmem:[%s1123_s1 + $0x98] sm:$0xff]  ;;  %v90_v19 = vld [vmem:[%s1123_s1 + $0x250] sm:$0xff] }
  0x1f   :  { %526 = vmatprep.subr.bf16.mxu0 %v727_v63  ;;  %567 = vmatprep.subr.bf16.mxu1 %v729_v0  ;;  %v39_v62 = vld [vmem:[%s1123_s1 + $0xb8] sm:$0xff]  ;;  %v754_v63 = vcombine.low %v42_v52, %v46_v53  ;;  %v94_v20 = vld [vmem:[%s1123_s1 + $0x270] sm:$0xff] }
  0x20   :  { %v749_v2 = vcombine.high %v35_v61, %v39_v62  ;;  %v82_v27 = vld [vmem:[%s1123_s1 + $0x210] sm:$0xff] }
  0x21   :  { %v86_v29 = vld [vmem:[%s1123_s1 + $0x230] sm:$0xff] }
  0x22   :  { %527 = vmatpush1.bf16.msra.mxu0 %v726_v6  ;;  %568 = vmatpush1.bf16.msra.mxu1 %v728_v7  ;;  %v31_v6 = vld [vmem:[%s1123_s1 + $0x78] sm:$0xff]  ;;  %v746_v7 = vcombine.low %v34_v59, %v38_v60  ;;  %v794_v36 = vcombine.low %v82_v27, %v86_v29 }
  0x23   :  { %540 = vmatprep.subr.bf16.mxu0 %v799_v8  ;;  %581 = vmatprep.subr.bf16.mxu1 %v801_v9  ;;  %v748_v8 = vcombine.low %v35_v61, %v39_v62  ;;  %v739_v9 = vcombine.high %v26_v3, %v30_v4  ;;  %v741_v10 = vcombine.high %v27_v5, %v31_v6 }
  0x26   :  { %541 = vmatpush2.bf16.msra.mxu0 %v798_v14  ;;  %582 = vmatpush2.bf16.msra.mxu1 %v800_v15  ;;  %v23_v14 = vld [vmem:[%s1123_s1 + $0x38] sm:$0xff]  ;;  %v738_v15 = vcombine.low %v26_v3, %v30_v4 }
  0x27   :  { %542 = vmatprep.subr.bf16.mxu0 %v791_v16  ;;  %583 = vmatprep.subr.bf16.mxu1 %v793_v17  ;;  %v740_v16 = vcombine.low %v27_v5, %v31_v6  ;;  %v731_v17 = vcombine.high %v18_v11, %v22_v12  ;;  %v733_v18 = vcombine.high %v19_v13, %v23_v14 }
  0x2a   :  { %543 = vmatpush2.bf16.msra.mxu0 %v790_v22  ;;  %584 = vmatpush2.bf16.msra.mxu1 %v792_v23  ;;  %v95_v22 = vld [vmem:[%s1123_s1 + $0x278] sm:$0xff]  ;;  %v730_v23 = vcombine.low %v18_v11, %v22_v12 }
  0x2b   :  { %594 = vmatprep.subr.bf16.mxu0 %v787_v24  ;;  %635 = vmatprep.subr.bf16.mxu1 %v789_v25  ;;  %v732_v24 = vcombine.low %v19_v13, %v23_v14  ;;  %v803_v25 = vcombine.high %v90_v19, %v94_v20  ;;  %v805_v26 = vcombine.high %v91_v21, %v95_v22 }
  0x2d   :  { %545 = vmatmul.mubr.bf16.vlgmr.msra.gmra.mxu0 %v999_v28  ;;  %586 = vmatmul.mubr.bf16.vlgmr.msra.gmra.mxu1 %v999_v28 }
  0x2e   :  { %595 = vmatpush1.bf16.msra.mxu0 %v786_v31  ;;  %636 = vmatpush1.bf16.msra.mxu1 %v788_v32  ;;  %v87_v31 = vld [vmem:[%s1123_s1 + $0x238] sm:$0xff]  ;;  %v802_v32 = vcombine.low %v90_v19, %v94_v20 }
  0x2f   :  { %596 = vmatprep.subr.bf16.mxu0 %v779_v33  ;;  %637 = vmatprep.subr.bf16.mxu1 %v781_v34  ;;  %v804_v33 = vcombine.low %v91_v21, %v95_v22  ;;  %v795_v34 = vcombine.high %v82_v27, %v86_v29  ;;  %v797_v35 = vcombine.high %v83_v30, %v87_v31 }
  0x30   :  { %808 = vmatprep.mubr.msk.bf16.mxu0 %vm508_vm0, %v916_v42  ;;  %809 = vmatprep.mubr.msk.bf16.mxu1 %vm508_vm0, %v916_v42  ;;  %v43_v42 = vld [vmem:[%s1123_s1 + $0xd8] sm:$0xff]  ;;  %v796_v37 = vcombine.low %v83_v30, %v87_v31 }
  0x31   :  { %v757_v58 = vcombine.high %v43_v42, %v47_v54  ;;  %v756_v0 = vcombine.low %v43_v42, %v47_v54 }
  0x32   :  { %597 = vmatpush1.bf16.msra.mxu0 %v778_v39  ;;  %638 = vmatpush1.bf16.msra.mxu1 %v780_v40 }
  0x33   :  { %598 = vmatprep.subr.bf16.mxu0 %v771_v41  ;;  %639 = vmatprep.subr.bf16.mxu1 %v773_v43 }
  0x36   :  { %599 = vmatpush1.bf16.msra.mxu0 %v770_v48  ;;  %640 = vmatpush1.bf16.msra.mxu1 %v772_v49 }
  0x37   :  { %600 = vmatprep.subr.bf16.mxu0 %v763_v50  ;;  %641 = vmatprep.subr.bf16.mxu1 %v765_v51 }
  0x3a   :  { %601 = vmatpush1.bf16.msra.mxu0 %v762_v55  ;;  %642 = vmatpush1.bf16.msra.mxu1 %v764_v56 }
  0x3b   :  { %602 = vmatprep.subr.bf16.mxu0 %v755_v57  ;;  %643 = vmatprep.subr.bf16.mxu1 %v757_v58 }
  0x3e   :  { %603 = vmatpush1.bf16.msra.mxu0 %v754_v63  ;;  %644 = vmatpush1.bf16.msra.mxu1 %v756_v0 }
  0x3f   :  { %604 = vmatprep.subr.bf16.mxu0 %v747_v1  ;;  %645 = vmatprep.subr.bf16.mxu1 %v749_v2 }
  0x42   :  { %605 = vmatpush1.bf16.msra.mxu0 %v746_v7  ;;  %646 = vmatpush1.bf16.msra.mxu1 %v748_v8 }
  0x43   :  { %606 = vmatprep.subr.bf16.mxu0 %v739_v9  ;;  %647 = vmatprep.subr.bf16.mxu1 %v741_v10 }
  0x46   :  { %607 = vmatpush1.bf16.msra.mxu0 %v738_v15  ;;  %648 = vmatpush1.bf16.msra.mxu1 %v740_v16 }
  0x47   :  { %608 = vmatprep.subr.bf16.mxu0 %v731_v17  ;;  %649 = vmatprep.subr.bf16.mxu1 %v733_v18 }
  0x4a   :  { %609 = vmatpush1.bf16.msra.mxu0 %v730_v23  ;;  %650 = vmatpush1.bf16.msra.mxu1 %v732_v24 }
  0x4b   :  { %622 = vmatprep.subr.bf16.mxu0 %v803_v25  ;;  %663 = vmatprep.subr.bf16.mxu1 %v805_v26 }
  0x4e   :  { %623 = vmatpush2.bf16.msra.mxu0 %v802_v32  ;;  %664 = vmatpush2.bf16.msra.mxu1 %v804_v33 }
  0x4f   :  { %624 = vmatprep.subr.bf16.mxu0 %v795_v34  ;;  %665 = vmatprep.subr.bf16.mxu1 %v797_v35 }
  0x52   :  { %625 = vmatpush2.bf16.msra.mxu0 %v794_v36  ;;  %666 = vmatpush2.bf16.msra.mxu1 %v796_v37 }
  0x55   :  { %627 = vmatmul.mubr.bf16.vlgmr.msra.gmra.mxu0 %v999_v28  ;;  %668 = vmatmul.mubr.bf16.vlgmr.msra.gmra.mxu1 %v999_v28 }
  0x90   :  { %v100_v38 = vpop.permute.xlu0 %99 }
  0xed   :  { %v546_v39 = vpop.f32.mrf.mxu0  ;;  %v587_v40 = vpop.f32.mrf.mxu1 }
  0xee   :  { %v547_v41 = vadd.f32 %v546_v39, %v100_v38  ;;  %v588_v44 = vadd.f32 %v587_v40, %v100_v38 }
  0xef   :  { %v548_v43 = vpop.f32.mrf.mxu0  ;;  %v589_v47 = vpop.f32.mrf.mxu1 }
  0xf0   :  { %v549_v45 = vadd.f32 %v548_v43, %v100_v38  ;;  %v676_v46 = vmax.f32 %v547_v41, 0.0  ;;  %v590_v48 = vadd.f32 %v589_v47, %v100_v38  ;;  %v678_v49 = vmax.f32 %v588_v44, 0.0 }
  0xf1   :  { %v550_v50 = vpop.f32.mrf.mxu0  ;;  %v591_v52 = vpop.f32.mrf.mxu1 }
  0xf2   :  { %v677_v51 = vmax.f32 %v549_v45, 0.0  ;;  %v679_v53 = vmax.f32 %v590_v48, 0.0 }
  0xf3   :  { %v551_v42 = vpop.f32.mrf.mxu0  ;;  %v592_v55 = vpop.f32.mrf.mxu1 }
  0xf4   :  { %v814_v54 = vpack.c.bf16 %v677_v51, %v676_v46  ;;  %v815_v56 = vpack.c.bf16 %v679_v53, %v678_v49 }
  0xf6   :  { %716 = vst [vmem:[%s1126_s3] sm:$0xff] %v814_v54  ;;  %717 = vst [vmem:[%s1126_s3 + $0x8] sm:$0xff] %v815_v56 }
 0x115   :  { %v628_v28 = vpop.f32.mrf.mxu0  ;;  %v669_v58 = vpop.f32.mrf.mxu1 }
 0x116   :  { %v629_v57 = vadd.f32 %v628_v28, %v100_v38  ;;  %v670_v59 = vadd.f32 %v669_v58, %v100_v38 }
 0x117   :  { %v630_v60 = vpop.f32.mrf.mxu0  ;;  %v671_v62 = vpop.f32.mrf.mxu1 }
 0x118   :  { %v631_v61 = vadd.f32 %v630_v60, %v100_v38  ;;  %v672_v63 = vadd.f32 %v671_v62, %v100_v38  ;;  %v680_v1 = vmax.f32 %v629_v57, 0.0  ;;  %v682_v4 = vmax.f32 %v670_v59, 0.0 }
 0x119   :  { %v632_v0 = vpop.f32.mrf.mxu0  ;;  %v673_v3 = vpop.f32.mrf.mxu1 }
 0x11a   :  { %v681_v2 = vmax.f32 %v631_v61, 0.0  ;;  %v683_v5 = vmax.f32 %v672_v63, 0.0 }
 0x11b   :  { %v633_v6 = vpop.f32.mrf.mxu0  ;;  %v674_v8 = vpop.f32.mrf.mxu1 }
 0x11c   :  { %v816_v7 = vpack.c.bf16 %v681_v2, %v680_v1  ;;  %v817_v9 = vpack.c.bf16 %v683_v5, %v682_v4 }
 0x11e   :  { %718 = vst [vmem:[%s1126_s3 + $0x10] sm:$0xff] %v816_v7  ;;  %719 = vst [vmem:[%s1126_s3 + $0x18] sm:$0xff] %v817_v9 }

// kernel: stcrl_forward.3
= control target key start
LH: loop header
LB: loop body
LE: loop exit
PB: predicated region body
PF: predicated region fallthrough
CT: control target
= control target key end

     0   :  { %s9827_s6 = smov 1   ;;  %s9828_s10 = smov 2   ;;  %s11270_s0 = inlined_call_operand.smem [shape: u32[47], index: -1, kind: input, shape index: {}] }
   0x1   :  { %s9888_s5 = sld [smem:[%s11270_s0]]   ;;  %s9829_s14 = smov 3  }
   0x2   :  { %s9893_s9 = sld [smem:[%s11270_s0 + %s9827_s6]]   ;;  %s9830_s18 = smov 4  }
   0x3   :  { %s9898_s13 = sld [smem:[%s11270_s0 + %s9828_s10]]   ;;  %s9831_s22 = smov 5  }
   0x4   :  { %s9903_s17 = sld [smem:[%s11270_s0 + %s9829_s14]]   ;;  %s9832_s26 = smov 6  }
   0x5   :  { %s9908_s21 = sld [smem:[%s11270_s0 + %s9830_s18]]   ;;  %s9833_s30 = smov 7  }
   0x6   :  { %s9913_s25 = sld [smem:[%s11270_s0 + %s9831_s22]]   ;;  %s9834_s4 = smov 8  }
   0x7   :  { %s9918_s29 = sld [smem:[%s11270_s0 + %s9832_s26]]   ;;  %s9835_s10 = smov 9  }
   0x8   :  { %s9923_s3 = sld [smem:[%s11270_s0 + %s9833_s30]]   ;;  %s9836_s15 = smov 10  }
   0x9   :  { %s9928_s8 = sld [smem:[%s11270_s0 + %s9834_s4]]   ;;  %s9837_s20 = smov 11  }
   0xa   :  { %s9933_s14 = sld [smem:[%s11270_s0 + %s9835_s10]]   ;;  %s9838_s26 = smov 12  }
   0xb   :  { %s9938_s19 = sld [smem:[%s11270_s0 + %s9836_s15]]   ;;  %s9839_s1 = smov 13  }
   0xc   :  { %s9943_s24 = sld [smem:[%s11270_s0 + %s9837_s20]]   ;;  %s9840_s7 = smov 14  }
   0xd   :  { %s9948_s30 = sld [smem:[%s11270_s0 + %s9838_s26]]   ;;  %s9841_s15 = smov 15  }
   0xe   :  { %s9953_s6 = sld [smem:[%s11270_s0 + %s9839_s1]]   ;;  %s9842_s22 = smov 16  }
   0xf   :  { %s9958_s12 = sld [smem:[%s11270_s0 + %s9840_s7]]   ;;  %s9843_s28 = smov 17  }
  0x10   :  { %s9963_s20 = sld [smem:[%s11270_s0 + %s9841_s15]]   ;;  %s9844_s7 = smov 18  }
  0x11   :  { %11286 = sst [smem:[#allocation12_spill]] %s9938_s19  ;;  %s9845_s15 = smov 19  }
  0x12   :  { %11287 = sst [smem:[#allocation13_spill]] %s9943_s24 }
  0x13   :  { %11288 = sst [smem:[#allocation14_spill]] %s9948_s30 }
  0x14   :  { %s9968_s27 = sld [smem:[%s11270_s0 + %s9842_s22]]   ;;  %s9846_s22 = smov 20  }
  0x15   :  { %11289 = sst [smem:[#allocation15_spill]] %s9958_s12 }
  0x16   :  { %11290 = sst [smem:[#allocation16_spill]] %s9963_s20 }
  0x17   :  { %s9973_s4 = sld [smem:[%s11270_s0 + %s9843_s28]]   ;;  %s9847_s28 = smov 21  }
  0x18   :  { %s9978_s30 = sld [smem:[%s11270_s0 + %s9844_s7]]   ;;  %s9848_s7 = smov 22  }
  0x19   :  { %s9983_s19 = sld [smem:[%s11270_s0 + %s9845_s15]]   ;;  %s9849_s15 = smov 23  }
  0x1a   :  { %11291 = sst [smem:[#allocation17_spill]] %s9968_s27 }
  0x1b   :  { %s9988_s27 = sld [smem:[%s11270_s0 + %s9846_s22]]   ;;  %s9850_s22 = smov 24  }
  0x1d   :  { %11292 = sst [smem:[#allocation18_spill]] %s9973_s4 }
  0x1e   :  { %11293 = sst [smem:[#allocation19_spill]] %s9978_s30 }
  0x1f   :  { %11294 = sst [smem:[#allocation20_spill]] %s9983_s19 }
  0x20   :  { %s9993_s4 = sld [smem:[%s11270_s0 + %s9847_s28]]   ;;  %s9851_s28 = smov 25  }
  0x21   :  { %11295 = sst [smem:[#allocation21_spill]] %s9988_s27 }
  0x22   :  { %s9998_s30 = sld [smem:[%s11270_s0 + %s9848_s7]]   ;;  %s9852_s7 = smov 26  }
  0x23   :  { %s10003_s19 = sld [smem:[%s11270_s0 + %s9849_s15]]   ;;  %s9853_s15 = smov 27  }
  0x24   :  { %s10008_s27 = sld [smem:[%s11270_s0 + %s9850_s22]]   ;;  %s9854_s22 = smov 28  }
  0x26   :  { %11296 = sst [smem:[#allocation22_spill]] %s9993_s4 }
  0x27   :  { %s10013_s4 = sld [smem:[%s11270_s0 + %s9851_s28]]   ;;  %s9855_s28 = smov 29  }
  0x28   :  { %11297 = sst [smem:[#allocation23_spill]] %s9998_s30 }
  0x29   :  { %11298 = sst [smem:[#allocation24_spill]] %s10003_s19 }
  0x2a   :  { %11299 = sst [smem:[#allocation25_spill]] %s10008_s27 }
  0x2b   :  { %s10018_s30 = sld [smem:[%s11270_s0 + %s9852_s7]]   ;;  %s9856_s7 = smov 30  }
  0x2c   :  { %s10023_s19 = sld [smem:[%s11270_s0 + %s9853_s15]]   ;;  %s9857_s15 = smov 31  }
  0x2d   :  { %11300 = sst [smem:[#allocation26_spill]] %s10013_s4 }
  0x2e   :  { %s10028_s27 = sld [smem:[%s11270_s0 + %s9854_s22]]   ;;  %s9858_s22 = smov 32  }
  0x2f   :  { %s10033_s4 = sld [smem:[%s11270_s0 + %s9855_s28]]   ;;  %s9859_s28 = smov 33  }
  0x31   :  { %11301 = sst [smem:[#allocation27_spill]] %s10018_s30 }
  0x32   :  { %11302 = sst [smem:[#allocation28_spill]] %s10023_s19 }
  0x33   :  { %s10038_s30 = sld [smem:[%s11270_s0 + %s9856_s7]]   ;;  %s9860_s7 = smov 34  }
  0x34   :  { %11303 = sst [smem:[#allocation29_spill]] %s10028_s27 }
  0x35   :  { %11304 = sst [smem:[#allocation30_spill]] %s10033_s4 }
  0x36   :  { %s10043_s19 = sld [smem:[%s11270_s0 + %s9857_s15]]   ;;  %s9861_s15 = smov 35  }
  0x37   :  { %s10048_s27 = sld [smem:[%s11270_s0 + %s9858_s22]]   ;;  %s9862_s22 = smov 36  }
  0x38   :  { %s10053_s4 = sld [smem:[%s11270_s0 + %s9859_s28]]   ;;  %s9863_s28 = smov 37  }
  0x39   :  { %11305 = sst [smem:[#allocation31_spill]] %s10038_s30 }
  0x3a   :  { %s10058_s30 = sld [smem:[%s11270_s0 + %s9860_s7]]   ;;  %s9864_s7 = smov 38  }
  0x3c   :  { %11306 = sst [smem:[#allocation32_spill]] %s10043_s19 }
  0x3d   :  { %11307 = sst [smem:[#allocation33_spill]] %s10048_s27 }
  0x3e   :  { %11308 = sst [smem:[#allocation34_spill]] %s10053_s4 }
  0x3f   :  { %s10063_s19 = sld [smem:[%s11270_s0 + %s9861_s15]]   ;;  %s9865_s15 = smov 39  }
  0x40   :  { %11309 = sst [smem:[#allocation35_spill]] %s10058_s30 }
  0x41   :  { %s10068_s27 = sld [smem:[%s11270_s0 + %s9862_s22]]   ;;  %s9866_s22 = smov 40  }
  0x42   :  { %s10073_s4 = sld [smem:[%s11270_s0 + %s9863_s28]]   ;;  %s9867_s28 = smov 41  }
  0x43   :  { %s10078_s30 = sld [smem:[%s11270_s0 + %s9864_s7]]   ;;  %s9868_s7 = smov 42  }
  0x44   :  { %s10098_s12 = sld [smem:[%s11270_s0 + %s9868_s7]]   ;;  %s9872_s7 = smov 46  }
  0x45   :  { %11310 = sst [smem:[#allocation36_spill]] %s10063_s19 }
  0x46   :  { %s10083_s19 = sld [smem:[%s11270_s0 + %s9865_s15]]   ;;  %s9869_s15 = smov 43  }
  0x47   :  { %11311 = sst [smem:[#allocation37_spill]] %s10068_s27 }
  0x48   :  { %11312 = sst [smem:[#allocation38_spill]] %s10073_s4 }
  0x49   :  { %s10088_s27 = sld [smem:[%s11270_s0 + %s9866_s22]]   ;;  %s9870_s22 = smov 44  }
  0x4a   :  { %s10093_s4 = sld [smem:[%s11270_s0 + %s9867_s28]]   ;;  %s9871_s28 = smov 45  }
  0x4b   :  { %s10108_s20 = sld [smem:[%s11270_s0 + %s9870_s22]]  }
  0x4c   :  { %11313 = sst [smem:[#allocation39_spill]] %s10083_s19 }
  0x4d   :  { %s10103_s19 = sld [smem:[%s11270_s0 + %s9869_s15]]  }
  0x4e   :  { %s10118_s24 = sld [smem:[%s11270_s0 + %s9872_s7]]  }
  0x50   :  { %11314 = sst [smem:[#allocation40_spill]] %s10093_s4 }
  0x51   :  { %s10113_s4 = sld [smem:[%s11270_s0 + %s9871_s28]]  }
  0x52   :  { %99 = vsyncpa [#allocation3], 0 }
  0x53   :  { %100 = vsyncpa [#allocation5], 0 }
  0x54   :  { %101 = vsyncpa [#allocation8], 0  ;;  %s9873_s15 = smov [#allocation4]   ;;  %s9874_s18 = smov [#allocation2]  }
  0x55   :  { %s196_s16 = sshll.u32 %s9873_s15, 4  ;;  %s184_s22 = sshll.u32 %s9874_s18, 4  ;;  %s197_s16 = int_to_ptr.vmem [resolvable:$true] %s196_s16  ;;  %s185_s22 = int_to_ptr.vmem [resolvable:$true] %s184_s22 }
  0x56   :  { %s9749_s23 = scalar_lea.vmem %s197_s16, 16  ;;  %s9753_s26 = scalar_lea.vmem %s197_s16, 32 }
  0x57   :  { %p9750_p0 = scmp.ne.s32.totalorder %s197_s16, %s9749_s23  ;;  %p9754_p1 = scmp.lt.s32.totalorder %s197_s16, %s197_s16 }
  0x58   :  { %p9755_p2 = scmp.lt.s32.totalorder %s9753_s26, %s9749_s23 }
  0x5a   :  { %p9756_p3 = por %p9755_p2, %p9754_p1 }
  0x5c   :  { %p9757_p4 = pnand %p9756_p3, %p9750_p0 }
  0x5e   :  { %9760 = shalt.err (!%p9757_p4)
}
  0x5f   :  { %199 = dma.hbm_to_vmem [thread:$0]  %s10088_s27, 16, %s197_s16, [#allocation5]  }
  0x60   :  { %s9769_s0 = scalar_lea.vmem %s185_s22, 16  ;;  %s9773_s28 = scalar_lea.vmem %s185_s22, 32 }
  0x61   :  { %p9770_p5 = scmp.ne.s32.totalorder %s185_s22, %s9769_s0  ;;  %p9774_p6 = scmp.lt.s32.totalorder %s185_s22, %s185_s22 }
  0x62   :  { %p9775_p7 = scmp.lt.s32.totalorder %s9773_s28, %s9769_s0 }
  0x64   :  { %p9776_p8 = por %p9775_p7, %p9774_p6 }
  0x66   :  { %p9777_p9 = pnand %p9776_p8, %p9770_p5 }
  0x68   :  { %9780 = shalt.err (!%p9777_p9)
}
  0x69   :  { %187 = dma.hbm_to_vmem [thread:$0]  %s10078_s30, 16, %s185_s22, [#allocation3]  }
  0x6a   :  { %s9875_s1 = smov [#allocation6]   ;;  %s9876_s7 = smov [#allocation7]  }
  0x6b   :  { %s208_s2 = sshll.u32 %s9875_s1, 4  ;;  %s220_s10 = sshll.u32 %s9876_s7, 4  ;;  %s209_s2 = int_to_ptr.vmem [resolvable:$true] %s208_s2  ;;  %s221_s10 = int_to_ptr.vmem [resolvable:$true] %s220_s10 }
  0x6c   :  { %s9789_s11 = scalar_lea.vmem %s209_s2, 16  ;;  %s9793_s15 = scalar_lea.vmem %s209_s2, 32 }
  0x6d   :  { %p9790_p10 = scmp.ne.s32.totalorder %s209_s2, %s9789_s11  ;;  %p9794_p11 = scmp.lt.s32.totalorder %s209_s2, %s209_s2 }
  0x6e   :  { %p9795_p12 = scmp.lt.s32.totalorder %s9793_s15, %s9789_s11 }
  0x70   :  { %p9796_p13 = por %p9795_p12, %p9794_p11 }
  0x72   :  { %p9797_p0 = pnand %p9796_p13, %p9790_p10 }
  0x74   :  { %9800 = shalt.err (!%p9797_p0)
}
  0x75   :  { %211 = dma.hbm_to_vmem [thread:$0]  %s10098_s12, 16, %s209_s2, [#allocation5]  }
  0x76   :  { %s9809_s27 = scalar_lea.vmem %s221_s10, 16  ;;  %s9813_s16 = scalar_lea.vmem %s221_s10, 32 }
  0x77   :  { %p9810_p1 = scmp.ne.s32.totalorder %s221_s10, %s9809_s27  ;;  %p9814_p2 = scmp.lt.s32.totalorder %s221_s10, %s221_s10 }
  0x78   :  { %p9815_p3 = scmp.lt.s32.totalorder %s9813_s16, %s9809_s27 }
  0x7a   :  { %p9816_p4 = por %p9815_p3, %p9814_p2 }
  0x7c   :  { %p9817_p5 = pnand %p9816_p4, %p9810_p1 }
  0x7e   :  { %9820 = shalt.err (!%p9817_p5)
}
  0x7f   :  { %223 = dma.hbm_to_vmem [thread:$0]  %s10108_s20, 16, %s221_s10, [#allocation8]  }
  0x80   :  { %9821 = dma.done.wait [#allocation3], 16  }
  0x81   :  { %9822 = vsyncadd [#allocation3], 4294967280 }
  0x82   :  { %9823 = dma.done.wait [#allocation5], 32  }
  0x83   :  { %9824 = vsyncadd [#allocation5], 4294967264 }
  0x84   :  { %9825 = dma.done.wait [#allocation8], 16  }
  0x85   :  { %9826 = vsyncadd [#allocation8], 4294967280  ;;  %v8547_v0 = vld [vmem:[%s9893_s9 + $0xe4] ss:$16 sps:$4 sm:$0xff]   ;;  %v8551_v2 = vld [vmem:[%s9893_s9 + $0xe0] ss:$16 sps:$4 sm:$0xff]   ;;  %v370_v36 = vlaneseq }
  0x86   :  { %v8549_v1 = vld [vmem:[%s9893_s9 + $0x2e4] ss:$16 sps:$4 sm:$0xff]   ;;  %1052 = vmatprep.subr.bf16.mxu0 %v8547_v0  ;;  %v8552_v3 = vld [vmem:[%s9893_s9 + $0x2e0] ss:$16 sps:$4 sm:$0xff]   ;;  %v9877_v37 = vmov 1983009808  }
  0x87   :  { %1093 = vmatprep.subr.bf16.mxu1 %v8549_v1  ;;  %v8553_v4 = vld [vmem:[%s9893_s9 + $0xc4] ss:$16 sps:$4 sm:$0xff]   ;;  %1053 = vmatpush1.bf16.msra.mxu0 %v8551_v2  ;;  %v8557_v6 = vld [vmem:[%s9893_s9 + $0xc0] ss:$16 sps:$4 sm:$0xff]   ;;  %v393_v38 = vunpack.c.l.s4 %v9877_v37  ;;  %v10163_v42 = vshrl.u32 %v370_v36, 7  ;;  %s11325_s30 = sld [smem:[#allocation22_spill]] }
  0x88   :  { %1094 = vmatpush1.bf16.msra.mxu1 %v8552_v3  ;;  %v8555_v5 = vld [vmem:[%s9893_s9 + $0x2c4] ss:$16 sps:$4 sm:$0xff]   ;;  %1054 = vmatprep.subr.bf16.mxu0 %v8553_v4  ;;  %v8558_v7 = vld [vmem:[%s9893_s9 + $0x2c0] ss:$16 sps:$4 sm:$0xff]   ;;  %v8682_v36 = vld [vmem:[%s9893_s9 + $0x2c] ss:$16 sps:$4 sm:$0xff]  }
  0x89   :  { %1095 = vmatprep.subr.bf16.mxu1 %v8555_v5  ;;  %v8559_v8 = vld [vmem:[%s9893_s9 + $0xa4] ss:$16 sps:$4 sm:$0xff]   ;;  %v8563_v10 = vld [vmem:[%s9893_s9 + $0xa0] ss:$16 sps:$4 sm:$0xff]   ;;  %v394_v43 = vunpack.c.0.s8 %v393_v38  ;;  %v8685_v37 = vld [vmem:[%s9893_s9 + $0x22c] ss:$16 sps:$4 sm:$0xff]  }
  0x8a   :  { %v8561_v9 = vld [vmem:[%s9893_s9 + $0x2a4] ss:$16 sps:$4 sm:$0xff]   ;;  %v8564_v11 = vld [vmem:[%s9893_s9 + $0x2a0] ss:$16 sps:$4 sm:$0xff]   ;;  %v8680_v38 = vld [vmem:[%s9893_s9 + $0x28] ss:$16 sps:$4 sm:$0xff]  }
  0x8b   :  { %1055 = vmatpush1.bf16.msra.mxu0 %v8557_v6  ;;  %v8565_v12 = vld [vmem:[%s9893_s9 + $0x84] ss:$16 sps:$4 sm:$0xff]   ;;  %v8569_v14 = vld [vmem:[%s9893_s9 + $0x80] ss:$16 sps:$4 sm:$0xff]   ;;  %v397_v49 = vsub.s32 %v394_v43, %v10163_v42  ;;  %v8686_v43 = vld [vmem:[%s9893_s9 + $0x8] ss:$16 sps:$4 sm:$0xff]  }
  0x8c   :  { %1096 = vmatpush1.bf16.msra.mxu1 %v8558_v7  ;;  %1056 = vmatprep.subr.bf16.mxu0 %v8559_v8  ;;  %v8567_v13 = vld [vmem:[%s9893_s9 + $0x284] ss:$16 sps:$4 sm:$0xff]   ;;  %v8570_v15 = vld [vmem:[%s9893_s9 + $0x280] ss:$16 sps:$4 sm:$0xff]   ;;  %vm9879_vm0 = vmmov 0   ;;  %s11327_s12 = sld [smem:[#allocation21_spill]] }
  0x8d   :  { %1097 = vmatprep.subr.bf16.mxu1 %v8561_v9  ;;  %v8571_v16 = vld [vmem:[%s9893_s9 + $0x64] ss:$16 sps:$4 sm:$0xff]   ;;  %v8575_v18 = vld [vmem:[%s9893_s9 + $0x60] ss:$16 sps:$4 sm:$0xff]   ;;  %s11328_s20 = sld [smem:[#allocation28_spill]]  ;;  %vm6791_vm1 = vcmask 523264  }
  0x8e   :  { %v8573_v17 = vld [vmem:[%s9893_s9 + $0x264] ss:$16 sps:$4 sm:$0xff]   ;;  %v8576_v19 = vld [vmem:[%s9893_s9 + $0x260] ss:$16 sps:$4 sm:$0xff]   ;;  %s11329_s18 = sld [smem:[#allocation25_spill]]  ;;  %vm7094_vm2 = vcmask 519168  }
  0x8f   :  { %1057 = vmatpush1.bf16.msra.mxu0 %v8563_v10  ;;  %v8577_v20 = vld [vmem:[%s9893_s9 + $0x44] ss:$16 sps:$4 sm:$0xff]   ;;  %v8581_v22 = vld [vmem:[%s9893_s9 + $0x40] ss:$16 sps:$4 sm:$0xff]   ;;  %s11330_s22 = sld [smem:[#allocation23_spill]]  ;;  %vm7196_vm3 = vcmask 261120  }
  0x90   :  { %1098 = vmatpush1.bf16.msra.mxu1 %v8564_v11  ;;  %1058 = vmatprep.subr.bf16.mxu0 %v8565_v12  ;;  %v8579_v21 = vld [vmem:[%s9893_s9 + $0x244] ss:$16 sps:$4 sm:$0xff]   ;;  %v8582_v23 = vld [vmem:[%s9893_s9 + $0x240] ss:$16 sps:$4 sm:$0xff]   ;;  %v8646_v12 = vld [vmem:[%s9893_s9 + $0xec] ss:$16 sps:$4 sm:$0xff]  }
  0x91   :  { %1099 = vmatprep.subr.bf16.mxu1 %v8567_v13  ;;  %v8583_v24 = vld [vmem:[%s9893_s9 + $0x24] ss:$16 sps:$4 sm:$0xff]   ;;  %v8587_v26 = vld [vmem:[%s9893_s9 + $0x20] ss:$16 sps:$4 sm:$0xff]   ;;  %v8649_v13 = vld [vmem:[%s9893_s9 + $0x2ec] ss:$16 sps:$4 sm:$0xff]  }
  0x92   :  { %v8585_v25 = vld [vmem:[%s9893_s9 + $0x224] ss:$16 sps:$4 sm:$0xff]   ;;  %v8588_v27 = vld [vmem:[%s9893_s9 + $0x220] ss:$16 sps:$4 sm:$0xff]   ;;  %s11331_s23 = sld [smem:[#allocation34_spill]]  ;;  %vm7271_vm4 = vcmask 257024  }
  0x93   :  { %1059 = vmatpush1.bf16.msra.mxu0 %v8569_v14  ;;  %v8589_v28 = vld [vmem:[%s9893_s9 + $0x4] ss:$16 sps:$4 sm:$0xff]   ;;  %v8593_v30 = vld [vmem:[%s9893_s9] ss:$16 sps:$4 sm:$0xff]   ;;  %v8644_v14 = vld [vmem:[%s9893_s9 + $0xe8] ss:$16 sps:$4 sm:$0xff]  }
  0x94   :  { %1100 = vmatpush1.bf16.msra.mxu1 %v8570_v15  ;;  %1060 = vmatprep.subr.bf16.mxu0 %v8571_v16  ;;  %v8591_v29 = vld [vmem:[%s9893_s9 + $0x204] ss:$16 sps:$4 sm:$0xff]   ;;  %v8594_v31 = vld [vmem:[%s9893_s9 + $0x200] ss:$16 sps:$4 sm:$0xff]   ;;  %v8647_v15 = vld [vmem:[%s9893_s9 + $0x2e8] ss:$16 sps:$4 sm:$0xff]  }
  0x95   :  { %1101 = vmatprep.subr.bf16.mxu1 %v8573_v17  ;;  %v8595_v32 = vld [vmem:[%s9893_s9 + $0x1e4] ss:$16 sps:$4 sm:$0xff]   ;;  %v8599_v34 = vld [vmem:[%s9893_s9 + $0x1e0] ss:$16 sps:$4 sm:$0xff]   ;;  %v8652_v16 = vld [vmem:[%s9893_s9 + $0xcc] ss:$16 sps:$4 sm:$0xff]  }
  0x96   :  { %v8597_v33 = vld [vmem:[%s9893_s9 + $0x3e4] ss:$16 sps:$4 sm:$0xff]   ;;  %v8600_v35 = vld [vmem:[%s9893_s9 + $0x3e0] ss:$16 sps:$4 sm:$0xff]   ;;  %v8655_v17 = vld [vmem:[%s9893_s9 + $0x2cc] ss:$16 sps:$4 sm:$0xff]  }
  0x97   :  { %1061 = vmatpush1.bf16.msra.mxu0 %v8575_v18  ;;  %v8601_v39 = vld [vmem:[%s9893_s9 + $0x1c4] ss:$16 sps:$4 sm:$0xff]   ;;  %v8605_v41 = vld [vmem:[%s9893_s9 + $0x1c0] ss:$16 sps:$4 sm:$0xff]   ;;  %v8650_v18 = vld [vmem:[%s9893_s9 + $0xc8] ss:$16 sps:$4 sm:$0xff]  }
  0x98   :  { %1102 = vmatpush1.bf16.msra.mxu1 %v8576_v19  ;;  %1062 = vmatprep.subr.bf16.mxu0 %v8577_v20  ;;  %v8603_v40 = vld [vmem:[%s9893_s9 + $0x3c4] ss:$16 sps:$4 sm:$0xff]   ;;  %v8606_v44 = vld [vmem:[%s9893_s9 + $0x3c0] ss:$16 sps:$4 sm:$0xff]   ;;  %v8653_v19 = vld [vmem:[%s9893_s9 + $0x2c8] ss:$16 sps:$4 sm:$0xff]  }
  0x99   :  { %1103 = vmatprep.subr.bf16.mxu1 %v8579_v21  ;;  %v8607_v45 = vld [vmem:[%s9893_s9 + $0x1a4] ss:$16 sps:$4 sm:$0xff]   ;;  %v8611_v47 = vld [vmem:[%s9893_s9 + $0x1a0] ss:$16 sps:$4 sm:$0xff]   ;;  %v8658_v20 = vld [vmem:[%s9893_s9 + $0xac] ss:$16 sps:$4 sm:$0xff]  }
  0x9a   :  { %v8609_v46 = vld [vmem:[%s9893_s9 + $0x3a4] ss:$16 sps:$4 sm:$0xff]   ;;  %v8612_v48 = vld [vmem:[%s9893_s9 + $0x3a0] ss:$16 sps:$4 sm:$0xff]   ;;  %v8661_v21 = vld [vmem:[%s9893_s9 + $0x2ac] ss:$16 sps:$4 sm:$0xff]  }
  0x9b   :  { %1063 = vmatpush1.bf16.msra.mxu0 %v8581_v22  ;;  %v8613_v50 = vld [vmem:[%s9893_s9 + $0x184] ss:$16 sps:$4 sm:$0xff]   ;;  %v8617_v53 = vld [vmem:[%s9893_s9 + $0x180] ss:$16 sps:$4 sm:$0xff]   ;;  %v8656_v22 = vld [vmem:[%s9893_s9 + $0xa8] ss:$16 sps:$4 sm:$0xff]  }
  0x9c   :  { %1104 = vmatpush1.bf16.msra.mxu1 %v8582_v23  ;;  %1064 = vmatprep.subr.bf16.mxu0 %v8583_v24  ;;  %v8615_v51 = vld [vmem:[%s9893_s9 + $0x384] ss:$16 sps:$4 sm:$0xff]   ;;  %v8618_v56 = vld [vmem:[%s9893_s9 + $0x380] ss:$16 sps:$4 sm:$0xff]   ;;  %v8659_v23 = vld [vmem:[%s9893_s9 + $0x2a8] ss:$16 sps:$4 sm:$0xff]  }
  0x9d   :  { %1105 = vmatprep.subr.bf16.mxu1 %v8585_v25  ;;  %v237_v52 = vld [vmem:[%s9888_s5] sm:$0xff]  ;;  %v8664_v24 = vld [vmem:[%s9893_s9 + $0x8c] ss:$16 sps:$4 sm:$0xff]   ;;  %s11332_s26 = sld [smem:[#allocation27_spill]] }
  0x9e   :  { %v10175_v54 = vrot.slane %v237_v52, %v397_v49  ;;  %v391_v55 = vcombine.high %v237_v52, %v237_v52  ;;  %v8619_v57 = vld [vmem:[%s9893_s9 + $0x164] ss:$16 sps:$4 sm:$0xff]   ;;  %v8623_v61 = vld [vmem:[%s9893_s9 + $0x160] ss:$16 sps:$4 sm:$0xff]   ;;  %v8667_v25 = vld [vmem:[%s9893_s9 + $0x28c] ss:$16 sps:$4 sm:$0xff]  }
  0x9f   :  { %1065 = vmatpush1.bf16.msra.mxu0 %v8587_v26  ;;  %v8621_v58 = vld [vmem:[%s9893_s9 + $0x364] ss:$16 sps:$4 sm:$0xff]   ;;  %v8624_v63 = vld [vmem:[%s9893_s9 + $0x360] ss:$16 sps:$4 sm:$0xff]   ;;  %v8662_v26 = vld [vmem:[%s9893_s9 + $0x88] ss:$16 sps:$4 sm:$0xff]  }
  0xa0   :  { %1106 = vmatpush1.bf16.msra.mxu1 %v8588_v27  ;;  %1066 = vmatprep.subr.bf16.mxu0 %v8589_v28  ;;  %v406_v59 = vcombine.high %v10175_v54, %v10175_v54  ;;  %v10182_v60 = vrot.slane %v391_v55, %v397_v49  ;;  %v8625_v0 = vld [vmem:[%s9893_s9 + $0x144] ss:$16 sps:$4 sm:$0xff]   ;;  %v8629_v2 = vld [vmem:[%s9893_s9 + $0x140] ss:$16 sps:$4 sm:$0xff]   ;;  %v8665_v27 = vld [vmem:[%s9893_s9 + $0x288] ss:$16 sps:$4 sm:$0xff]  }
  0xa1   :  { %1107 = vmatprep.subr.bf16.mxu1 %v8591_v29  ;;  %v8627_v1 = vld [vmem:[%s9893_s9 + $0x344] ss:$16 sps:$4 sm:$0xff]   ;;  %v8630_v3 = vld [vmem:[%s9893_s9 + $0x340] ss:$16 sps:$4 sm:$0xff]   ;;  %v8670_v28 = vld [vmem:[%s9893_s9 + $0x6c] ss:$16 sps:$4 sm:$0xff]  }
  0xa2   :  { %1084 = vmatprep.mubr.bf16.mxu0 %v406_v59  ;;  %v407_v62 = vcombine.high %v10182_v60, %v10182_v60  ;;  %v8631_v4 = vld [vmem:[%s9893_s9 + $0x124] ss:$16 sps:$4 sm:$0xff]   ;;  %v8635_v6 = vld [vmem:[%s9893_s9 + $0x120] ss:$16 sps:$4 sm:$0xff]   ;;  %v8673_v29 = vld [vmem:[%s9893_s9 + $0x26c] ss:$16 sps:$4 sm:$0xff]  }
  0xa3   :  { %1067 = vmatpush1.bf16.msra.mxu0 %v8593_v30  ;;  %v8633_v5 = vld [vmem:[%s9893_s9 + $0x324] ss:$16 sps:$4 sm:$0xff]   ;;  %v8636_v7 = vld [vmem:[%s9893_s9 + $0x320] ss:$16 sps:$4 sm:$0xff]   ;;  %v8668_v30 = vld [vmem:[%s9893_s9 + $0x68] ss:$16 sps:$4 sm:$0xff]  }
  0xa4   :  { %1108 = vmatpush1.bf16.msra.mxu1 %v8594_v31  ;;  %1068 = vmatprep.subr.bf16.mxu0 %v8595_v32  ;;  %v8637_v8 = vld [vmem:[%s9893_s9 + $0x104] ss:$16 sps:$4 sm:$0xff]   ;;  %v8641_v10 = vld [vmem:[%s9893_s9 + $0x100] ss:$16 sps:$4 sm:$0xff]   ;;  %v8671_v31 = vld [vmem:[%s9893_s9 + $0x268] ss:$16 sps:$4 sm:$0xff]  }
  0xa5   :  { %1109 = vmatprep.subr.bf16.mxu1 %v8597_v33  ;;  %1125 = vmatprep.mubr.bf16.mxu1 %v407_v62  ;;  %v8639_v9 = vld [vmem:[%s9893_s9 + $0x304] ss:$16 sps:$4 sm:$0xff]   ;;  %v8642_v11 = vld [vmem:[%s9893_s9 + $0x300] ss:$16 sps:$4 sm:$0xff]   ;;  %v8676_v32 = vld [vmem:[%s9893_s9 + $0x4c] ss:$16 sps:$4 sm:$0xff]  }
  0xa6   :  { %v8679_v33 = vld [vmem:[%s9893_s9 + $0x24c] ss:$16 sps:$4 sm:$0xff]   ;;  %v8701_v52 = vld [vmem:[%s9893_s9 + $0x3c8] ss:$16 sps:$4 sm:$0xff]   ;;  %s11333_s0 = sld [smem:[#allocation30_spill]] }
  0xa7   :  { %1069 = vmatpush2.bf16.msra.mxu0 %v8599_v34  ;;  %v8674_v34 = vld [vmem:[%s9893_s9 + $0x48] ss:$16 sps:$4 sm:$0xff]   ;;  %v8700_v49 = vld [vmem:[%s9893_s9 + $0x1cc] ss:$16 sps:$4 sm:$0xff]   ;;  %s11334_s28 = sld [smem:[#allocation29_spill]] }
  0xa8   :  { %1110 = vmatpush2.bf16.msra.mxu1 %v8600_v35  ;;  %1070 = vmatprep.subr.bf16.mxu0 %v8601_v39  ;;  %v8677_v35 = vld [vmem:[%s9893_s9 + $0x248] ss:$16 sps:$4 sm:$0xff]   ;;  %v8709_v55 = vld [vmem:[%s9893_s9 + $0x3ac] ss:$16 sps:$4 sm:$0xff]   ;;  %s11335_s1 = sld [smem:[#allocation32_spill]] }
  0xa9   :  { %1111 = vmatprep.subr.bf16.mxu1 %v8603_v40  ;;  %v8683_v39 = vld [vmem:[%s9893_s9 + $0x228] ss:$16 sps:$4 sm:$0xff]   ;;  %v8688_v40 = vld [vmem:[%s9893_s9 + $0xc] ss:$16 sps:$4 sm:$0xff]   ;;  %s11336_s2 = sld [smem:[#allocation31_spill]] }
  0xaa   :  { %s11337_s7 = sld [smem:[#allocation36_spill]] }
  0xab   :  { %1071 = vmatpush2.bf16.msra.mxu0 %v8605_v41  ;;  %v8691_v41 = vld [vmem:[%s9893_s9 + $0x20c] ss:$16 sps:$4 sm:$0xff]   ;;  %s11338_s10 = sld [smem:[#allocation38_spill]] }
  0xac   :  { %1112 = vmatpush2.bf16.msra.mxu1 %v8606_v44  ;;  %1072 = vmatprep.subr.bf16.mxu0 %v8607_v45  ;;  %v8689_v44 = vld [vmem:[%s9893_s9 + $0x208] ss:$16 sps:$4 sm:$0xff]   ;;  %v8694_v45 = vld [vmem:[%s9893_s9 + $0x1ec] ss:$16 sps:$4 sm:$0xff]   ;;  %s11339_s11 = sld [smem:[#allocation35_spill]] }
  0xad   :  { %1113 = vmatprep.subr.bf16.mxu1 %v8609_v46  ;;  %v8697_v46 = vld [vmem:[%s9893_s9 + $0x3ec] ss:$16 sps:$4 sm:$0xff]   ;;  %s11340_s15 = sld [smem:[#allocation33_spill]] }
  0xae   :  { %s11341_s27 = sld [smem:[#allocation39_spill]] }
  0xaf   :  { %1073 = vmatpush2.bf16.msra.mxu0 %v8611_v47  ;;  %v8692_v47 = vld [vmem:[%s9893_s9 + $0x1e8] ss:$16 sps:$4 sm:$0xff]   ;;  %s11342_s16 = sld [smem:[#allocation37_spill]] }
  0xb0   :  { %1114 = vmatpush2.bf16.msra.mxu1 %v8612_v48  ;;  %1074 = vmatprep.subr.bf16.mxu0 %v8613_v50  ;;  %v8695_v48 = vld [vmem:[%s9893_s9 + $0x3e8] ss:$16 sps:$4 sm:$0xff]   ;;  %v8703_v50 = vld [vmem:[%s9893_s9 + $0x3cc] ss:$16 sps:$4 sm:$0xff]  }
  0xb1   :  { %1115 = vmatprep.subr.bf16.mxu1 %v8615_v51  ;;  %v8698_v51 = vld [vmem:[%s9893_s9 + $0x1c8] ss:$16 sps:$4 sm:$0xff]  }
  0xb3   :  { %1075 = vmatpush2.bf16.msra.mxu0 %v8617_v53  ;;  %v8706_v53 = vld [vmem:[%s9893_s9 + $0x1ac] ss:$16 sps:$4 sm:$0xff]  }
  0xb4   :  { %1116 = vmatpush2.bf16.msra.mxu1 %v8618_v56  ;;  %1076 = vmatprep.subr.bf16.mxu0 %v8619_v57  ;;  %v8704_v56 = vld [vmem:[%s9893_s9 + $0x1a8] ss:$16 sps:$4 sm:$0xff]  }
  0xb5   :  { %1117 = vmatprep.subr.bf16.mxu1 %v8621_v58  ;;  %v8707_v57 = vld [vmem:[%s9893_s9 + $0x3a8] ss:$16 sps:$4 sm:$0xff]   ;;  %v8712_v58 = vld [vmem:[%s9893_s9 + $0x18c] ss:$16 sps:$4 sm:$0xff]  }
  0xb7   :  { %1077 = vmatpush2.bf16.msra.mxu0 %v8623_v61  ;;  %v8710_v61 = vld [vmem:[%s9893_s9 + $0x188] ss:$16 sps:$4 sm:$0xff]  }
  0xb8   :  { %1118 = vmatpush2.bf16.msra.mxu1 %v8624_v63  ;;  %1078 = vmatprep.subr.bf16.mxu0 %v8625_v0  ;;  %v8718_v63 = vld [vmem:[%s9893_s9 + $0x16c] ss:$16 sps:$4 sm:$0xff]  }
  0xb9   :  { %1119 = vmatprep.subr.bf16.mxu1 %v8627_v1  ;;  %v8721_v0 = vld [vmem:[%s9893_s9 + $0x36c] ss:$16 sps:$4 sm:$0xff]   ;;  %v8716_v1 = vld [vmem:[%s9893_s9 + $0x168] ss:$16 sps:$4 sm:$0xff]  }
  0xbb   :  { %1079 = vmatpush2.bf16.msra.mxu0 %v8629_v2  ;;  %v8719_v2 = vld [vmem:[%s9893_s9 + $0x368] ss:$16 sps:$4 sm:$0xff]  }
  0xbc   :  { %1120 = vmatpush2.bf16.msra.mxu1 %v8630_v3  ;;  %1080 = vmatprep.subr.bf16.mxu0 %v8631_v4  ;;  %v8724_v3 = vld [vmem:[%s9893_s9 + $0x14c] ss:$16 sps:$4 sm:$0xff]  }
  0xbd   :  { %1121 = vmatprep.subr.bf16.mxu1 %v8633_v5  ;;  %v8727_v4 = vld [vmem:[%s9893_s9 + $0x34c] ss:$16 sps:$4 sm:$0xff]   ;;  %v8722_v5 = vld [vmem:[%s9893_s9 + $0x148] ss:$16 sps:$4 sm:$0xff]  }
  0xbf   :  { %1081 = vmatpush2.bf16.msra.mxu0 %v8635_v6  ;;  %v8725_v6 = vld [vmem:[%s9893_s9 + $0x348] ss:$16 sps:$4 sm:$0xff]  }
  0xc0   :  { %1122 = vmatpush2.bf16.msra.mxu1 %v8636_v7  ;;  %1082 = vmatprep.subr.bf16.mxu0 %v8637_v8  ;;  %v8730_v7 = vld [vmem:[%s9893_s9 + $0x12c] ss:$16 sps:$4 sm:$0xff]  }
  0xc1   :  { %1123 = vmatprep.subr.bf16.mxu1 %v8639_v9  ;;  %v8733_v8 = vld [vmem:[%s9893_s9 + $0x32c] ss:$16 sps:$4 sm:$0xff]   ;;  %v8728_v9 = vld [vmem:[%s9893_s9 + $0x128] ss:$16 sps:$4 sm:$0xff]  }
  0xc3   :  { %1083 = vmatpush2.bf16.msra.mxu0 %v8641_v10  ;;  %v8731_v10 = vld [vmem:[%s9893_s9 + $0x328] ss:$16 sps:$4 sm:$0xff]  }
  0xc4   :  { %1124 = vmatpush2.bf16.msra.mxu1 %v8642_v11  ;;  %1134 = vmatprep.subr.bf16.mxu0 %v8646_v12  ;;  %v8736_v11 = vld [vmem:[%s9893_s9 + $0x10c] ss:$16 sps:$4 sm:$0xff]  }
  0xc5   :  { %1175 = vmatprep.subr.bf16.mxu1 %v8649_v13  ;;  %v8739_v12 = vld [vmem:[%s9893_s9 + $0x30c] ss:$16 sps:$4 sm:$0xff]   ;;  %v8734_v13 = vld [vmem:[%s9893_s9 + $0x108] ss:$16 sps:$4 sm:$0xff]  }
  0xc6   :  { %1085 = vmatmul.mubr.bf16.vlgmr.msra.gmra.mxu0 %v10175_v54 }
  0xc7   :  { %1126 = vmatmul.mubr.bf16.vlgmr.msra.gmra.mxu1 %v10182_v60  ;;  %1135 = vmatpush1.bf16.msra.mxu0 %v8644_v14  ;;  %v8737_v14 = vld [vmem:[%s9893_s9 + $0x308] ss:$16 sps:$4 sm:$0xff]  }
  0xc8   :  { %1176 = vmatpush1.bf16.msra.mxu1 %v8647_v15  ;;  %1136 = vmatprep.subr.bf16.mxu0 %v8652_v16  ;;  %v8742_v15 = vld [vmem:[%s9903_s17 + $0xe4] ss:$16 sps:$4 sm:$0xff]   ;;  %v8740_v16 = vld [vmem:[%s9903_s17 + $0xe0] ss:$16 sps:$4 sm:$0xff]  }
  0xc9   :  { %1177 = vmatprep.subr.bf16.mxu1 %v8655_v17  ;;  %1166 = vmatprep.mubr.bf16.mxu0 %v406_v59  ;;  %v8715_v59 = vld [vmem:[%s9893_s9 + $0x38c] ss:$16 sps:$4 sm:$0xff]   ;;  %v8745_v17 = vld [vmem:[%s9903_s17 + $0xc4] ss:$16 sps:$4 sm:$0xff]  }
  0xca   :  { %1207 = vmatprep.mubr.bf16.mxu1 %v407_v62  ;;  %v8713_v62 = vld [vmem:[%s9893_s9 + $0x388] ss:$16 sps:$4 sm:$0xff]   ;;  %s11316_s9 = sld [smem:[#allocation16_spill]] }
  0xcb   :  { %1137 = vmatpush1.bf16.msra.mxu0 %v8650_v18  ;;  %v8743_v18 = vld [vmem:[%s9903_s17 + $0xc0] ss:$16 sps:$4 sm:$0xff]  }
  0xcc   :  { %1178 = vmatpush1.bf16.msra.mxu1 %v8653_v19  ;;  %1138 = vmatprep.subr.bf16.mxu0 %v8658_v20  ;;  %v8748_v19 = vld [vmem:[%s9903_s17 + $0xa4] ss:$16 sps:$4 sm:$0xff]   ;;  %v8746_v20 = vld [vmem:[%s9903_s17 + $0xa0] ss:$16 sps:$4 sm:$0xff]  }
  0xcd   :  { %1179 = vmatprep.subr.bf16.mxu1 %v8661_v21  ;;  %v8751_v21 = vld [vmem:[%s9903_s17 + $0x84] ss:$16 sps:$4 sm:$0xff]  }
  0xcf   :  { %1139 = vmatpush1.bf16.msra.mxu0 %v8656_v22  ;;  %v8749_v22 = vld [vmem:[%s9903_s17 + $0x80] ss:$16 sps:$4 sm:$0xff]  }
  0xd0   :  { %1180 = vmatpush1.bf16.msra.mxu1 %v8659_v23  ;;  %1140 = vmatprep.subr.bf16.mxu0 %v8664_v24  ;;  %v8790_v23 = vld [vmem:[%s9903_s17 + $0x2e4] ss:$16 sps:$4 sm:$0xff]   ;;  %v8752_v24 = vld [vmem:[%s9903_s17 + $0x60] ss:$16 sps:$4 sm:$0xff]  }
  0xd1   :  { %1181 = vmatprep.subr.bf16.mxu1 %v8667_v25  ;;  %v8794_v25 = vld [vmem:[%s9903_s17 + $0x2c0] ss:$16 sps:$4 sm:$0xff]  }
  0xd3   :  { %1141 = vmatpush1.bf16.msra.mxu0 %v8662_v26  ;;  %v8796_v26 = vld [vmem:[%s9903_s17 + $0x2c4] ss:$16 sps:$4 sm:$0xff]  }
  0xd4   :  { %1182 = vmatpush1.bf16.msra.mxu1 %v8665_v27  ;;  %1142 = vmatprep.subr.bf16.mxu0 %v8670_v28  ;;  %v8757_v27 = vld [vmem:[%s9903_s17 + $0x44] ss:$16 sps:$4 sm:$0xff]   ;;  %v8755_v28 = vld [vmem:[%s9903_s17 + $0x40] ss:$16 sps:$4 sm:$0xff]  }
  0xd5   :  { %1183 = vmatprep.subr.bf16.mxu1 %v8673_v29  ;;  %v8800_v29 = vld [vmem:[%s9903_s17 + $0x2a0] ss:$16 sps:$4 sm:$0xff]  }
  0xd7   :  { %1143 = vmatpush1.bf16.msra.mxu0 %v8668_v30  ;;  %v8802_v30 = vld [vmem:[%s9903_s17 + $0x2a4] ss:$16 sps:$4 sm:$0xff]  }
  0xd8   :  { %1184 = vmatpush1.bf16.msra.mxu1 %v8671_v31  ;;  %1144 = vmatprep.subr.bf16.mxu0 %v8676_v32  ;;  %v8760_v31 = vld [vmem:[%s9903_s17 + $0x24] ss:$16 sps:$4 sm:$0xff]   ;;  %v8758_v32 = vld [vmem:[%s9903_s17 + $0x20] ss:$16 sps:$4 sm:$0xff]  }
  0xd9   :  { %1185 = vmatprep.subr.bf16.mxu1 %v8679_v33  ;;  %v8806_v33 = vld [vmem:[%s9903_s17 + $0x280] ss:$16 sps:$4 sm:$0xff]  }
  0xdb   :  { %1145 = vmatpush1.bf16.msra.mxu0 %v8674_v34  ;;  %v8808_v34 = vld [vmem:[%s9903_s17 + $0x284] ss:$16 sps:$4 sm:$0xff]  }
  0xdc   :  { %1186 = vmatpush1.bf16.msra.mxu1 %v8677_v35  ;;  %1146 = vmatprep.subr.bf16.mxu0 %v8682_v36  ;;  %v8763_v35 = vld [vmem:[%s9903_s17 + $0x4] ss:$16 sps:$4 sm:$0xff]   ;;  %v8761_v36 = vld [vmem:[%s9903_s17] ss:$16 sps:$4 sm:$0xff]  }
  0xdd   :  { %1187 = vmatprep.subr.bf16.mxu1 %v8685_v37  ;;  %v8812_v37 = vld [vmem:[%s9903_s17 + $0x260] ss:$16 sps:$4 sm:$0xff]  }
  0xdf   :  { %1147 = vmatpush1.bf16.msra.mxu0 %v8680_v38  ;;  %v8814_v38 = vld [vmem:[%s9903_s17 + $0x264] ss:$16 sps:$4 sm:$0xff]  }
  0xe0   :  { %1188 = vmatpush1.bf16.msra.mxu1 %v8683_v39  ;;  %1148 = vmatprep.subr.bf16.mxu0 %v8688_v40  ;;  %v8766_v39 = vld [vmem:[%s9903_s17 + $0x1e4] ss:$16 sps:$4 sm:$0xff]   ;;  %v8764_v40 = vld [vmem:[%s9903_s17 + $0x1e0] ss:$16 sps:$4 sm:$0xff]  }
  0xe1   :  { %1189 = vmatprep.subr.bf16.mxu1 %v8691_v41  ;;  %v8818_v41 = vld [vmem:[%s9903_s17 + $0x240] ss:$16 sps:$4 sm:$0xff]  }
  0xe3   :  { %1149 = vmatpush1.bf16.msra.mxu0 %v8686_v43  ;;  %v8820_v43 = vld [vmem:[%s9903_s17 + $0x244] ss:$16 sps:$4 sm:$0xff]  }
  0xe4   :  { %1190 = vmatpush1.bf16.msra.mxu1 %v8689_v44  ;;  %1150 = vmatprep.subr.bf16.mxu0 %v8694_v45  ;;  %v8769_v44 = vld [vmem:[%s9903_s17 + $0x1c4] ss:$16 sps:$4 sm:$0xff]   ;;  %v8767_v45 = vld [vmem:[%s9903_s17 + $0x1c0] ss:$16 sps:$4 sm:$0xff]  }
  0xe5   :  { %1191 = vmatprep.subr.bf16.mxu1 %v8697_v46  ;;  %v8824_v46 = vld [vmem:[%s9903_s17 + $0x220] ss:$16 sps:$4 sm:$0xff]  }
  0xe7   :  { %1151 = vmatpush2.bf16.msra.mxu0 %v8692_v47  ;;  %v8826_v47 = vld [vmem:[%s9903_s17 + $0x224] ss:$16 sps:$4 sm:$0xff]  }
  0xe8   :  { %1192 = vmatpush2.bf16.msra.mxu1 %v8695_v48  ;;  %1152 = vmatprep.subr.bf16.mxu0 %v8700_v49  ;;  %v8772_v48 = vld [vmem:[%s9903_s17 + $0x1a4] ss:$16 sps:$4 sm:$0xff]   ;;  %v8770_v49 = vld [vmem:[%s9903_s17 + $0x1a0] ss:$16 sps:$4 sm:$0xff]  }
  0xe9   :  { %1193 = vmatprep.subr.bf16.mxu1 %v8703_v50  ;;  %v8830_v50 = vld [vmem:[%s9903_s17 + $0x200] ss:$16 sps:$4 sm:$0xff]  }
  0xeb   :  { %1153 = vmatpush2.bf16.msra.mxu0 %v8698_v51  ;;  %v8832_v51 = vld [vmem:[%s9903_s17 + $0x204] ss:$16 sps:$4 sm:$0xff]  }
  0xec   :  { %1194 = vmatpush2.bf16.msra.mxu1 %v8701_v52  ;;  %1154 = vmatprep.subr.bf16.mxu0 %v8706_v53  ;;  %v8775_v52 = vld [vmem:[%s9903_s17 + $0x184] ss:$16 sps:$4 sm:$0xff]   ;;  %v8773_v53 = vld [vmem:[%s9903_s17 + $0x180] ss:$16 sps:$4 sm:$0xff]  }
  0xed   :  { %1195 = vmatprep.subr.bf16.mxu1 %v8709_v55  ;;  %v8836_v55 = vld [vmem:[%s9903_s17 + $0x3e0] ss:$16 sps:$4 sm:$0xff]  }
  0xef   :  { %1155 = vmatpush2.bf16.msra.mxu0 %v8704_v56  ;;  %v8838_v56 = vld [vmem:[%s9903_s17 + $0x3e4] ss:$16 sps:$4 sm:$0xff]  }
  0xf0   :  { %1196 = vmatpush2.bf16.msra.mxu1 %v8707_v57  ;;  %1156 = vmatprep.subr.bf16.mxu0 %v8712_v58  ;;  %v8778_v57 = vld [vmem:[%s9903_s17 + $0x164] ss:$16 sps:$4 sm:$0xff]   ;;  %v8776_v58 = vld [vmem:[%s9903_s17 + $0x160] ss:$16 sps:$4 sm:$0xff]  }
  0xf1   :  { %1197 = vmatprep.subr.bf16.mxu1 %v8715_v59  ;;  %v8842_v59 = vld [vmem:[%s9903_s17 + $0x3c0] ss:$16 sps:$4 sm:$0xff]  }
  0xf3   :  { %1157 = vmatpush2.bf16.msra.mxu0 %v8710_v61  ;;  %v8844_v61 = vld [vmem:[%s9903_s17 + $0x3c4] ss:$16 sps:$4 sm:$0xff]  }
  0xf4   :  { %1198 = vmatpush2.bf16.msra.mxu1 %v8713_v62  ;;  %1158 = vmatprep.subr.bf16.mxu0 %v8718_v63  ;;  %v8781_v62 = vld [vmem:[%s9903_s17 + $0x144] ss:$16 sps:$4 sm:$0xff]   ;;  %v8779_v63 = vld [vmem:[%s9903_s17 + $0x140] ss:$16 sps:$4 sm:$0xff]  }
  0xf5   :  { %1199 = vmatprep.subr.bf16.mxu1 %v8721_v0  ;;  %v8848_v0 = vld [vmem:[%s9903_s17 + $0x3a0] ss:$16 sps:$4 sm:$0xff]  }
  0xf7   :  { %1159 = vmatpush2.bf16.msra.mxu0 %v8716_v1  ;;  %v8850_v1 = vld [vmem:[%s9903_s17 + $0x3a4] ss:$16 sps:$4 sm:$0xff]  }
  0xf8   :  { %1200 = vmatpush2.bf16.msra.mxu1 %v8719_v2  ;;  %1160 = vmatprep.subr.bf16.mxu0 %v8724_v3  ;;  %v8784_v2 = vld [vmem:[%s9903_s17 + $0x124] ss:$16 sps:$4 sm:$0xff]   ;;  %v8782_v3 = vld [vmem:[%s9903_s17 + $0x120] ss:$16 sps:$4 sm:$0xff]  }
  0xf9   :  { %1201 = vmatprep.subr.bf16.mxu1 %v8727_v4  ;;  %v8854_v4 = vld [vmem:[%s9903_s17 + $0x380] ss:$16 sps:$4 sm:$0xff]  }
  0xfb   :  { %1161 = vmatpush2.bf16.msra.mxu0 %v8722_v5  ;;  %v8856_v5 = vld [vmem:[%s9903_s17 + $0x384] ss:$16 sps:$4 sm:$0xff]  }
  0xfc   :  { %1202 = vmatpush2.bf16.msra.mxu1 %v8725_v6  ;;  %1162 = vmatprep.subr.bf16.mxu0 %v8730_v7  ;;  %v8787_v6 = vld [vmem:[%s9903_s17 + $0x104] ss:$16 sps:$4 sm:$0xff]   ;;  %v8785_v7 = vld [vmem:[%s9903_s17 + $0x100] ss:$16 sps:$4 sm:$0xff]  }
  0xfd   :  { %1203 = vmatprep.subr.bf16.mxu1 %v8733_v8  ;;  %v8860_v8 = vld [vmem:[%s9903_s17 + $0x360] ss:$16 sps:$4 sm:$0xff]  }
  0xff   :  { %1163 = vmatpush2.bf16.msra.mxu0 %v8728_v9  ;;  %v8862_v9 = vld [vmem:[%s9903_s17 + $0x364] ss:$16 sps:$4 sm:$0xff]  }
 0x100   :  { %1204 = vmatpush2.bf16.msra.mxu1 %v8731_v10  ;;  %1164 = vmatprep.subr.bf16.mxu0 %v8736_v11  ;;  %v8793_v10 = vld [vmem:[%s9903_s17 + $0xec] ss:$16 sps:$4 sm:$0xff]   ;;  %v8866_v11 = vld [vmem:[%s9903_s17 + $0x340] ss:$16 sps:$4 sm:$0xff]  }
 0x101   :  { %1205 = vmatprep.subr.bf16.mxu1 %v8739_v12  ;;  %v8868_v12 = vld [vmem:[%s9903_s17 + $0x344] ss:$16 sps:$4 sm:$0xff]  }
 0x103   :  { %1165 = vmatpush2.bf16.msra.mxu0 %v8734_v13  ;;  %v8874_v13 = vld [vmem:[%s9903_s17 + $0x324] ss:$16 sps:$4 sm:$0xff]  }
 0x104   :  { %1206 = vmatpush2.bf16.msra.mxu1 %v8737_v14  ;;  %2014 = vmatprep.subr.bf16.mxu0 %v8742_v15  ;;  %v8872_v14 = vld [vmem:[%s9903_s17 + $0x320] ss:$16 sps:$4 sm:$0xff]   ;;  %v8880_v15 = vld [vmem:[%s9903_s17 + $0x304] ss:$16 sps:$4 sm:$0xff]  }
 0x105   :  { %2055 = vmatprep.subr.bf16.mxu1 %v8790_v23 }
 0x106   :  { %1167 = vmatmul.mubr.bf16.vlgmr.msra.gmra.mxu0 %v10175_v54  ;;  %v8754_v54 = vld [vmem:[%s9903_s17 + $0x64] ss:$16 sps:$4 sm:$0xff]  }
 0x107   :  { %1208 = vmatmul.mubr.bf16.vlgmr.msra.gmra.mxu1 %v10182_v60  ;;  %2015 = vmatpush1.bf16.msra.mxu0 %v8740_v16  ;;  %v8788_v60 = vld [vmem:[%s9903_s17 + $0x2e0] ss:$16 sps:$4 sm:$0xff]  }
 0x108   :  { %2016 = vmatprep.subr.bf16.mxu0 %v8745_v17  ;;  %2056 = vmatpush1.bf16.msra.mxu1 %v8788_v60  ;;  %v8878_v16 = vld [vmem:[%s9903_s17 + $0x300] ss:$16 sps:$4 sm:$0xff]   ;;  %v8886_v17 = vld [vmem:[%s9903_s17 + $0x2ec] ss:$16 sps:$4 sm:$0xff]  }
 0x109   :  { %2057 = vmatprep.subr.bf16.mxu1 %v8796_v26 }
 0x10b   :  { %2017 = vmatpush1.bf16.msra.mxu0 %v8743_v18  ;;  %v10335_v18 = vsub.s32 0, %v10163_v42 }
 0x10c   :  { %2018 = vmatprep.subr.bf16.mxu0 %v8748_v19  ;;  %2058 = vmatpush1.bf16.msra.mxu1 %v8794_v25  ;;  %v10338_v19 = vld [vmem:[%s9898_s13] sm:$0xf]  ;;  %s11317_s13 = sld [smem:[#allocation15_spill]] }
 0x10d   :  { %2059 = vmatprep.subr.bf16.mxu1 %v8802_v30 }
 0x10f   :  { %2019 = vmatpush1.bf16.msra.mxu0 %v8746_v20  ;;  %v10341_v20 = vsub.s32 1, %v10163_v42 }
 0x110   :  { %2020 = vmatprep.subr.bf16.mxu0 %v8751_v21  ;;  %2060 = vmatpush1.bf16.msra.mxu1 %v8800_v29  ;;  %v373_v21 = vrot.slane %v10338_v19, %v10335_v18 }
 0x111   :  { %2061 = vmatprep.subr.bf16.mxu1 %v8808_v34 }
 0x113   :  { %2021 = vmatpush1.bf16.msra.mxu0 %v8749_v22  ;;  %v377_v22 = vrot.slane %v10338_v19, %v10341_v20 }
 0x114   :  { %2022 = vmatprep.subr.bf16.mxu0 %v8754_v54  ;;  %2062 = vmatpush1.bf16.msra.mxu1 %v8806_v33 }
 0x115   :  { %2063 = vmatprep.subr.bf16.mxu1 %v8814_v38 }
 0x117   :  { %2023 = vmatpush1.bf16.msra.mxu0 %v8752_v24 }
 0x118   :  { %2024 = vmatprep.subr.bf16.mxu0 %v8757_v27  ;;  %2064 = vmatpush1.bf16.msra.mxu1 %v8812_v37 }
 0x119   :  { %2065 = vmatprep.subr.bf16.mxu1 %v8820_v43  ;;  %v8811_v43 = vld [vmem:[%s9903_s17 + $0x8c] ss:$16 sps:$4 sm:$0xff]  }
 0x11b   :  { %2025 = vmatpush1.bf16.msra.mxu0 %v8755_v28 }
 0x11c   :  { %2026 = vmatprep.subr.bf16.mxu0 %v8760_v31  ;;  %2066 = vmatpush1.bf16.msra.mxu1 %v8818_v41  ;;  %v8803_v41 = vld [vmem:[%s9903_s17 + $0xa8] ss:$16 sps:$4 sm:$0xff]  }
 0x11d   :  { %2067 = vmatprep.subr.bf16.mxu1 %v8826_v47  ;;  %v8823_v47 = vld [vmem:[%s9903_s17 + $0x4c] ss:$16 sps:$4 sm:$0xff]  }
 0x11f   :  { %2027 = vmatpush1.bf16.msra.mxu0 %v8758_v32 }
 0x120   :  { %2028 = vmatprep.subr.bf16.mxu0 %v8763_v35  ;;  %2068 = vmatpush1.bf16.msra.mxu1 %v8824_v46  ;;  %v8791_v35 = vld [vmem:[%s9903_s17 + $0xe8] ss:$16 sps:$4 sm:$0xff]  }
 0x121   :  { %2069 = vmatprep.subr.bf16.mxu1 %v8832_v51  ;;  %v8815_v46 = vld [vmem:[%s9903_s17 + $0x68] ss:$16 sps:$4 sm:$0xff]   ;;  %v8835_v51 = vld [vmem:[%s9903_s17 + $0xc] ss:$16 sps:$4 sm:$0xff]  }
 0x123   :  { %2029 = vmatpush1.bf16.msra.mxu0 %v8761_v36  ;;  %v8799_v36 = vld [vmem:[%s9903_s17 + $0xcc] ss:$16 sps:$4 sm:$0xff]  }
 0x124   :  { %2030 = vmatprep.subr.bf16.mxu0 %v8766_v39  ;;  %2070 = vmatpush1.bf16.msra.mxu1 %v8830_v50  ;;  %v8797_v39 = vld [vmem:[%s9903_s17 + $0xc8] ss:$16 sps:$4 sm:$0xff]  }
 0x125   :  { %2071 = vmatprep.subr.bf16.mxu1 %v8838_v56  ;;  %v8827_v50 = vld [vmem:[%s9903_s17 + $0x28] ss:$16 sps:$4 sm:$0xff]   ;;  %v8847_v56 = vld [vmem:[%s9903_s17 + $0x1cc] ss:$16 sps:$4 sm:$0xff]  }
 0x127   :  { %2031 = vmatpush2.bf16.msra.mxu0 %v8764_v40  ;;  %v8805_v40 = vld [vmem:[%s9903_s17 + $0xac] ss:$16 sps:$4 sm:$0xff]  }
 0x128   :  { %2032 = vmatprep.subr.bf16.mxu0 %v8769_v44  ;;  %2072 = vmatpush2.bf16.msra.mxu1 %v8836_v55  ;;  %v8809_v44 = vld [vmem:[%s9903_s17 + $0x88] ss:$16 sps:$4 sm:$0xff]  }
 0x129   :  { %2073 = vmatprep.subr.bf16.mxu1 %v8844_v61  ;;  %v8839_v55 = vld [vmem:[%s9903_s17 + $0x1e8] ss:$16 sps:$4 sm:$0xff]   ;;  %v8859_v61 = vld [vmem:[%s9903_s17 + $0x18c] ss:$16 sps:$4 sm:$0xff]  }
 0x12b   :  { %2033 = vmatpush2.bf16.msra.mxu0 %v8767_v45  ;;  %v8817_v45 = vld [vmem:[%s9903_s17 + $0x6c] ss:$16 sps:$4 sm:$0xff]  }
 0x12c   :  { %2034 = vmatprep.subr.bf16.mxu0 %v8772_v48  ;;  %2074 = vmatpush2.bf16.msra.mxu1 %v8842_v59  ;;  %v8821_v48 = vld [vmem:[%s9903_s17 + $0x48] ss:$16 sps:$4 sm:$0xff]  }
 0x12d   :  { %2075 = vmatprep.subr.bf16.mxu1 %v8850_v1  ;;  %v8851_v59 = vld [vmem:[%s9903_s17 + $0x1a8] ss:$16 sps:$4 sm:$0xff]   ;;  %v8871_v1 = vld [vmem:[%s9903_s17 + $0x14c] ss:$16 sps:$4 sm:$0xff]  }
 0x12f   :  { %2035 = vmatpush2.bf16.msra.mxu0 %v8770_v49  ;;  %v8829_v49 = vld [vmem:[%s9903_s17 + $0x2c] ss:$16 sps:$4 sm:$0xff]  }
 0x130   :  { %2036 = vmatprep.subr.bf16.mxu0 %v8775_v52  ;;  %2076 = vmatpush2.bf16.msra.mxu1 %v8848_v0  ;;  %v8833_v52 = vld [vmem:[%s9903_s17 + $0x8] ss:$16 sps:$4 sm:$0xff]  }
 0x131   :  { %2077 = vmatprep.subr.bf16.mxu1 %v8856_v5  ;;  %v8863_v0 = vld [vmem:[%s9903_s17 + $0x168] ss:$16 sps:$4 sm:$0xff]   ;;  %v8877_v5 = vld [vmem:[%s9903_s17 + $0x12c] ss:$16 sps:$4 sm:$0xff]  }
 0x133   :  { %2037 = vmatpush2.bf16.msra.mxu0 %v8773_v53  ;;  %v8841_v53 = vld [vmem:[%s9903_s17 + $0x1ec] ss:$16 sps:$4 sm:$0xff]  }
 0x134   :  { %2038 = vmatprep.subr.bf16.mxu0 %v8778_v57  ;;  %2078 = vmatpush2.bf16.msra.mxu1 %v8854_v4  ;;  %v8845_v57 = vld [vmem:[%s9903_s17 + $0x1c8] ss:$16 sps:$4 sm:$0xff]   ;;  %v10381_v4 = vsub.s32 3, %v10163_v42 }
 0x135   :  { %2079 = vmatprep.subr.bf16.mxu1 %v8862_v9 }
 0x137   :  { %2039 = vmatpush2.bf16.msra.mxu0 %v8776_v58  ;;  %v8853_v58 = vld [vmem:[%s9903_s17 + $0x1ac] ss:$16 sps:$4 sm:$0xff]  }
 0x138   :  { %2040 = vmatprep.subr.bf16.mxu0 %v8781_v62  ;;  %2080 = vmatpush2.bf16.msra.mxu1 %v8860_v8  ;;  %v8857_v62 = vld [vmem:[%s9903_s17 + $0x188] ss:$16 sps:$4 sm:$0xff]  }
 0x139   :  { %2081 = vmatprep.subr.bf16.mxu1 %v8868_v12  ;;  %v8875_v8 = vld [vmem:[%s9903_s17 + $0x128] ss:$16 sps:$4 sm:$0xff]  }
 0x13b   :  { %2041 = vmatpush2.bf16.msra.mxu0 %v8779_v63  ;;  %v8865_v63 = vld [vmem:[%s9903_s17 + $0x16c] ss:$16 sps:$4 sm:$0xff]  }
 0x13c   :  { %2042 = vmatprep.subr.bf16.mxu0 %v8784_v2  ;;  %2082 = vmatpush2.bf16.msra.mxu1 %v8866_v11  ;;  %v10377_v2 = vsub.s32 2, %v10163_v42  ;;  %v8883_v11 = vld [vmem:[%s9903_s17 + $0x10c] ss:$16 sps:$4 sm:$0xff]  }
 0x13d   :  { %2083 = vmatprep.subr.bf16.mxu1 %v8874_v13 }
 0x13f   :  { %2043 = vmatpush2.bf16.msra.mxu0 %v8782_v3  ;;  %v8869_v3 = vld [vmem:[%s9903_s17 + $0x148] ss:$16 sps:$4 sm:$0xff]  }
 0x140   :  { %2044 = vmatprep.subr.bf16.mxu0 %v8787_v6  ;;  %2084 = vmatpush2.bf16.msra.mxu1 %v8872_v14  ;;  %v381_v6 = vrot.slane %v10338_v19, %v10377_v2 }
 0x141   :  { %2085 = vmatprep.subr.bf16.mxu1 %v8880_v15 }
 0x143   :  { %2045 = vmatpush2.bf16.msra.mxu0 %v8785_v7  ;;  %v385_v7 = vrot.slane %v10338_v19, %v10381_v4 }
 0x144   :  { %2096 = vmatprep.subr.bf16.mxu0 %v8793_v10  ;;  %2086 = vmatpush2.bf16.msra.mxu1 %v8878_v16  ;;  %v8881_v16 = vld [vmem:[%s9903_s17 + $0x108] ss:$16 sps:$4 sm:$0xff]  }
 0x145   :  { %2137 = vmatprep.subr.bf16.mxu1 %v8886_v17 }
 0x186   :  { %v1086_v23 = vpop.f32.mrf.mxu0 }
 0x187   :  { %v1127_v54 = vpop.f32.mrf.mxu1  ;;  %v1087_v60 = vadd.f32 %v1086_v23, %v373_v21 }
 0x188   :  { %v1088_v24 = vpop.f32.mrf.mxu0 }
 0x189   :  { %v1129_v25 = vpop.f32.mrf.mxu1  ;;  %v1128_v26 = vadd.f32 %v1127_v54, %v1087_v60  ;;  %v1089_v27 = vadd.f32 %v1088_v24, %v377_v22  ;;  %v8884_v24 = vld [vmem:[%s9903_s17 + $0x2e8] ss:$16 sps:$4 sm:$0xff]  }
 0x18a   :  { %v1090_v28 = vpop.f32.mrf.mxu0 }
 0x18b   :  { %v1131_v29 = vpop.f32.mrf.mxu1  ;;  %v1130_v30 = vadd.f32 %v1129_v25, %v1089_v27  ;;  %v1216_v31 = vmax.f32 %v1128_v26, 0.0  ;;  %v8889_v25 = vld [vmem:[%s9903_s17 + $0x2cc] ss:$16 sps:$4 sm:$0xff]   ;;  %v8887_v28 = vld [vmem:[%s9903_s17 + $0x2c8] ss:$16 sps:$4 sm:$0xff]  }
 0x18c   :  { %v1091_v32 = vpop.f32.mrf.mxu0  ;;  %v8892_v29 = vld [vmem:[%s9903_s17 + $0x2ac] ss:$16 sps:$4 sm:$0xff]  }
 0x18d   :  { %v1132_v33 = vpop.f32.mrf.mxu1  ;;  %v1217_v34 = vmax.f32 %v1130_v30, 0.0  ;;  %v10349_v38 = vpack.c.bf16 %v1216_v31, %v1216_v31  ;;  %v8890_v30 = vld [vmem:[%s9903_s17 + $0x2a8] ss:$16 sps:$4 sm:$0xff]   ;;  %v8895_v31 = vld [vmem:[%s9903_s17 + $0x28c] ss:$16 sps:$4 sm:$0xff]  }
 0x18e   :  { %v8932_v32 = vld [vmem:[%s9913_s25 + $0xe0] ss:$16 sps:$4 sm:$0xff]   ;;  %v8934_v33 = vld [vmem:[%s9913_s25 + $0xe4] ss:$16 sps:$4 sm:$0xff]  }
 0x18f   :  { %v1221_v37 = vpack.c.bf16 %v1217_v34, %v1217_v34  ;;  %v8937_v34 = vld [vmem:[%s9913_s25 + $0xc4] ss:$16 sps:$4 sm:$0xff]  }
 0x191   :  { %2046 = vmatprep.mubr.bf16.mxu0 %v1221_v37 }
 0x192   :  { %2047 = vmatmul.mubr.bf16.vlgmr.msra.gmra.mxu0 %v10349_v38 }
 0x193   :  { %2097 = vmatpush1.bf16.msra.mxu0 %v8791_v35  ;;  %2128 = vmatprep.mubr.bf16.mxu0 %v1221_v37  ;;  %v8893_v35 = vld [vmem:[%s9903_s17 + $0x288] ss:$16 sps:$4 sm:$0xff]   ;;  %v8898_v37 = vld [vmem:[%s9903_s17 + $0x26c] ss:$16 sps:$4 sm:$0xff]  }
 0x194   :  { %2098 = vmatprep.subr.bf16.mxu0 %v8799_v36  ;;  %v8935_v36 = vld [vmem:[%s9913_s25 + $0xc0] ss:$16 sps:$4 sm:$0xff]  }
 0x197   :  { %2099 = vmatpush1.bf16.msra.mxu0 %v8797_v39  ;;  %v8896_v39 = vld [vmem:[%s9903_s17 + $0x268] ss:$16 sps:$4 sm:$0xff]  }
 0x198   :  { %2100 = vmatprep.subr.bf16.mxu0 %v8805_v40  ;;  %v8938_v40 = vld [vmem:[%s9913_s25 + $0xa0] ss:$16 sps:$4 sm:$0xff]  }
 0x19b   :  { %2101 = vmatpush1.bf16.msra.mxu0 %v8803_v41  ;;  %v8901_v41 = vld [vmem:[%s9903_s17 + $0x24c] ss:$16 sps:$4 sm:$0xff]  }
 0x19c   :  { %2102 = vmatprep.subr.bf16.mxu0 %v8811_v43  ;;  %v8943_v43 = vld [vmem:[%s9913_s25 + $0x84] ss:$16 sps:$4 sm:$0xff]  }
 0x19f   :  { %2103 = vmatpush1.bf16.msra.mxu0 %v8809_v44  ;;  %v8899_v44 = vld [vmem:[%s9903_s17 + $0x248] ss:$16 sps:$4 sm:$0xff]  }
 0x1a0   :  { %2104 = vmatprep.subr.bf16.mxu0 %v8817_v45  ;;  %v8941_v45 = vld [vmem:[%s9913_s25 + $0x80] ss:$16 sps:$4 sm:$0xff]  }
 0x1a3   :  { %2105 = vmatpush1.bf16.msra.mxu0 %v8815_v46  ;;  %v8904_v46 = vld [vmem:[%s9903_s17 + $0x22c] ss:$16 sps:$4 sm:$0xff]  }
 0x1a4   :  { %2106 = vmatprep.subr.bf16.mxu0 %v8823_v47  ;;  %v8946_v47 = vld [vmem:[%s9913_s25 + $0x64] ss:$16 sps:$4 sm:$0xff]  }
 0x1a7   :  { %2107 = vmatpush1.bf16.msra.mxu0 %v8821_v48  ;;  %v8902_v48 = vld [vmem:[%s9903_s17 + $0x228] ss:$16 sps:$4 sm:$0xff]  }
 0x1a8   :  { %2108 = vmatprep.subr.bf16.mxu0 %v8829_v49  ;;  %v8944_v49 = vld [vmem:[%s9913_s25 + $0x60] ss:$16 sps:$4 sm:$0xff]  }
 0x1ab   :  { %2109 = vmatpush1.bf16.msra.mxu0 %v8827_v50  ;;  %v8907_v50 = vld [vmem:[%s9903_s17 + $0x20c] ss:$16 sps:$4 sm:$0xff]  }
 0x1ac   :  { %2110 = vmatprep.subr.bf16.mxu0 %v8835_v51  ;;  %v8949_v51 = vld [vmem:[%s9913_s25 + $0x44] ss:$16 sps:$4 sm:$0xff]  }
 0x1af   :  { %2111 = vmatpush1.bf16.msra.mxu0 %v8833_v52  ;;  %v8905_v52 = vld [vmem:[%s9903_s17 + $0x208] ss:$16 sps:$4 sm:$0xff]  }
 0x1b0   :  { %2112 = vmatprep.subr.bf16.mxu0 %v8841_v53  ;;  %v8947_v53 = vld [vmem:[%s9913_s25 + $0x40] ss:$16 sps:$4 sm:$0xff]  }
 0x1b3   :  { %2113 = vmatpush2.bf16.msra.mxu0 %v8839_v55  ;;  %v8910_v55 = vld [vmem:[%s9903_s17 + $0x3ec] ss:$16 sps:$4 sm:$0xff]  }
 0x1b4   :  { %2114 = vmatprep.subr.bf16.mxu0 %v8847_v56  ;;  %v8952_v56 = vld [vmem:[%s9913_s25 + $0x24] ss:$16 sps:$4 sm:$0xff]  }
 0x1b7   :  { %2115 = vmatpush2.bf16.msra.mxu0 %v8845_v57  ;;  %v8908_v57 = vld [vmem:[%s9903_s17 + $0x3e8] ss:$16 sps:$4 sm:$0xff]  }
 0x1b8   :  { %2116 = vmatprep.subr.bf16.mxu0 %v8853_v58  ;;  %v8950_v58 = vld [vmem:[%s9913_s25 + $0x20] ss:$16 sps:$4 sm:$0xff]  }
 0x1bb   :  { %2117 = vmatpush2.bf16.msra.mxu0 %v8851_v59  ;;  %v8913_v59 = vld [vmem:[%s9903_s17 + $0x3cc] ss:$16 sps:$4 sm:$0xff]  }
 0x1bc   :  { %2118 = vmatprep.subr.bf16.mxu0 %v8859_v61  ;;  %v8955_v61 = vld [vmem:[%s9913_s25 + $0x4] ss:$16 sps:$4 sm:$0xff]  }
 0x1bf   :  { %2119 = vmatpush2.bf16.msra.mxu0 %v8857_v62  ;;  %v8911_v62 = vld [vmem:[%s9903_s17 + $0x3c8] ss:$16 sps:$4 sm:$0xff]  }
 0x1c0   :  { %2120 = vmatprep.subr.bf16.mxu0 %v8865_v63  ;;  %v8953_v63 = vld [vmem:[%s9913_s25] ss:$16 sps:$4 sm:$0xff]  }
 0x1c3   :  { %2121 = vmatpush2.bf16.msra.mxu0 %v8863_v0  ;;  %v8916_v0 = vld [vmem:[%s9903_s17 + $0x3ac] ss:$16 sps:$4 sm:$0xff]  }
 0x1c4   :  { %2122 = vmatprep.subr.bf16.mxu0 %v8871_v1  ;;  %v8958_v1 = vld [vmem:[%s9913_s25 + $0x1e4] ss:$16 sps:$4 sm:$0xff]  }
 0x1c6   :  { %v1168_v9 = vpop.f32.mrf.mxu0 }
 0x1c7   :  { %v1209_v10 = vpop.f32.mrf.mxu1  ;;  %v1169_v12 = vadd.f32 %v1168_v9, %v381_v6  ;;  %2123 = vmatpush2.bf16.msra.mxu0 %v8869_v3  ;;  %v8914_v3 = vld [vmem:[%s9903_s17 + $0x3a8] ss:$16 sps:$4 sm:$0xff]   ;;  %v8919_v6 = vld [vmem:[%s9903_s17 + $0x38c] ss:$16 sps:$4 sm:$0xff]   ;;  %v8959_v9 = vld [vmem:[%s9913_s25 + $0x1c0] ss:$16 sps:$4 sm:$0xff]  }
 0x1c8   :  { %v1170_v13 = vpop.f32.mrf.mxu0  ;;  %2124 = vmatprep.subr.bf16.mxu0 %v8877_v5  ;;  %v8956_v5 = vld [vmem:[%s9913_s25 + $0x1e0] ss:$16 sps:$4 sm:$0xff]  }
 0x1c9   :  { %v1211_v42 = vpop.f32.mrf.mxu1  ;;  %v1210_v14 = vadd.f32 %v1209_v10, %v1169_v12  ;;  %v1171_v15 = vadd.f32 %v1170_v13, %v385_v7  ;;  %v8961_v7 = vld [vmem:[%s9913_s25 + $0x1c4] ss:$16 sps:$4 sm:$0xff]   ;;  %v8922_v10 = vld [vmem:[%s9903_s17 + $0x36c] ss:$16 sps:$4 sm:$0xff]   ;;  %v8920_v12 = vld [vmem:[%s9903_s17 + $0x368] ss:$16 sps:$4 sm:$0xff]  }
 0x1ca   :  { %v1172_v17 = vpop.f32.mrf.mxu0  ;;  %v8962_v13 = vld [vmem:[%s9913_s25 + $0x1a0] ss:$16 sps:$4 sm:$0xff]  }
 0x1cb   :  { %v1213_v21 = vpop.f32.mrf.mxu1  ;;  %v1212_v22 = vadd.f32 %v1211_v42, %v1171_v15  ;;  %2125 = vmatpush2.bf16.msra.mxu0 %v8875_v8  ;;  %v1218_v19 = vmax.f32 %v1210_v14, 0.0  ;;  %v8917_v8 = vld [vmem:[%s9903_s17 + $0x388] ss:$16 sps:$4 sm:$0xff]   ;;  %v8925_v42 = vld [vmem:[%s9903_s17 + $0x34c] ss:$16 sps:$4 sm:$0xff]  }
 0x1cc   :  { %v1173_v23 = vpop.f32.mrf.mxu0  ;;  %2126 = vmatprep.subr.bf16.mxu0 %v8883_v11  ;;  %v8964_v11 = vld [vmem:[%s9913_s25 + $0x1a4] ss:$16 sps:$4 sm:$0xff]   ;;  %v8923_v15 = vld [vmem:[%s9903_s17 + $0x348] ss:$16 sps:$4 sm:$0xff]   ;;  %v8928_v17 = vld [vmem:[%s9903_s17 + $0x32c] ss:$16 sps:$4 sm:$0xff]  }
 0x1cd   :  { %v1214_v54 = vpop.f32.mrf.mxu1  ;;  %v1219_v60 = vmax.f32 %v1212_v22, 0.0  ;;  %v10393_v27 = vpack.c.bf16 %v1218_v19, %v1218_v19  ;;  %v8967_v14 = vld [vmem:[%s9913_s25 + $0x184] ss:$16 sps:$4 sm:$0xff]   ;;  %v8926_v22 = vld [vmem:[%s9903_s17 + $0x328] ss:$16 sps:$4 sm:$0xff]  }
 0x1ce   :  { %v8970_v21 = vld [vmem:[%s9913_s25 + $0x164] ss:$16 sps:$4 sm:$0xff]   ;;  %v8968_v19 = vld [vmem:[%s9913_s25 + $0x160] ss:$16 sps:$4 sm:$0xff]   ;;  %v8931_v23 = vld [vmem:[%s9903_s17 + $0x30c] ss:$16 sps:$4 sm:$0xff]  }
 0x1cf   :  { %v1223_v26 = vpack.c.bf16 %v1219_v60, %v1219_v60  ;;  %2127 = vmatpush2.bf16.msra.mxu0 %v8881_v16  ;;  %v8965_v16 = vld [vmem:[%s9913_s25 + $0x180] ss:$16 sps:$4 sm:$0xff]   ;;  %v8929_v54 = vld [vmem:[%s9903_s17 + $0x308] ss:$16 sps:$4 sm:$0xff]   ;;  %v8973_v60 = vld [vmem:[%s9913_s25 + $0x144] ss:$16 sps:$4 sm:$0xff]  }
 0x1d0   :  { %2986 = vmatprep.subr.bf16.mxu0 %v8934_v33  ;;  %v8988_v33 = vld [vmem:[%s9913_s25 + $0x2c4] ss:$16 sps:$4 sm:$0xff]   ;;  %s11318_s17 = sld [smem:[#allocation12_spill]] }
 0x1d1   :  { %2087 = vmatprep.mubr.bf16.mxu1 %v1223_v26 }
 0x1d2   :  { %2129 = vmatmul.mubr.bf16.vlgmr.msra.gmra.mxu0 %v10349_v38  ;;  %2088 = vmatmul.mubr.bf16.vlgmr.msra.gmra.mxu1 %v10393_v27  ;;  %v8940_v38 = vld [vmem:[%s9913_s25 + $0xa4] ss:$16 sps:$4 sm:$0xff]  }
 0x1d3   :  { %2138 = vmatpush1.bf16.msra.mxu1 %v8884_v24  ;;  %2169 = vmatprep.mubr.bf16.mxu1 %v1223_v26  ;;  %v8971_v24 = vld [vmem:[%s9913_s25 + $0x140] ss:$16 sps:$4 sm:$0xff]  }
 0x1d4   :  { %2139 = vmatprep.subr.bf16.mxu1 %v8889_v25  ;;  %2987 = vmatpush1.bf16.msra.mxu0 %v8932_v32  ;;  %v8976_v25 = vld [vmem:[%s9913_s25 + $0x124] ss:$16 sps:$4 sm:$0xff]   ;;  %v8974_v26 = vld [vmem:[%s9913_s25 + $0x120] ss:$16 sps:$4 sm:$0xff]  }
 0x1d5   :  { %2988 = vmatprep.subr.bf16.mxu0 %v8937_v34  ;;  %v8986_v32 = vld [vmem:[%s9913_s25 + $0x2c0] ss:$16 sps:$4 sm:$0xff]  }
 0x1d6   :  { %v8992_v34 = vld [vmem:[%s9913_s25 + $0x2a0] ss:$16 sps:$4 sm:$0xff]  }
 0x1d7   :  { %2140 = vmatpush1.bf16.msra.mxu1 %v8887_v28  ;;  %v8979_v28 = vld [vmem:[%s9913_s25 + $0x104] ss:$16 sps:$4 sm:$0xff]  }
 0x1d8   :  { %2141 = vmatprep.subr.bf16.mxu1 %v8892_v29  ;;  %2989 = vmatpush1.bf16.msra.mxu0 %v8935_v36  ;;  %v8977_v29 = vld [vmem:[%s9913_s25 + $0x100] ss:$16 sps:$4 sm:$0xff]  }
 0x1d9   :  { %2990 = vmatprep.subr.bf16.mxu0 %v8940_v38  ;;  %v8998_v36 = vld [vmem:[%s9913_s25 + $0x280] ss:$16 sps:$4 sm:$0xff]  }
 0x1da   :  { %v9004_v38 = vld [vmem:[%s9913_s25 + $0x260] ss:$16 sps:$4 sm:$0xff]  }
 0x1db   :  { %2142 = vmatpush1.bf16.msra.mxu1 %v8890_v30  ;;  %v8980_v30 = vld [vmem:[%s9913_s25 + $0x2e0] ss:$16 sps:$4 sm:$0xff]  }
 0x1dc   :  { %2143 = vmatprep.subr.bf16.mxu1 %v8895_v31  ;;  %2991 = vmatpush1.bf16.msra.mxu0 %v8938_v40  ;;  %v8982_v31 = vld [vmem:[%s9913_s25 + $0x2e4] ss:$16 sps:$4 sm:$0xff]   ;;  %v9010_v40 = vld [vmem:[%s9913_s25 + $0x240] ss:$16 sps:$4 sm:$0xff]  }
 0x1dd   :  { %2992 = vmatprep.subr.bf16.mxu0 %v8943_v43  ;;  %v9016_v43 = vld [vmem:[%s9913_s25 + $0x220] ss:$16 sps:$4 sm:$0xff]  }
 0x1df   :  { %2144 = vmatpush1.bf16.msra.mxu1 %v8893_v35  ;;  %v8994_v35 = vld [vmem:[%s9913_s25 + $0x2a4] ss:$16 sps:$4 sm:$0xff]  }
 0x1e0   :  { %2145 = vmatprep.subr.bf16.mxu1 %v8898_v37  ;;  %2993 = vmatpush1.bf16.msra.mxu0 %v8941_v45  ;;  %v9000_v37 = vld [vmem:[%s9913_s25 + $0x284] ss:$16 sps:$4 sm:$0xff]   ;;  %v9022_v45 = vld [vmem:[%s9913_s25 + $0x200] ss:$16 sps:$4 sm:$0xff]  }
 0x1e1   :  { %2994 = vmatprep.subr.bf16.mxu0 %v8946_v47  ;;  %v9028_v47 = vld [vmem:[%s9913_s25 + $0x3e0] ss:$16 sps:$4 sm:$0xff]  }
 0x1e3   :  { %2146 = vmatpush1.bf16.msra.mxu1 %v8896_v39  ;;  %v9006_v39 = vld [vmem:[%s9913_s25 + $0x264] ss:$16 sps:$4 sm:$0xff]  }
 0x1e4   :  { %2147 = vmatprep.subr.bf16.mxu1 %v8901_v41  ;;  %2995 = vmatpush1.bf16.msra.mxu0 %v8944_v49  ;;  %v9012_v41 = vld [vmem:[%s9913_s25 + $0x244] ss:$16 sps:$4 sm:$0xff]   ;;  %v9034_v49 = vld [vmem:[%s9913_s25 + $0x3c0] ss:$16 sps:$4 sm:$0xff]  }
 0x1e5   :  { %2996 = vmatprep.subr.bf16.mxu0 %v8949_v51  ;;  %v9040_v51 = vld [vmem:[%s9913_s25 + $0x3a0] ss:$16 sps:$4 sm:$0xff]  }
 0x1e7   :  { %2148 = vmatpush1.bf16.msra.mxu1 %v8899_v44  ;;  %v9018_v44 = vld [vmem:[%s9913_s25 + $0x224] ss:$16 sps:$4 sm:$0xff]  }
 0x1e8   :  { %2149 = vmatprep.subr.bf16.mxu1 %v8904_v46  ;;  %2997 = vmatpush1.bf16.msra.mxu0 %v8947_v53  ;;  %v9024_v46 = vld [vmem:[%s9913_s25 + $0x204] ss:$16 sps:$4 sm:$0xff]   ;;  %v9046_v53 = vld [vmem:[%s9913_s25 + $0x380] ss:$16 sps:$4 sm:$0xff]  }
 0x1e9   :  { %2998 = vmatprep.subr.bf16.mxu0 %v8952_v56  ;;  %v9052_v56 = vld [vmem:[%s9913_s25 + $0x360] ss:$16 sps:$4 sm:$0xff]  }
 0x1eb   :  { %2150 = vmatpush1.bf16.msra.mxu1 %v8902_v48  ;;  %v9030_v48 = vld [vmem:[%s9913_s25 + $0x3e4] ss:$16 sps:$4 sm:$0xff]  }
 0x1ec   :  { %2151 = vmatprep.subr.bf16.mxu1 %v8907_v50  ;;  %2999 = vmatpush1.bf16.msra.mxu0 %v8950_v58  ;;  %v9036_v50 = vld [vmem:[%s9913_s25 + $0x3c4] ss:$16 sps:$4 sm:$0xff]   ;;  %v9058_v58 = vld [vmem:[%s9913_s25 + $0x340] ss:$16 sps:$4 sm:$0xff]  }
 0x1ed   :  { %3000 = vmatprep.subr.bf16.mxu0 %v8955_v61 }
 0x1ef   :  { %2152 = vmatpush1.bf16.msra.mxu1 %v8905_v52  ;;  %v9042_v52 = vld [vmem:[%s9913_s25 + $0x3a4] ss:$16 sps:$4 sm:$0xff]  }
 0x1f0   :  { %2153 = vmatprep.subr.bf16.mxu1 %v8910_v55  ;;  %3001 = vmatpush1.bf16.msra.mxu0 %v8953_v63  ;;  %v9048_v55 = vld [vmem:[%s9913_s25 + $0x384] ss:$16 sps:$4 sm:$0xff]  }
 0x1f1   :  { %3002 = vmatprep.subr.bf16.mxu0 %v8958_v1 }
 0x1f3   :  { %2154 = vmatpush2.bf16.msra.mxu1 %v8908_v57  ;;  %v9054_v57 = vld [vmem:[%s9913_s25 + $0x364] ss:$16 sps:$4 sm:$0xff]  }
 0x1f4   :  { %2155 = vmatprep.subr.bf16.mxu1 %v8913_v59  ;;  %3003 = vmatpush2.bf16.msra.mxu0 %v8956_v5  ;;  %v9060_v59 = vld [vmem:[%s9913_s25 + $0x344] ss:$16 sps:$4 sm:$0xff]  }
 0x1f5   :  { %3004 = vmatprep.subr.bf16.mxu0 %v8961_v7  ;;  %v9078_v7 = vld [vmem:[%s9913_s25 + $0x2ec] ss:$16 sps:$4 sm:$0xff]  }
 0x1f7   :  { %2156 = vmatpush2.bf16.msra.mxu1 %v8911_v62  ;;  %v9066_v62 = vld [vmem:[%s9913_s25 + $0x324] ss:$16 sps:$4 sm:$0xff]  }
 0x1f8   :  { %2157 = vmatprep.subr.bf16.mxu1 %v8916_v0  ;;  %3005 = vmatpush2.bf16.msra.mxu0 %v8959_v9  ;;  %v9064_v0 = vld [vmem:[%s9913_s25 + $0x320] ss:$16 sps:$4 sm:$0xff]  }
 0x1f9   :  { %3006 = vmatprep.subr.bf16.mxu0 %v8964_v11  ;;  %v10501_v11 = vld [vmem:[%s9888_s5] sm:$0xff]  ;;  %s11315_s5 = sld [smem:[#allocation13_spill]] }
 0x1fb   :  { %2158 = vmatpush2.bf16.msra.mxu1 %v8914_v3  ;;  %v9072_v3 = vld [vmem:[%s9913_s25 + $0x304] ss:$16 sps:$4 sm:$0xff]  }
 0x1fc   :  { %2159 = vmatprep.subr.bf16.mxu1 %v8919_v6  ;;  %3007 = vmatpush2.bf16.msra.mxu0 %v8962_v13  ;;  %v9070_v6 = vld [vmem:[%s9913_s25 + $0x300] ss:$16 sps:$4 sm:$0xff]  }
 0x1fd   :  { %3008 = vmatprep.subr.bf16.mxu0 %v8967_v14 }
 0x1ff   :  { %2160 = vmatpush2.bf16.msra.mxu1 %v8917_v8  ;;  %v10494_v8 = vld [vmem:[%s9908_s21] sm:$0xf]  ;;  %s11319_s21 = sld [smem:[#allocation18_spill]] }
 0x200   :  { %2161 = vmatprep.subr.bf16.mxu1 %v8922_v10  ;;  %3009 = vmatpush2.bf16.msra.mxu0 %v8965_v16  ;;  %v1357_v9 = vrot.slane %v10494_v8, %v10335_v18  ;;  %v1361_v10 = vrot.slane %v10494_v8, %v10341_v20 }
 0x201   :  { %3010 = vmatprep.subr.bf16.mxu0 %v8970_v21 }
 0x203   :  { %2162 = vmatpush2.bf16.msra.mxu1 %v8920_v12  ;;  %v238_v12 = vunpack.c.l.bf16 %v10501_v11 }
 0x204   :  { %2163 = vmatprep.subr.bf16.mxu1 %v8925_v42  ;;  %3011 = vmatpush2.bf16.msra.mxu0 %v8968_v19 }
 0x205   :  { %3012 = vmatprep.subr.bf16.mxu0 %v8973_v60 }
 0x207   :  { %2164 = vmatpush2.bf16.msra.mxu1 %v8923_v15 }
 0x208   :  { %2165 = vmatprep.subr.bf16.mxu1 %v8928_v17  ;;  %3013 = vmatpush2.bf16.msra.mxu0 %v8971_v24  ;;  %v2180_v17 = vcombine.high %v238_v12, %v238_v12 }
 0x209   :  { %3014 = vmatprep.subr.bf16.mxu0 %v8976_v25 }
 0x20b   :  { %2166 = vmatpush2.bf16.msra.mxu1 %v8926_v22 }
 0x20c   :  { %2167 = vmatprep.subr.bf16.mxu1 %v8931_v23  ;;  %3015 = vmatpush2.bf16.msra.mxu0 %v8974_v26 }
 0x20d   :  { %3016 = vmatprep.subr.bf16.mxu0 %v8979_v28 }
 0x20f   :  { %2168 = vmatpush2.bf16.msra.mxu1 %v8929_v54 }
 0x210   :  { %3017 = vmatpush2.bf16.msra.mxu0 %v8977_v29  ;;  %3027 = vmatprep.subr.bf16.mxu1 %v8982_v31  ;;  %v8983_v31 = vld [vmem:[%s9913_s25 + $0xe8] ss:$16 sps:$4 sm:$0xff]  }
 0x212   :  { %2170 = vmatmul.mubr.bf16.vlgmr.msra.gmra.mxu1 %v10393_v27  ;;  %v8985_v27 = vld [vmem:[%s9913_s25 + $0xec] ss:$16 sps:$4 sm:$0xff]  }
 0x213   :  { %3028 = vmatpush1.bf16.msra.mxu1 %v8980_v30  ;;  %3068 = vmatprep.subr.bf16.mxu0 %v8985_v27 }
 0x214   :  { %3029 = vmatprep.subr.bf16.mxu1 %v8988_v33  ;;  %v8989_v33 = vld [vmem:[%s9913_s25 + $0xc8] ss:$16 sps:$4 sm:$0xff]  }
 0x217   :  { %3030 = vmatpush1.bf16.msra.mxu1 %v8986_v32  ;;  %v8991_v32 = vld [vmem:[%s9913_s25 + $0xcc] ss:$16 sps:$4 sm:$0xff]  }
 0x218   :  { %3031 = vmatprep.subr.bf16.mxu1 %v8994_v35  ;;  %v8995_v35 = vld [vmem:[%s9913_s25 + $0xa8] ss:$16 sps:$4 sm:$0xff]  }
 0x21b   :  { %3032 = vmatpush1.bf16.msra.mxu1 %v8992_v34  ;;  %v8997_v34 = vld [vmem:[%s9913_s25 + $0xac] ss:$16 sps:$4 sm:$0xff]  }
 0x21c   :  { %3033 = vmatprep.subr.bf16.mxu1 %v9000_v37  ;;  %v9001_v37 = vld [vmem:[%s9913_s25 + $0x88] ss:$16 sps:$4 sm:$0xff]  }
 0x21f   :  { %3034 = vmatpush1.bf16.msra.mxu1 %v8998_v36  ;;  %v9003_v36 = vld [vmem:[%s9913_s25 + $0x8c] ss:$16 sps:$4 sm:$0xff]  }
 0x220   :  { %3035 = vmatprep.subr.bf16.mxu1 %v9006_v39  ;;  %v9007_v39 = vld [vmem:[%s9913_s25 + $0x68] ss:$16 sps:$4 sm:$0xff]  }
 0x223   :  { %3036 = vmatpush1.bf16.msra.mxu1 %v9004_v38  ;;  %v9009_v38 = vld [vmem:[%s9913_s25 + $0x6c] ss:$16 sps:$4 sm:$0xff]  }
 0x224   :  { %3037 = vmatprep.subr.bf16.mxu1 %v9012_v41  ;;  %v9013_v41 = vld [vmem:[%s9913_s25 + $0x48] ss:$16 sps:$4 sm:$0xff]  }
 0x227   :  { %3038 = vmatpush1.bf16.msra.mxu1 %v9010_v40  ;;  %v9015_v40 = vld [vmem:[%s9913_s25 + $0x4c] ss:$16 sps:$4 sm:$0xff]  }
 0x228   :  { %3039 = vmatprep.subr.bf16.mxu1 %v9018_v44  ;;  %v9019_v44 = vld [vmem:[%s9913_s25 + $0x28] ss:$16 sps:$4 sm:$0xff]  }
 0x22b   :  { %3040 = vmatpush1.bf16.msra.mxu1 %v9016_v43  ;;  %v9021_v43 = vld [vmem:[%s9913_s25 + $0x2c] ss:$16 sps:$4 sm:$0xff]  }
 0x22c   :  { %3041 = vmatprep.subr.bf16.mxu1 %v9024_v46  ;;  %v9025_v46 = vld [vmem:[%s9913_s25 + $0x8] ss:$16 sps:$4 sm:$0xff]  }
 0x22f   :  { %3042 = vmatpush1.bf16.msra.mxu1 %v9022_v45  ;;  %v9027_v45 = vld [vmem:[%s9913_s25 + $0xc] ss:$16 sps:$4 sm:$0xff]  }
 0x230   :  { %3043 = vmatprep.subr.bf16.mxu1 %v9030_v48  ;;  %v9031_v48 = vld [vmem:[%s9913_s25 + $0x1e8] ss:$16 sps:$4 sm:$0xff]  }
 0x233   :  { %3044 = vmatpush2.bf16.msra.mxu1 %v9028_v47  ;;  %v9033_v47 = vld [vmem:[%s9913_s25 + $0x1ec] ss:$16 sps:$4 sm:$0xff]  }
 0x234   :  { %3045 = vmatprep.subr.bf16.mxu1 %v9036_v50  ;;  %v9037_v50 = vld [vmem:[%s9913_s25 + $0x1c8] ss:$16 sps:$4 sm:$0xff]  }
 0x237   :  { %3046 = vmatpush2.bf16.msra.mxu1 %v9034_v49  ;;  %v9039_v49 = vld [vmem:[%s9913_s25 + $0x1cc] ss:$16 sps:$4 sm:$0xff]  }
 0x238   :  { %3047 = vmatprep.subr.bf16.mxu1 %v9042_v52  ;;  %v9043_v52 = vld [vmem:[%s9913_s25 + $0x1a8] ss:$16 sps:$4 sm:$0xff]  }
 0x23b   :  { %3048 = vmatpush2.bf16.msra.mxu1 %v9040_v51  ;;  %v9045_v51 = vld [vmem:[%s9913_s25 + $0x1ac] ss:$16 sps:$4 sm:$0xff]  }
 0x23c   :  { %3049 = vmatprep.subr.bf16.mxu1 %v9048_v55  ;;  %v9049_v55 = vld [vmem:[%s9913_s25 + $0x188] ss:$16 sps:$4 sm:$0xff]  }
 0x23f   :  { %3050 = vmatpush2.bf16.msra.mxu1 %v9046_v53  ;;  %v9051_v53 = vld [vmem:[%s9913_s25 + $0x18c] ss:$16 sps:$4 sm:$0xff]  }
 0x240   :  { %3051 = vmatprep.subr.bf16.mxu1 %v9054_v57  ;;  %v9055_v57 = vld [vmem:[%s9913_s25 + $0x168] ss:$16 sps:$4 sm:$0xff]  }
 0x243   :  { %3052 = vmatpush2.bf16.msra.mxu1 %v9052_v56  ;;  %v9057_v56 = vld [vmem:[%s9913_s25 + $0x16c] ss:$16 sps:$4 sm:$0xff]  }
 0x244   :  { %3053 = vmatprep.subr.bf16.mxu1 %v9060_v59  ;;  %v1365_v59 = vrot.slane %v10494_v8, %v10377_v2 }
 0x247   :  { %3054 = vmatpush2.bf16.msra.mxu1 %v9058_v58  ;;  %v9063_v58 = vld [vmem:[%s9913_s25 + $0x14c] ss:$16 sps:$4 sm:$0xff]  }
 0x248   :  { %3055 = vmatprep.subr.bf16.mxu1 %v9066_v62  ;;  %v239_v62 = vunpack.c.h.bf16 %v10501_v11 }
 0x24b   :  { %3056 = vmatpush2.bf16.msra.mxu1 %v9064_v0  ;;  %v9069_v0 = vld [vmem:[%s9913_s25 + $0x12c] ss:$16 sps:$4 sm:$0xff]  }
 0x24c   :  { %3057 = vmatprep.subr.bf16.mxu1 %v9072_v3 }
 0x24f   :  { %3058 = vmatpush2.bf16.msra.mxu1 %v9070_v6 }
 0x250   :  { %3109 = vmatprep.subr.bf16.mxu1 %v9078_v7  ;;  %v2181_v7 = vcombine.high %v239_v62, %v239_v62 }
 0x252   :  { %v2048_v61 = vpop.f32.mrf.mxu0 }
 0x253   :  { %v2049_v13 = vadd.f32 %v2048_v61, %v1357_v9  ;;  %v1369_v61 = vrot.slane %v10494_v8, %v10381_v4  ;;  %v9067_v9 = vld [vmem:[%s9913_s25 + $0x128] ss:$16 sps:$4 sm:$0xff]   ;;  %v9075_v8 = vld [vmem:[%s9913_s25 + $0x10c] ss:$16 sps:$4 sm:$0xff]  }
 0x254   :  { %v2050_v63 = vpop.f32.mrf.mxu0 }
 0x255   :  { %v2051_v15 = vadd.f32 %v2050_v63, %v1361_v10  ;;  %v9061_v63 = vld [vmem:[%s9913_s25 + $0x148] ss:$16 sps:$4 sm:$0xff]  }
 0x256   :  { %v2052_v1 = vpop.f32.mrf.mxu0 }
 0x258   :  { %v2053_v5 = vpop.f32.mrf.mxu0 }
 0x292   :  { %v10504_v42 = vpop.f32.mrf.mxu0  ;;  %v2089_v14 = vpop.f32.mrf.mxu1 }
 0x293   :  { %v2090_v16 = vadd.f32 %v2089_v14, %v2049_v13  ;;  %v2131_v1 = vadd.f32 %v10504_v42, %v1365_v59  ;;  %v9108_v59 = vld [vmem:[%s9913_s25 + $0x3ac] ss:$16 sps:$4 sm:$0xff]  }
 0x294   :  { %v10506_v21 = vpop.f32.mrf.mxu0  ;;  %v2091_v22 = vpop.f32.mrf.mxu1 }
 0x295   :  { %v2184_v19 = vadd.f32 %v2090_v16, %v238_v12  ;;  %v2092_v23 = vadd.f32 %v2091_v22, %v2051_v15  ;;  %v2133_v5 = vadd.f32 %v10506_v21, %v1369_v61  ;;  %v9073_v15 = vld [vmem:[%s9913_s25 + $0x108] ss:$16 sps:$4 sm:$0xff]   ;;  %v9150_v61 = vld [vmem:[%s9923_s3 + $0x1e4] ss:$16 sps:$4 sm:$0xff]  }
 0x296   :  { %v2134_v54 = vpop.f32.mrf.mxu0  ;;  %v2093_v60 = vpop.f32.mrf.mxu1  ;;  %v9076_v22 = vld [vmem:[%s9913_s25 + $0x2e8] ss:$16 sps:$4 sm:$0xff]  }
 0x297   :  { %v2185_v24 = vadd.f32 %v2180_v17, %v2092_v23  ;;  %v10508_v25 = vmax.f32 %v2184_v19, 0.0  ;;  %v9081_v23 = vld [vmem:[%s9913_s25 + $0x2cc] ss:$16 sps:$4 sm:$0xff]   ;;  %v9079_v54 = vld [vmem:[%s9913_s25 + $0x2c8] ss:$16 sps:$4 sm:$0xff]  }
 0x298   :  { %v2135_v26 = vpop.f32.mrf.mxu0  ;;  %v2094_v28 = vpop.f32.mrf.mxu1  ;;  %v9084_v60 = vld [vmem:[%s9913_s25 + $0x2ac] ss:$16 sps:$4 sm:$0xff]  }
 0x299   :  { %v10510_v29 = vmax.f32 %v2185_v24, 0.0  ;;  %v10517_v27 = vpack.c.bf16 %v10508_v25, %v10508_v25  ;;  %v9082_v24 = vld [vmem:[%s9913_s25 + $0x2a8] ss:$16 sps:$4 sm:$0xff]   ;;  %v9087_v26 = vld [vmem:[%s9913_s25 + $0x28c] ss:$16 sps:$4 sm:$0xff]  }
 0x29a   :  { %v9124_v28 = vld [vmem:[%s9923_s3 + $0xe0] ss:$16 sps:$4 sm:$0xff]  }
 0x29b   :  { %v2193_v30 = vpack.c.bf16 %v10510_v29, %v10510_v29 }
 0x29d   :  { %3018 = vmatprep.mubr.bf16.mxu0 %v2193_v30 }
 0x29e   :  { %3019 = vmatmul.mubr.bf16.vlgmr.msra.gmra.mxu0 %v10517_v27 }
 0x29f   :  { %3069 = vmatpush1.bf16.msra.mxu0 %v8983_v31  ;;  %3100 = vmatprep.mubr.bf16.mxu0 %v2193_v30  ;;  %v9126_v30 = vld [vmem:[%s9923_s3 + $0xe4] ss:$16 sps:$4 sm:$0xff]  }
 0x2a0   :  { %3070 = vmatprep.subr.bf16.mxu0 %v8991_v32  ;;  %v9129_v31 = vld [vmem:[%s9923_s3 + $0xc4] ss:$16 sps:$4 sm:$0xff]   ;;  %v9127_v32 = vld [vmem:[%s9923_s3 + $0xc0] ss:$16 sps:$4 sm:$0xff]  }
 0x2a3   :  { %3071 = vmatpush1.bf16.msra.mxu0 %v8989_v33  ;;  %v9090_v33 = vld [vmem:[%s9913_s25 + $0x26c] ss:$16 sps:$4 sm:$0xff]  }
 0x2a4   :  { %3072 = vmatprep.subr.bf16.mxu0 %v8997_v34  ;;  %v9132_v34 = vld [vmem:[%s9923_s3 + $0xa4] ss:$16 sps:$4 sm:$0xff]  }
 0x2a7   :  { %3073 = vmatpush1.bf16.msra.mxu0 %v8995_v35  ;;  %v9088_v35 = vld [vmem:[%s9913_s25 + $0x268] ss:$16 sps:$4 sm:$0xff]  }
 0x2a8   :  { %3074 = vmatprep.subr.bf16.mxu0 %v9003_v36  ;;  %v9130_v36 = vld [vmem:[%s9923_s3 + $0xa0] ss:$16 sps:$4 sm:$0xff]  }
 0x2ab   :  { %3075 = vmatpush1.bf16.msra.mxu0 %v9001_v37  ;;  %v9093_v37 = vld [vmem:[%s9913_s25 + $0x24c] ss:$16 sps:$4 sm:$0xff]  }
 0x2ac   :  { %3076 = vmatprep.subr.bf16.mxu0 %v9009_v38  ;;  %v9135_v38 = vld [vmem:[%s9923_s3 + $0x84] ss:$16 sps:$4 sm:$0xff]  }
 0x2af   :  { %3077 = vmatpush1.bf16.msra.mxu0 %v9007_v39  ;;  %v9091_v39 = vld [vmem:[%s9913_s25 + $0x248] ss:$16 sps:$4 sm:$0xff]  }
 0x2b0   :  { %3078 = vmatprep.subr.bf16.mxu0 %v9015_v40  ;;  %v9133_v40 = vld [vmem:[%s9923_s3 + $0x80] ss:$16 sps:$4 sm:$0xff]  }
 0x2b3   :  { %3079 = vmatpush1.bf16.msra.mxu0 %v9013_v41  ;;  %v9096_v41 = vld [vmem:[%s9913_s25 + $0x22c] ss:$16 sps:$4 sm:$0xff]  }
 0x2b4   :  { %3080 = vmatprep.subr.bf16.mxu0 %v9021_v43  ;;  %v9138_v43 = vld [vmem:[%s9923_s3 + $0x64] ss:$16 sps:$4 sm:$0xff]  }
 0x2b7   :  { %3081 = vmatpush1.bf16.msra.mxu0 %v9019_v44  ;;  %v9094_v44 = vld [vmem:[%s9913_s25 + $0x228] ss:$16 sps:$4 sm:$0xff]  }
 0x2b8   :  { %3082 = vmatprep.subr.bf16.mxu0 %v9027_v45  ;;  %v9136_v45 = vld [vmem:[%s9923_s3 + $0x60] ss:$16 sps:$4 sm:$0xff]  }
 0x2bb   :  { %3083 = vmatpush1.bf16.msra.mxu0 %v9025_v46  ;;  %v9099_v46 = vld [vmem:[%s9913_s25 + $0x20c] ss:$16 sps:$4 sm:$0xff]  }
 0x2bc   :  { %3084 = vmatprep.subr.bf16.mxu0 %v9033_v47  ;;  %v9141_v47 = vld [vmem:[%s9923_s3 + $0x44] ss:$16 sps:$4 sm:$0xff]  }
 0x2bf   :  { %3085 = vmatpush2.bf16.msra.mxu0 %v9031_v48  ;;  %v9097_v48 = vld [vmem:[%s9913_s25 + $0x208] ss:$16 sps:$4 sm:$0xff]  }
 0x2c0   :  { %3086 = vmatprep.subr.bf16.mxu0 %v9039_v49  ;;  %v9139_v49 = vld [vmem:[%s9923_s3 + $0x40] ss:$16 sps:$4 sm:$0xff]  }
 0x2c3   :  { %3087 = vmatpush2.bf16.msra.mxu0 %v9037_v50  ;;  %v9102_v50 = vld [vmem:[%s9913_s25 + $0x3ec] ss:$16 sps:$4 sm:$0xff]  }
 0x2c4   :  { %3088 = vmatprep.subr.bf16.mxu0 %v9045_v51  ;;  %v9144_v51 = vld [vmem:[%s9923_s3 + $0x24] ss:$16 sps:$4 sm:$0xff]  }
 0x2c7   :  { %3089 = vmatpush2.bf16.msra.mxu0 %v9043_v52  ;;  %v9100_v52 = vld [vmem:[%s9913_s25 + $0x3e8] ss:$16 sps:$4 sm:$0xff]  }
 0x2c8   :  { %3090 = vmatprep.subr.bf16.mxu0 %v9051_v53  ;;  %v9142_v53 = vld [vmem:[%s9923_s3 + $0x20] ss:$16 sps:$4 sm:$0xff]  }
 0x2cb   :  { %3091 = vmatpush2.bf16.msra.mxu0 %v9049_v55  ;;  %v9105_v55 = vld [vmem:[%s9913_s25 + $0x3cc] ss:$16 sps:$4 sm:$0xff]  }
 0x2cc   :  { %3092 = vmatprep.subr.bf16.mxu0 %v9057_v56  ;;  %v9147_v56 = vld [vmem:[%s9923_s3 + $0x4] ss:$16 sps:$4 sm:$0xff]  }
 0x2cf   :  { %3093 = vmatpush2.bf16.msra.mxu0 %v9055_v57  ;;  %v9103_v57 = vld [vmem:[%s9913_s25 + $0x3c8] ss:$16 sps:$4 sm:$0xff]  }
 0x2d0   :  { %3094 = vmatprep.subr.bf16.mxu0 %v9063_v58  ;;  %v9145_v58 = vld [vmem:[%s9923_s3] ss:$16 sps:$4 sm:$0xff]  }
 0x2d2   :  { %v2171_v3 = vpop.f32.mrf.mxu1 }
 0x2d3   :  { %v2172_v6 = vadd.f32 %v2171_v3, %v2131_v1  ;;  %3095 = vmatpush2.bf16.msra.mxu0 %v9061_v63  ;;  %v9148_v63 = vld [vmem:[%s9923_s3 + $0x1e0] ss:$16 sps:$4 sm:$0xff]   ;;  %v9153_v1 = vld [vmem:[%s9923_s3 + $0x1c4] ss:$16 sps:$4 sm:$0xff]   ;;  %v9109_v3 = vld [vmem:[%s9913_s25 + $0x388] ss:$16 sps:$4 sm:$0xff]  }
 0x2d4   :  { %v2173_v10 = vpop.f32.mrf.mxu1  ;;  %3096 = vmatprep.subr.bf16.mxu0 %v9069_v0  ;;  %v9111_v0 = vld [vmem:[%s9913_s25 + $0x38c] ss:$16 sps:$4 sm:$0xff]  }
 0x2d5   :  { %v2186_v12 = vadd.f32 %v2172_v6, %v239_v62  ;;  %v2174_v11 = vadd.f32 %v2173_v10, %v2133_v5  ;;  %v9106_v62 = vld [vmem:[%s9913_s25 + $0x3a8] ss:$16 sps:$4 sm:$0xff]   ;;  %v9151_v5 = vld [vmem:[%s9923_s3 + $0x1c0] ss:$16 sps:$4 sm:$0xff]   ;;  %v9114_v6 = vld [vmem:[%s9913_s25 + $0x36c] ss:$16 sps:$4 sm:$0xff]  }
 0x2d6   :  { %v2175_v13 = vpop.f32.mrf.mxu1  ;;  %v9154_v10 = vld [vmem:[%s9923_s3 + $0x1a0] ss:$16 sps:$4 sm:$0xff]  }
 0x2d7   :  { %v2187_v14 = vadd.f32 %v2181_v7, %v2174_v11  ;;  %3097 = vmatpush2.bf16.msra.mxu0 %v9067_v9  ;;  %v10557_v42 = vmax.f32 %v2186_v12, 0.0  ;;  %v9156_v7 = vld [vmem:[%s9923_s3 + $0x1a4] ss:$16 sps:$4 sm:$0xff]   ;;  %v9112_v9 = vld [vmem:[%s9913_s25 + $0x368] ss:$16 sps:$4 sm:$0xff]  }
 0x2d8   :  { %v2176_v16 = vpop.f32.mrf.mxu1  ;;  %3098 = vmatprep.subr.bf16.mxu0 %v9075_v8  ;;  %v9117_v8 = vld [vmem:[%s9913_s25 + $0x34c] ss:$16 sps:$4 sm:$0xff]   ;;  %v9159_v12 = vld [vmem:[%s9923_s3 + $0x184] ss:$16 sps:$4 sm:$0xff]   ;;  %v9115_v11 = vld [vmem:[%s9913_s25 + $0x348] ss:$16 sps:$4 sm:$0xff]  }
 0x2d9   :  { %v10559_v17 = vmax.f32 %v2187_v14, 0.0  ;;  %v10566_v19 = vpack.c.bf16 %v10557_v42, %v10557_v42  ;;  %v9157_v13 = vld [vmem:[%s9923_s3 + $0x180] ss:$16 sps:$4 sm:$0xff]   ;;  %v9120_v14 = vld [vmem:[%s9913_s25 + $0x32c] ss:$16 sps:$4 sm:$0xff]  }
 0x2da   :  { %v9118_v16 = vld [vmem:[%s9913_s25 + $0x328] ss:$16 sps:$4 sm:$0xff]  }
 0x2db   :  { %3099 = vmatpush2.bf16.msra.mxu0 %v9073_v15  ;;  %v2195_v21 = vpack.c.bf16 %v10559_v17, %v10559_v17  ;;  %v9162_v15 = vld [vmem:[%s9923_s3 + $0x164] ss:$16 sps:$4 sm:$0xff]  }
 0x2dc   :  { %3948 = vmatprep.subr.bf16.mxu0 %v9126_v30  ;;  %v9169_v30 = vld [vmem:[%s9923_s3 + $0x100] ss:$16 sps:$4 sm:$0xff]  }
 0x2dd   :  { %3059 = vmatprep.mubr.bf16.mxu1 %v2195_v21 }
 0x2de   :  { %3060 = vmatmul.mubr.bf16.vlgmr.msra.gmra.mxu1 %v10566_v19  ;;  %3101 = vmatmul.mubr.bf16.vlgmr.msra.gmra.mxu0 %v10517_v27  ;;  %v9085_v27 = vld [vmem:[%s9913_s25 + $0x288] ss:$16 sps:$4 sm:$0xff]  }
 0x2df   :  { %3110 = vmatpush1.bf16.msra.mxu1 %v9076_v22  ;;  %3141 = vmatprep.mubr.bf16.mxu1 %v2195_v21  ;;  %v9160_v21 = vld [vmem:[%s9923_s3 + $0x160] ss:$16 sps:$4 sm:$0xff]   ;;  %v9123_v22 = vld [vmem:[%s9913_s25 + $0x30c] ss:$16 sps:$4 sm:$0xff]  }
 0x2e0   :  { %3111 = vmatprep.subr.bf16.mxu1 %v9081_v23  ;;  %3949 = vmatpush1.bf16.msra.mxu0 %v9124_v28  ;;  %v9165_v23 = vld [vmem:[%s9923_s3 + $0x144] ss:$16 sps:$4 sm:$0xff]  }
 0x2e1   :  { %3950 = vmatprep.subr.bf16.mxu0 %v9129_v31  ;;  %v9171_v28 = vld [vmem:[%s9923_s3 + $0x104] ss:$16 sps:$4 sm:$0xff]   ;;  %v9172_v31 = vld [vmem:[%s9923_s3 + $0x2e0] ss:$16 sps:$4 sm:$0xff]  }
 0x2e3   :  { %3112 = vmatpush1.bf16.msra.mxu1 %v9079_v54  ;;  %v9121_v54 = vld [vmem:[%s9913_s25 + $0x308] ss:$16 sps:$4 sm:$0xff]   ;;  %s11320_s25 = sld [smem:[#allocation14_spill]] }
 0x2e4   :  { %3113 = vmatprep.subr.bf16.mxu1 %v9084_v60  ;;  %3951 = vmatpush1.bf16.msra.mxu0 %v9127_v32  ;;  %v9163_v60 = vld [vmem:[%s9923_s3 + $0x140] ss:$16 sps:$4 sm:$0xff]   ;;  %v9177_v32 = vld [vmem:[%s9923_s3 + $0xec] ss:$16 sps:$4 sm:$0xff]  }
 0x2e5   :  { %3952 = vmatprep.subr.bf16.mxu0 %v9132_v34  ;;  %v9184_v34 = vld [vmem:[%s9923_s3 + $0x2a0] ss:$16 sps:$4 sm:$0xff]  }
 0x2e7   :  { %3114 = vmatpush1.bf16.msra.mxu1 %v9082_v24  ;;  %v9168_v24 = vld [vmem:[%s9923_s3 + $0x124] ss:$16 sps:$4 sm:$0xff]  }
 0x2e8   :  { %3115 = vmatprep.subr.bf16.mxu1 %v9087_v26  ;;  %3953 = vmatpush1.bf16.msra.mxu0 %v9130_v36  ;;  %v9166_v26 = vld [vmem:[%s9923_s3 + $0x120] ss:$16 sps:$4 sm:$0xff]  }
 0x2e9   :  { %3954 = vmatprep.subr.bf16.mxu0 %v9135_v38  ;;  %v9190_v36 = vld [vmem:[%s9923_s3 + $0x280] ss:$16 sps:$4 sm:$0xff]  }
 0x2ea   :  { %v9196_v38 = vld [vmem:[%s9923_s3 + $0x260] ss:$16 sps:$4 sm:$0xff]  }
 0x2eb   :  { %3116 = vmatpush1.bf16.msra.mxu1 %v9085_v27  ;;  %v9174_v27 = vld [vmem:[%s9923_s3 + $0x2e4] ss:$16 sps:$4 sm:$0xff]  }
 0x2ec   :  { %3117 = vmatprep.subr.bf16.mxu1 %v9090_v33  ;;  %3955 = vmatpush1.bf16.msra.mxu0 %v9133_v40  ;;  %v9180_v33 = vld [vmem:[%s9923_s3 + $0x2c4] ss:$16 sps:$4 sm:$0xff]   ;;  %v9202_v40 = vld [vmem:[%s9923_s3 + $0x240] ss:$16 sps:$4 sm:$0xff]  }
 0x2ed   :  { %3956 = vmatprep.subr.bf16.mxu0 %v9138_v43  ;;  %v9208_v43 = vld [vmem:[%s9923_s3 + $0x220] ss:$16 sps:$4 sm:$0xff]  }
 0x2ef   :  { %3118 = vmatpush1.bf16.msra.mxu1 %v9088_v35  ;;  %v9186_v35 = vld [vmem:[%s9923_s3 + $0x2a4] ss:$16 sps:$4 sm:$0xff]  }
 0x2f0   :  { %3119 = vmatprep.subr.bf16.mxu1 %v9093_v37  ;;  %3957 = vmatpush1.bf16.msra.mxu0 %v9136_v45  ;;  %v9192_v37 = vld [vmem:[%s9923_s3 + $0x284] ss:$16 sps:$4 sm:$0xff]   ;;  %v9214_v45 = vld [vmem:[%s9923_s3 + $0x200] ss:$16 sps:$4 sm:$0xff]  }
 0x2f1   :  { %3958 = vmatprep.subr.bf16.mxu0 %v9141_v47  ;;  %v9220_v47 = vld [vmem:[%s9923_s3 + $0x3e0] ss:$16 sps:$4 sm:$0xff]  }
 0x2f3   :  { %3120 = vmatpush1.bf16.msra.mxu1 %v9091_v39  ;;  %v9198_v39 = vld [vmem:[%s9923_s3 + $0x264] ss:$16 sps:$4 sm:$0xff]  }
 0x2f4   :  { %3121 = vmatprep.subr.bf16.mxu1 %v9096_v41  ;;  %3959 = vmatpush1.bf16.msra.mxu0 %v9139_v49  ;;  %v9204_v41 = vld [vmem:[%s9923_s3 + $0x244] ss:$16 sps:$4 sm:$0xff]   ;;  %v9226_v49 = vld [vmem:[%s9923_s3 + $0x3c0] ss:$16 sps:$4 sm:$0xff]  }
 0x2f5   :  { %3960 = vmatprep.subr.bf16.mxu0 %v9144_v51  ;;  %v9232_v51 = vld [vmem:[%s9923_s3 + $0x3a0] ss:$16 sps:$4 sm:$0xff]  }
 0x2f7   :  { %3122 = vmatpush1.bf16.msra.mxu1 %v9094_v44  ;;  %v9210_v44 = vld [vmem:[%s9923_s3 + $0x224] ss:$16 sps:$4 sm:$0xff]  }
 0x2f8   :  { %3123 = vmatprep.subr.bf16.mxu1 %v9099_v46  ;;  %3961 = vmatpush1.bf16.msra.mxu0 %v9142_v53  ;;  %v9216_v46 = vld [vmem:[%s9923_s3 + $0x204] ss:$16 sps:$4 sm:$0xff]   ;;  %v9238_v53 = vld [vmem:[%s9923_s3 + $0x380] ss:$16 sps:$4 sm:$0xff]  }
 0x2f9   :  { %3962 = vmatprep.subr.bf16.mxu0 %v9147_v56  ;;  %v9244_v56 = vld [vmem:[%s9923_s3 + $0x360] ss:$16 sps:$4 sm:$0xff]  }
 0x2fb   :  { %3124 = vmatpush1.bf16.msra.mxu1 %v9097_v48  ;;  %v9222_v48 = vld [vmem:[%s9923_s3 + $0x3e4] ss:$16 sps:$4 sm:$0xff]  }
 0x2fc   :  { %3125 = vmatprep.subr.bf16.mxu1 %v9102_v50  ;;  %3963 = vmatpush1.bf16.msra.mxu0 %v9145_v58  ;;  %v9228_v50 = vld [vmem:[%s9923_s3 + $0x3c4] ss:$16 sps:$4 sm:$0xff]   ;;  %v9250_v58 = vld [vmem:[%s9923_s3 + $0x340] ss:$16 sps:$4 sm:$0xff]  }
 0x2fd   :  { %3964 = vmatprep.subr.bf16.mxu0 %v9150_v61  ;;  %v9258_v61 = vld [vmem:[%s9923_s3 + $0x324] ss:$16 sps:$4 sm:$0xff]  }
 0x2ff   :  { %3126 = vmatpush2.bf16.msra.mxu1 %v9100_v52  ;;  %v9234_v52 = vld [vmem:[%s9923_s3 + $0x3a4] ss:$16 sps:$4 sm:$0xff]  }
 0x300   :  { %3127 = vmatprep.subr.bf16.mxu1 %v9105_v55  ;;  %3965 = vmatpush2.bf16.msra.mxu0 %v9148_v63  ;;  %v9240_v55 = vld [vmem:[%s9923_s3 + $0x384] ss:$16 sps:$4 sm:$0xff]   ;;  %v9256_v63 = vld [vmem:[%s9923_s3 + $0x320] ss:$16 sps:$4 sm:$0xff]  }
 0x301   :  { %3966 = vmatprep.subr.bf16.mxu0 %v9153_v1  ;;  %v9264_v1 = vld [vmem:[%s9923_s3 + $0x304] ss:$16 sps:$4 sm:$0xff]  }
 0x303   :  { %3128 = vmatpush2.bf16.msra.mxu1 %v9103_v57  ;;  %v9246_v57 = vld [vmem:[%s9923_s3 + $0x364] ss:$16 sps:$4 sm:$0xff]  }
 0x304   :  { %3129 = vmatprep.subr.bf16.mxu1 %v9108_v59  ;;  %3967 = vmatpush2.bf16.msra.mxu0 %v9151_v5  ;;  %v9252_v59 = vld [vmem:[%s9923_s3 + $0x344] ss:$16 sps:$4 sm:$0xff]   ;;  %v9262_v5 = vld [vmem:[%s9923_s3 + $0x300] ss:$16 sps:$4 sm:$0xff]  }
 0x305   :  { %3968 = vmatprep.subr.bf16.mxu0 %v9156_v7  ;;  %v9270_v7 = vld [vmem:[%s9923_s3 + $0x2ec] ss:$16 sps:$4 sm:$0xff]  }
 0x307   :  { %3130 = vmatpush2.bf16.msra.mxu1 %v9106_v62 }
 0x308   :  { %3131 = vmatprep.subr.bf16.mxu1 %v9111_v0  ;;  %3969 = vmatpush2.bf16.msra.mxu0 %v9154_v10 }
 0x309   :  { %3970 = vmatprep.subr.bf16.mxu0 %v9159_v12 }
 0x30b   :  { %3132 = vmatpush2.bf16.msra.mxu1 %v9109_v3 }
 0x30c   :  { %3133 = vmatprep.subr.bf16.mxu1 %v9114_v6  ;;  %3971 = vmatpush2.bf16.msra.mxu0 %v9157_v13 }
 0x30d   :  { %3972 = vmatprep.subr.bf16.mxu0 %v9162_v15 }
 0x30f   :  { %3134 = vmatpush2.bf16.msra.mxu1 %v9112_v9  ;;  %v10668_v9 = vld [vmem:[%s9918_s29] sm:$0xf]  ;;  %s11321_s29 = sld [smem:[#allocation24_spill]] }
 0x310   :  { %3135 = vmatprep.subr.bf16.mxu1 %v9117_v8  ;;  %3973 = vmatpush2.bf16.msra.mxu0 %v9160_v21  ;;  %v2329_v10 = vrot.slane %v10668_v9, %v10335_v18  ;;  %v2333_v8 = vrot.slane %v10668_v9, %v10341_v20 }
 0x311   :  { %3974 = vmatprep.subr.bf16.mxu0 %v9165_v23 }
 0x313   :  { %3136 = vmatpush2.bf16.msra.mxu1 %v9115_v11 }
 0x314   :  { %3137 = vmatprep.subr.bf16.mxu1 %v9120_v14  ;;  %3975 = vmatpush2.bf16.msra.mxu0 %v9163_v60 }
 0x315   :  { %3976 = vmatprep.subr.bf16.mxu0 %v9168_v24 }
 0x317   :  { %3138 = vmatpush2.bf16.msra.mxu1 %v9118_v16 }
 0x318   :  { %3139 = vmatprep.subr.bf16.mxu1 %v9123_v22  ;;  %3977 = vmatpush2.bf16.msra.mxu0 %v9166_v26 }
 0x319   :  { %3978 = vmatprep.subr.bf16.mxu0 %v9171_v28 }
 0x31b   :  { %3140 = vmatpush2.bf16.msra.mxu1 %v9121_v54 }
 0x31c   :  { %3979 = vmatpush2.bf16.msra.mxu0 %v9169_v30  ;;  %3989 = vmatprep.subr.bf16.mxu1 %v9174_v27 }
 0x31d   :  { %4030 = vmatprep.subr.bf16.mxu0 %v9177_v32  ;;  %v9183_v32 = vld [vmem:[%s9923_s3 + $0xcc] ss:$16 sps:$4 sm:$0xff]  }
 0x31e   :  { %3142 = vmatmul.mubr.bf16.vlgmr.msra.gmra.mxu1 %v10566_v19  ;;  %v9178_v19 = vld [vmem:[%s9923_s3 + $0x2c0] ss:$16 sps:$4 sm:$0xff]  }
 0x31f   :  { %3990 = vmatpush1.bf16.msra.mxu1 %v9172_v31  ;;  %v9175_v31 = vld [vmem:[%s9923_s3 + $0xe8] ss:$16 sps:$4 sm:$0xff]  }
 0x320   :  { %3991 = vmatprep.subr.bf16.mxu1 %v9180_v33  ;;  %v9189_v33 = vld [vmem:[%s9923_s3 + $0xac] ss:$16 sps:$4 sm:$0xff]  }
 0x323   :  { %3992 = vmatpush1.bf16.msra.mxu1 %v9178_v19  ;;  %v9181_v19 = vld [vmem:[%s9923_s3 + $0xc8] ss:$16 sps:$4 sm:$0xff]  }
 0x324   :  { %3993 = vmatprep.subr.bf16.mxu1 %v9186_v35  ;;  %v9195_v35 = vld [vmem:[%s9923_s3 + $0x8c] ss:$16 sps:$4 sm:$0xff]  }
 0x327   :  { %3994 = vmatpush1.bf16.msra.mxu1 %v9184_v34  ;;  %v9187_v34 = vld [vmem:[%s9923_s3 + $0xa8] ss:$16 sps:$4 sm:$0xff]  }
 0x328   :  { %3995 = vmatprep.subr.bf16.mxu1 %v9192_v37  ;;  %v9201_v37 = vld [vmem:[%s9923_s3 + $0x6c] ss:$16 sps:$4 sm:$0xff]  }
 0x32b   :  { %3996 = vmatpush1.bf16.msra.mxu1 %v9190_v36  ;;  %v9193_v36 = vld [vmem:[%s9923_s3 + $0x88] ss:$16 sps:$4 sm:$0xff]  }
 0x32c   :  { %3997 = vmatprep.subr.bf16.mxu1 %v9198_v39  ;;  %v9207_v39 = vld [vmem:[%s9923_s3 + $0x4c] ss:$16 sps:$4 sm:$0xff]  }
 0x32f   :  { %3998 = vmatpush1.bf16.msra.mxu1 %v9196_v38  ;;  %v9199_v38 = vld [vmem:[%s9923_s3 + $0x68] ss:$16 sps:$4 sm:$0xff]  }
 0x330   :  { %3999 = vmatprep.subr.bf16.mxu1 %v9204_v41  ;;  %v9213_v41 = vld [vmem:[%s9923_s3 + $0x2c] ss:$16 sps:$4 sm:$0xff]  }
 0x333   :  { %4000 = vmatpush1.bf16.msra.mxu1 %v9202_v40  ;;  %v9205_v40 = vld [vmem:[%s9923_s3 + $0x48] ss:$16 sps:$4 sm:$0xff]  }
 0x334   :  { %4001 = vmatprep.subr.bf16.mxu1 %v9210_v44  ;;  %v9219_v44 = vld [vmem:[%s9923_s3 + $0xc] ss:$16 sps:$4 sm:$0xff]  }
 0x337   :  { %4002 = vmatpush1.bf16.msra.mxu1 %v9208_v43  ;;  %v9211_v43 = vld [vmem:[%s9923_s3 + $0x28] ss:$16 sps:$4 sm:$0xff]  }
 0x338   :  { %4003 = vmatprep.subr.bf16.mxu1 %v9216_v46  ;;  %v9225_v46 = vld [vmem:[%s9923_s3 + $0x1ec] ss:$16 sps:$4 sm:$0xff]  }
 0x33b   :  { %4004 = vmatpush1.bf16.msra.mxu1 %v9214_v45  ;;  %v9217_v45 = vld [vmem:[%s9923_s3 + $0x8] ss:$16 sps:$4 sm:$0xff]  }
 0x33c   :  { %4005 = vmatprep.subr.bf16.mxu1 %v9222_v48  ;;  %v9231_v48 = vld [vmem:[%s9923_s3 + $0x1cc] ss:$16 sps:$4 sm:$0xff]  }
 0x33f   :  { %4006 = vmatpush2.bf16.msra.mxu1 %v9220_v47  ;;  %v9223_v47 = vld [vmem:[%s9923_s3 + $0x1e8] ss:$16 sps:$4 sm:$0xff]  }
 0x340   :  { %4007 = vmatprep.subr.bf16.mxu1 %v9228_v50  ;;  %v9237_v50 = vld [vmem:[%s9923_s3 + $0x1ac] ss:$16 sps:$4 sm:$0xff]  }
 0x343   :  { %4008 = vmatpush2.bf16.msra.mxu1 %v9226_v49  ;;  %v9229_v49 = vld [vmem:[%s9923_s3 + $0x1c8] ss:$16 sps:$4 sm:$0xff]  }
 0x344   :  { %4009 = vmatprep.subr.bf16.mxu1 %v9234_v52  ;;  %v9243_v52 = vld [vmem:[%s9923_s3 + $0x18c] ss:$16 sps:$4 sm:$0xff]  }
 0x347   :  { %4010 = vmatpush2.bf16.msra.mxu1 %v9232_v51  ;;  %v9235_v51 = vld [vmem:[%s9923_s3 + $0x1a8] ss:$16 sps:$4 sm:$0xff]  }
 0x348   :  { %4011 = vmatprep.subr.bf16.mxu1 %v9240_v55  ;;  %v9249_v55 = vld [vmem:[%s9923_s3 + $0x16c] ss:$16 sps:$4 sm:$0xff]  }
 0x34b   :  { %4012 = vmatpush2.bf16.msra.mxu1 %v9238_v53  ;;  %v9241_v53 = vld [vmem:[%s9923_s3 + $0x188] ss:$16 sps:$4 sm:$0xff]  }
 0x34c   :  { %4013 = vmatprep.subr.bf16.mxu1 %v9246_v57  ;;  %v9255_v57 = vld [vmem:[%s9923_s3 + $0x14c] ss:$16 sps:$4 sm:$0xff]  }
 0x34f   :  { %4014 = vmatpush2.bf16.msra.mxu1 %v9244_v56  ;;  %v9247_v56 = vld [vmem:[%s9923_s3 + $0x168] ss:$16 sps:$4 sm:$0xff]  }
 0x350   :  { %4015 = vmatprep.subr.bf16.mxu1 %v9252_v59  ;;  %v9253_v59 = vld [vmem:[%s9923_s3 + $0x148] ss:$16 sps:$4 sm:$0xff]  }
 0x353   :  { %4016 = vmatpush2.bf16.msra.mxu1 %v9250_v58  ;;  %v2337_v58 = vrot.slane %v10668_v9, %v10377_v2 }
 0x354   :  { %4017 = vmatprep.subr.bf16.mxu1 %v9258_v61  ;;  %v9261_v61 = vld [vmem:[%s9923_s3 + $0x12c] ss:$16 sps:$4 sm:$0xff]  }
 0x357   :  { %4018 = vmatpush2.bf16.msra.mxu1 %v9256_v63 }
 0x358   :  { %4019 = vmatprep.subr.bf16.mxu1 %v9264_v1 }
 0x35b   :  { %4020 = vmatpush2.bf16.msra.mxu1 %v9262_v5 }
 0x35c   :  { %4071 = vmatprep.subr.bf16.mxu1 %v9270_v7 }
 0x35e   :  { %v3020_v62 = vpop.f32.mrf.mxu0 }
 0x35f   :  { %v3021_v12 = vadd.f32 %v3020_v62, %v2329_v10  ;;  %v2341_v62 = vrot.slane %v10668_v9, %v10381_v4 }
 0x360   :  { %v3022_v0 = vpop.f32.mrf.mxu0 }
 0x361   :  { %v3023_v14 = vadd.f32 %v3022_v0, %v2333_v8  ;;  %v9259_v0 = vld [vmem:[%s9923_s3 + $0x128] ss:$16 sps:$4 sm:$0xff]  }
 0x362   :  { %v3024_v3 = vpop.f32.mrf.mxu0  ;;  %v9265_v8 = vld [vmem:[%s9923_s3 + $0x108] ss:$16 sps:$4 sm:$0xff]  }
 0x363   :  { %v9267_v3 = vld [vmem:[%s9923_s3 + $0x10c] ss:$16 sps:$4 sm:$0xff]  }
 0x364   :  { %v3025_v6 = vpop.f32.mrf.mxu0 }
 0x39e   :  { %v3061_v11 = vpop.f32.mrf.mxu1  ;;  %v10674_v13 = vpop.f32.mrf.mxu0 }
 0x39f   :  { %v3062_v15 = vadd.f32 %v3061_v11, %v3021_v12  ;;  %v3103_v63 = vadd.f32 %v10674_v13, %v2337_v58  ;;  %v9298_v58 = vld [vmem:[%s9923_s3 + $0x3a8] ss:$16 sps:$4 sm:$0xff]  }
 0x3a0   :  { %v3063_v16 = vpop.f32.mrf.mxu1  ;;  %v10676_v21 = vpop.f32.mrf.mxu0 }
 0x3a1   :  { %v3064_v22 = vadd.f32 %v3063_v16, %v3023_v14  ;;  %v3150_v23 = vmax.f32 %v3062_v15, 0.0  ;;  %v3105_v5 = vadd.f32 %v10676_v21, %v2341_v62  ;;  %v9268_v15 = vld [vmem:[%s9923_s3 + $0x2e8] ss:$16 sps:$4 sm:$0xff]   ;;  %v9273_v21 = vld [vmem:[%s9923_s3 + $0x2cc] ss:$16 sps:$4 sm:$0xff]  }
 0x3a2   :  { %v3065_v54 = vpop.f32.mrf.mxu1  ;;  %v3106_v60 = vpop.f32.mrf.mxu0  ;;  %v9345_v62 = vld [vmem:[%s9953_s6 + $0xe4] ss:$8 sps:$4 sm:$0xff]  }
 0x3a3   :  { %v3151_v24 = vmax.f32 %v3064_v22, 0.0  ;;  %v10679_v27 = vpack.c.bf16 %v3150_v23, %v3150_v23  ;;  %v9271_v22 = vld [vmem:[%s9923_s3 + $0x2c8] ss:$16 sps:$4 sm:$0xff]   ;;  %v9276_v23 = vld [vmem:[%s9923_s3 + $0x2ac] ss:$16 sps:$4 sm:$0xff]  }
 0x3a4   :  { %v3066_v26 = vpop.f32.mrf.mxu1  ;;  %v3107_v28 = vpop.f32.mrf.mxu0  ;;  %v9274_v54 = vld [vmem:[%s9923_s3 + $0x2a8] ss:$16 sps:$4 sm:$0xff]   ;;  %v9279_v60 = vld [vmem:[%s9923_s3 + $0x28c] ss:$16 sps:$4 sm:$0xff]  }
 0x3a5   :  { %v3155_v30 = vpack.c.bf16 %v3151_v24, %v3151_v24  ;;  %v9316_v24 = vld [vmem:[%s9953_s6 + $0x70] ss:$8 sps:$4 sm:$0xff]   ;;  %v9318_v26 = vld [vmem:[%s9953_s6 + $0x74] ss:$8 sps:$4 sm:$0xff]   ;;  %v9321_v28 = vld [vmem:[%s9953_s6 + $0x64] ss:$8 sps:$4 sm:$0xff]  }
 0x3a7   :  { %3980 = vmatprep.mubr.bf16.mxu0 %v3155_v30 }
 0x3a8   :  { %3981 = vmatmul.mubr.bf16.vlgmr.msra.gmra.mxu0 %v10679_v27 }
 0x3a9   :  { %4031 = vmatpush1.bf16.msra.mxu0 %v9175_v31  ;;  %4062 = vmatprep.mubr.bf16.mxu0 %v3155_v30  ;;  %v9277_v30 = vld [vmem:[%s9923_s3 + $0x288] ss:$16 sps:$4 sm:$0xff]  }
 0x3aa   :  { %4032 = vmatprep.subr.bf16.mxu0 %v9183_v32  ;;  %v9319_v31 = vld [vmem:[%s9953_s6 + $0x60] ss:$8 sps:$4 sm:$0xff]   ;;  %v9324_v32 = vld [vmem:[%s9953_s6 + $0x54] ss:$8 sps:$4 sm:$0xff]  }
 0x3ad   :  { %4033 = vmatpush1.bf16.msra.mxu0 %v9181_v19  ;;  %v9280_v19 = vld [vmem:[%s9923_s3 + $0x268] ss:$16 sps:$4 sm:$0xff]  }
 0x3ae   :  { %4034 = vmatprep.subr.bf16.mxu0 %v9189_v33  ;;  %v9322_v33 = vld [vmem:[%s9953_s6 + $0x50] ss:$8 sps:$4 sm:$0xff]  }
 0x3b1   :  { %4035 = vmatpush1.bf16.msra.mxu0 %v9187_v34  ;;  %v9285_v34 = vld [vmem:[%s9923_s3 + $0x24c] ss:$16 sps:$4 sm:$0xff]  }
 0x3b2   :  { %4036 = vmatprep.subr.bf16.mxu0 %v9195_v35  ;;  %v9327_v35 = vld [vmem:[%s9953_s6 + $0x44] ss:$8 sps:$4 sm:$0xff]  }
 0x3b5   :  { %4037 = vmatpush1.bf16.msra.mxu0 %v9193_v36  ;;  %v9283_v36 = vld [vmem:[%s9923_s3 + $0x248] ss:$16 sps:$4 sm:$0xff]  }
 0x3b6   :  { %4038 = vmatprep.subr.bf16.mxu0 %v9201_v37  ;;  %v9325_v37 = vld [vmem:[%s9953_s6 + $0x40] ss:$8 sps:$4 sm:$0xff]  }
 0x3b9   :  { %4039 = vmatpush1.bf16.msra.mxu0 %v9199_v38  ;;  %v9288_v38 = vld [vmem:[%s9923_s3 + $0x22c] ss:$16 sps:$4 sm:$0xff]  }
 0x3ba   :  { %4040 = vmatprep.subr.bf16.mxu0 %v9207_v39  ;;  %v9330_v39 = vld [vmem:[%s9953_s6 + $0x34] ss:$8 sps:$4 sm:$0xff]  }
 0x3bd   :  { %4041 = vmatpush1.bf16.msra.mxu0 %v9205_v40  ;;  %v9286_v40 = vld [vmem:[%s9923_s3 + $0x228] ss:$16 sps:$4 sm:$0xff]  }
 0x3be   :  { %4042 = vmatprep.subr.bf16.mxu0 %v9213_v41  ;;  %v9328_v41 = vld [vmem:[%s9953_s6 + $0x30] ss:$8 sps:$4 sm:$0xff]  }
 0x3c1   :  { %4043 = vmatpush1.bf16.msra.mxu0 %v9211_v43  ;;  %v9291_v43 = vld [vmem:[%s9923_s3 + $0x20c] ss:$16 sps:$4 sm:$0xff]  }
 0x3c2   :  { %4044 = vmatprep.subr.bf16.mxu0 %v9219_v44  ;;  %v9333_v44 = vld [vmem:[%s9953_s6 + $0x24] ss:$8 sps:$4 sm:$0xff]  }
 0x3c5   :  { %4045 = vmatpush1.bf16.msra.mxu0 %v9217_v45  ;;  %v9289_v45 = vld [vmem:[%s9923_s3 + $0x208] ss:$16 sps:$4 sm:$0xff]  }
 0x3c6   :  { %4046 = vmatprep.subr.bf16.mxu0 %v9225_v46  ;;  %v9331_v46 = vld [vmem:[%s9953_s6 + $0x20] ss:$8 sps:$4 sm:$0xff]  }
 0x3c9   :  { %4047 = vmatpush2.bf16.msra.mxu0 %v9223_v47  ;;  %v9294_v47 = vld [vmem:[%s9923_s3 + $0x3ec] ss:$16 sps:$4 sm:$0xff]  }
 0x3ca   :  { %4048 = vmatprep.subr.bf16.mxu0 %v9231_v48  ;;  %v9336_v48 = vld [vmem:[%s9953_s6 + $0x14] ss:$8 sps:$4 sm:$0xff]  }
 0x3cd   :  { %4049 = vmatpush2.bf16.msra.mxu0 %v9229_v49  ;;  %v9292_v49 = vld [vmem:[%s9923_s3 + $0x3e8] ss:$16 sps:$4 sm:$0xff]  }
 0x3ce   :  { %4050 = vmatprep.subr.bf16.mxu0 %v9237_v50  ;;  %v9334_v50 = vld [vmem:[%s9953_s6 + $0x10] ss:$8 sps:$4 sm:$0xff]  }
 0x3d1   :  { %4051 = vmatpush2.bf16.msra.mxu0 %v9235_v51  ;;  %v9297_v51 = vld [vmem:[%s9923_s3 + $0x3cc] ss:$16 sps:$4 sm:$0xff]  }
 0x3d2   :  { %4052 = vmatprep.subr.bf16.mxu0 %v9243_v52  ;;  %v9339_v52 = vld [vmem:[%s9953_s6 + $0x4] ss:$8 sps:$4 sm:$0xff]  }
 0x3d5   :  { %4053 = vmatpush2.bf16.msra.mxu0 %v9241_v53  ;;  %v9295_v53 = vld [vmem:[%s9923_s3 + $0x3c8] ss:$16 sps:$4 sm:$0xff]  }
 0x3d6   :  { %4054 = vmatprep.subr.bf16.mxu0 %v9249_v55  ;;  %v9337_v55 = vld [vmem:[%s9953_s6] ss:$8 sps:$4 sm:$0xff]  }
 0x3d9   :  { %4055 = vmatpush2.bf16.msra.mxu0 %v9247_v56  ;;  %v9300_v56 = vld [vmem:[%s9923_s3 + $0x3ac] ss:$16 sps:$4 sm:$0xff]  }
 0x3da   :  { %4056 = vmatprep.subr.bf16.mxu0 %v9255_v57  ;;  %v9342_v57 = vld [vmem:[%s9953_s6 + $0xf4] ss:$8 sps:$4 sm:$0xff]  }
 0x3dd   :  { %4057 = vmatpush2.bf16.msra.mxu0 %v9253_v59  ;;  %v9340_v59 = vld [vmem:[%s9953_s6 + $0xf0] ss:$8 sps:$4 sm:$0xff]  }
 0x3de   :  { %v3143_v1 = vpop.f32.mrf.mxu1  ;;  %4058 = vmatprep.subr.bf16.mxu0 %v9261_v61  ;;  %v9303_v61 = vld [vmem:[%s9923_s3 + $0x38c] ss:$16 sps:$4 sm:$0xff]  }
 0x3df   :  { %v3144_v6 = vadd.f32 %v3143_v1, %v3103_v63  ;;  %v9301_v63 = vld [vmem:[%s9923_s3 + $0x388] ss:$16 sps:$4 sm:$0xff]   ;;  %v9306_v1 = vld [vmem:[%s9923_s3 + $0x36c] ss:$16 sps:$4 sm:$0xff]  }
 0x3e0   :  { %v3145_v7 = vpop.f32.mrf.mxu1 }
 0x3e1   :  { %v3146_v10 = vadd.f32 %v3145_v7, %v3105_v5  ;;  %4059 = vmatpush2.bf16.msra.mxu0 %v9259_v0  ;;  %v3152_v12 = vmax.f32 %v3144_v6, 0.0  ;;  %v9343_v0 = vld [vmem:[%s9953_s6 + $0xe0] ss:$8 sps:$4 sm:$0xff]   ;;  %v9346_v6 = vld [vmem:[%s9953_s6 + $0xd0] ss:$8 sps:$4 sm:$0xff]  }
 0x3e2   :  { %v3147_v11 = vpop.f32.mrf.mxu1  ;;  %4060 = vmatprep.subr.bf16.mxu0 %v9267_v3  ;;  %v9348_v3 = vld [vmem:[%s9953_s6 + $0xd4] ss:$8 sps:$4 sm:$0xff]   ;;  %v9304_v5 = vld [vmem:[%s9923_s3 + $0x368] ss:$16 sps:$4 sm:$0xff]  }
 0x3e3   :  { %v3153_v9 = vmax.f32 %v3146_v10, 0.0  ;;  %v10719_v16 = vpack.c.bf16 %v3152_v12, %v3152_v12  ;;  %v9309_v7 = vld [vmem:[%s9923_s3 + $0x34c] ss:$16 sps:$4 sm:$0xff]   ;;  %v9349_v12 = vld [vmem:[%s9953_s6 + $0xc0] ss:$8 sps:$4 sm:$0xff]  }
 0x3e4   :  { %v3148_v13 = vpop.f32.mrf.mxu1  ;;  %v9351_v10 = vld [vmem:[%s9953_s6 + $0xc4] ss:$8 sps:$4 sm:$0xff]  }
 0x3e5   :  { %v3157_v14 = vpack.c.bf16 %v3153_v9, %v3153_v9  ;;  %4061 = vmatpush2.bf16.msra.mxu0 %v9265_v8  ;;  %v9307_v8 = vld [vmem:[%s9923_s3 + $0x348] ss:$16 sps:$4 sm:$0xff]   ;;  %v9312_v11 = vld [vmem:[%s9923_s3 + $0x32c] ss:$16 sps:$4 sm:$0xff]  }
 0x3e6   :  { %4520 = vmatprep.subr.bf16.mxu0 %v9318_v26  ;;  %v9354_v9 = vld [vmem:[%s9953_s6 + $0xb4] ss:$8 sps:$4 sm:$0xff]   ;;  %v9310_v13 = vld [vmem:[%s9923_s3 + $0x328] ss:$16 sps:$4 sm:$0xff]  }
 0x3e7   :  { %4021 = vmatprep.mubr.bf16.mxu1 %v3157_v14  ;;  %v9361_v26 = vld [vmem:[%s9953_s6 + $0x80] ss:$8 sps:$4 sm:$0xff]  }
 0x3e8   :  { %4022 = vmatmul.mubr.bf16.vlgmr.msra.gmra.mxu1 %v10719_v16  ;;  %4063 = vmatmul.mubr.bf16.vlgmr.msra.gmra.mxu0 %v10679_v27  ;;  %v9282_v27 = vld [vmem:[%s9923_s3 + $0x26c] ss:$16 sps:$4 sm:$0xff]  }
 0x3e9   :  { %4072 = vmatpush1.bf16.msra.mxu1 %v9268_v15  ;;  %4103 = vmatprep.mubr.bf16.mxu1 %v3157_v14  ;;  %v9352_v14 = vld [vmem:[%s9953_s6 + $0xb0] ss:$8 sps:$4 sm:$0xff]   ;;  %v9315_v15 = vld [vmem:[%s9923_s3 + $0x30c] ss:$16 sps:$4 sm:$0xff]  }
 0x3ea   :  { %4073 = vmatprep.subr.bf16.mxu1 %v9273_v21  ;;  %4521 = vmatpush1.bf16.msra.mxu0 %v9316_v24  ;;  %v9357_v21 = vld [vmem:[%s9953_s6 + $0xa4] ss:$8 sps:$4 sm:$0xff]  }
 0x3eb   :  { %4522 = vmatprep.subr.bf16.mxu0 %v9321_v28  ;;  %v9363_v24 = vld [vmem:[%s9953_s6 + $0x84] ss:$8 sps:$4 sm:$0xff]   ;;  %v9364_v28 = vld [vmem:[%s9953_s6 + $0x170] ss:$8 sps:$4 sm:$0xff]  }
 0x3ed   :  { %4074 = vmatpush1.bf16.msra.mxu1 %v9271_v22  ;;  %v9313_v22 = vld [vmem:[%s9923_s3 + $0x308] ss:$16 sps:$4 sm:$0xff]   ;;  %s11322_s3 = sld [smem:[#allocation17_spill]] }
 0x3ee   :  { %4075 = vmatprep.subr.bf16.mxu1 %v9276_v23  ;;  %4523 = vmatpush1.bf16.msra.mxu0 %v9319_v31  ;;  %v9355_v23 = vld [vmem:[%s9953_s6 + $0xa0] ss:$8 sps:$4 sm:$0xff]   ;;  %v9369_v31 = vld [vmem:[%s9933_s14 + $0x74] ss:$8 sps:$4 sm:$0xff]  }
 0x3ef   :  { %4524 = vmatprep.subr.bf16.mxu0 %v9324_v32  ;;  %v9376_v32 = vld [vmem:[%s9953_s6 + $0x150] ss:$8 sps:$4 sm:$0xff]  }
 0x3f1   :  { %4076 = vmatpush1.bf16.msra.mxu1 %v9274_v54  ;;  %v9360_v54 = vld [vmem:[%s9953_s6 + $0x94] ss:$8 sps:$4 sm:$0xff]  }
 0x3f2   :  { %4077 = vmatprep.subr.bf16.mxu1 %v9279_v60  ;;  %4525 = vmatpush1.bf16.msra.mxu0 %v9322_v33  ;;  %v9358_v60 = vld [vmem:[%s9953_s6 + $0x90] ss:$8 sps:$4 sm:$0xff]   ;;  %v9382_v33 = vld [vmem:[%s9953_s6 + $0x140] ss:$8 sps:$4 sm:$0xff]  }
 0x3f3   :  { %4526 = vmatprep.subr.bf16.mxu0 %v9327_v35  ;;  %v9388_v35 = vld [vmem:[%s9953_s6 + $0x130] ss:$8 sps:$4 sm:$0xff]  }
 0x3f5   :  { %4078 = vmatpush1.bf16.msra.mxu1 %v9277_v30  ;;  %v9366_v30 = vld [vmem:[%s9953_s6 + $0x174] ss:$8 sps:$4 sm:$0xff]  }
 0x3f6   :  { %4079 = vmatprep.subr.bf16.mxu1 %v9282_v27  ;;  %4527 = vmatpush1.bf16.msra.mxu0 %v9325_v37  ;;  %v9372_v27 = vld [vmem:[%s9953_s6 + $0x164] ss:$8 sps:$4 sm:$0xff]   ;;  %v9394_v37 = vld [vmem:[%s9953_s6 + $0x120] ss:$8 sps:$4 sm:$0xff]  }
 0x3f7   :  { %4528 = vmatprep.subr.bf16.mxu0 %v9330_v39  ;;  %v9400_v39 = vld [vmem:[%s9953_s6 + $0x110] ss:$8 sps:$4 sm:$0xff]  }
 0x3f9   :  { %4080 = vmatpush1.bf16.msra.mxu1 %v9280_v19  ;;  %v9378_v19 = vld [vmem:[%s9953_s6 + $0x154] ss:$8 sps:$4 sm:$0xff]  }
 0x3fa   :  { %4081 = vmatprep.subr.bf16.mxu1 %v9285_v34  ;;  %4529 = vmatpush1.bf16.msra.mxu0 %v9328_v41  ;;  %v9384_v34 = vld [vmem:[%s9953_s6 + $0x144] ss:$8 sps:$4 sm:$0xff]   ;;  %v9406_v41 = vld [vmem:[%s9953_s6 + $0x100] ss:$8 sps:$4 sm:$0xff]  }
 0x3fb   :  { %4530 = vmatprep.subr.bf16.mxu0 %v9333_v44  ;;  %v9412_v44 = vld [vmem:[%s9953_s6 + $0x1f0] ss:$8 sps:$4 sm:$0xff]  }
 0x3fd   :  { %4082 = vmatpush1.bf16.msra.mxu1 %v9283_v36  ;;  %v9390_v36 = vld [vmem:[%s9953_s6 + $0x134] ss:$8 sps:$4 sm:$0xff]  }
 0x3fe   :  { %4083 = vmatprep.subr.bf16.mxu1 %v9288_v38  ;;  %4531 = vmatpush1.bf16.msra.mxu0 %v9331_v46  ;;  %v9396_v38 = vld [vmem:[%s9953_s6 + $0x124] ss:$8 sps:$4 sm:$0xff]   ;;  %v9418_v46 = vld [vmem:[%s9953_s6 + $0x1e0] ss:$8 sps:$4 sm:$0xff]  }
 0x3ff   :  { %4532 = vmatprep.subr.bf16.mxu0 %v9336_v48  ;;  %v9424_v48 = vld [vmem:[%s9953_s6 + $0x1d0] ss:$8 sps:$4 sm:$0xff]  }
 0x401   :  { %4084 = vmatpush1.bf16.msra.mxu1 %v9286_v40  ;;  %v9402_v40 = vld [vmem:[%s9953_s6 + $0x114] ss:$8 sps:$4 sm:$0xff]  }
 0x402   :  { %4085 = vmatprep.subr.bf16.mxu1 %v9291_v43  ;;  %4533 = vmatpush1.bf16.msra.mxu0 %v9334_v50  ;;  %v9408_v43 = vld [vmem:[%s9953_s6 + $0x104] ss:$8 sps:$4 sm:$0xff]   ;;  %v9430_v50 = vld [vmem:[%s9953_s6 + $0x1c0] ss:$8 sps:$4 sm:$0xff]  }
 0x403   :  { %4534 = vmatprep.subr.bf16.mxu0 %v9339_v52  ;;  %v9436_v52 = vld [vmem:[%s9953_s6 + $0x1b0] ss:$8 sps:$4 sm:$0xff]  }
 0x405   :  { %4086 = vmatpush1.bf16.msra.mxu1 %v9289_v45  ;;  %v9414_v45 = vld [vmem:[%s9953_s6 + $0x1f4] ss:$8 sps:$4 sm:$0xff]  }
 0x406   :  { %4087 = vmatprep.subr.bf16.mxu1 %v9294_v47  ;;  %4535 = vmatpush1.bf16.msra.mxu0 %v9337_v55  ;;  %v9420_v47 = vld [vmem:[%s9953_s6 + $0x1e4] ss:$8 sps:$4 sm:$0xff]   ;;  %v9442_v55 = vld [vmem:[%s9953_s6 + $0x1a0] ss:$8 sps:$4 sm:$0xff]  }
 0x407   :  { %4536 = vmatprep.subr.bf16.mxu0 %v9342_v57 }
 0x409   :  { %4088 = vmatpush2.bf16.msra.mxu1 %v9292_v49  ;;  %v9426_v49 = vld [vmem:[%s9953_s6 + $0x1d4] ss:$8 sps:$4 sm:$0xff]  }
 0x40a   :  { %4089 = vmatprep.subr.bf16.mxu1 %v9297_v51  ;;  %4537 = vmatpush2.bf16.msra.mxu0 %v9340_v59  ;;  %v9432_v51 = vld [vmem:[%s9953_s6 + $0x1c4] ss:$8 sps:$4 sm:$0xff]  }
 0x40b   :  { %4538 = vmatprep.subr.bf16.mxu0 %v9345_v62 }
 0x40d   :  { %4090 = vmatpush2.bf16.msra.mxu1 %v9295_v53  ;;  %v9438_v53 = vld [vmem:[%s9953_s6 + $0x1b4] ss:$8 sps:$4 sm:$0xff]  }
 0x40e   :  { %4091 = vmatprep.subr.bf16.mxu1 %v9300_v56  ;;  %4539 = vmatpush2.bf16.msra.mxu0 %v9343_v0  ;;  %v9444_v56 = vld [vmem:[%s9953_s6 + $0x1a4] ss:$8 sps:$4 sm:$0xff]  }
 0x40f   :  { %4540 = vmatprep.subr.bf16.mxu0 %v9348_v3  ;;  %v9462_v3 = vld [vmem:[%s9933_s14 + $0x174] ss:$8 sps:$4 sm:$0xff]  }
 0x411   :  { %4092 = vmatpush2.bf16.msra.mxu1 %v9298_v58  ;;  %v9450_v58 = vld [vmem:[%s9953_s6 + $0x194] ss:$8 sps:$4 sm:$0xff]  }
 0x412   :  { %4093 = vmatprep.subr.bf16.mxu1 %v9303_v61  ;;  %4541 = vmatpush2.bf16.msra.mxu0 %v9346_v6  ;;  %v9448_v61 = vld [vmem:[%s9953_s6 + $0x190] ss:$8 sps:$4 sm:$0xff]  }
 0x413   :  { %4542 = vmatprep.subr.bf16.mxu0 %v9351_v10 }
 0x415   :  { %4094 = vmatpush2.bf16.msra.mxu1 %v9301_v63  ;;  %v9456_v63 = vld [vmem:[%s9953_s6 + $0x184] ss:$8 sps:$4 sm:$0xff]  }
 0x416   :  { %4095 = vmatprep.subr.bf16.mxu1 %v9306_v1  ;;  %4543 = vmatpush2.bf16.msra.mxu0 %v9349_v12  ;;  %v9454_v1 = vld [vmem:[%s9953_s6 + $0x180] ss:$8 sps:$4 sm:$0xff]  }
 0x417   :  { %4544 = vmatprep.subr.bf16.mxu0 %v9354_v9 }
 0x419   :  { %4096 = vmatpush2.bf16.msra.mxu1 %v9304_v5  ;;  %v10821_v5 = vld [vmem:[%s9928_s8] sm:$0xf]  ;;  %s11323_s8 = sld [smem:[#allocation20_spill]] }
 0x41a   :  { %4097 = vmatprep.subr.bf16.mxu1 %v9309_v7  ;;  %4545 = vmatpush2.bf16.msra.mxu0 %v9352_v14  ;;  %v3291_v6 = vrot.slane %v10821_v5, %v10335_v18  ;;  %v3295_v7 = vrot.slane %v10821_v5, %v10341_v20 }
 0x41b   :  { %4546 = vmatprep.subr.bf16.mxu0 %v9357_v21 }
 0x41d   :  { %4098 = vmatpush2.bf16.msra.mxu1 %v9307_v8 }
 0x41e   :  { %4099 = vmatprep.subr.bf16.mxu1 %v9312_v11  ;;  %4547 = vmatpush2.bf16.msra.mxu0 %v9355_v23 }
 0x41f   :  { %4548 = vmatprep.subr.bf16.mxu0 %v9360_v54 }
 0x421   :  { %4100 = vmatpush2.bf16.msra.mxu1 %v9310_v13 }
 0x422   :  { %4101 = vmatprep.subr.bf16.mxu1 %v9315_v15  ;;  %4549 = vmatpush2.bf16.msra.mxu0 %v9358_v60 }
 0x423   :  { %4550 = vmatprep.subr.bf16.mxu0 %v9363_v24 }
 0x425   :  { %4102 = vmatpush2.bf16.msra.mxu1 %v9313_v22 }
 0x426   :  { %4551 = vmatpush2.bf16.msra.mxu0 %v9361_v26  ;;  %4561 = vmatprep.subr.bf16.mxu1 %v9366_v30 }
 0x427   :  { %4998 = vmatprep.subr.bf16.mxu0 %v9369_v31  ;;  %v9367_v31 = vld [vmem:[%s9933_s14 + $0x70] ss:$8 sps:$4 sm:$0xff]  }
 0x428   :  { %4104 = vmatmul.mubr.bf16.vlgmr.msra.gmra.mxu1 %v10719_v16  ;;  %v9370_v16 = vld [vmem:[%s9953_s6 + $0x160] ss:$8 sps:$4 sm:$0xff]   ;;  %s11326_s6 = sld [smem:[#allocation26_spill]] }
 0x429   :  { %4562 = vmatpush1.bf16.msra.mxu1 %v9364_v28 }
 0x42a   :  { %4563 = vmatprep.subr.bf16.mxu1 %v9372_v27  ;;  %v9381_v27 = vld [vmem:[%s9933_s14 + $0x54] ss:$8 sps:$4 sm:$0xff]  }
 0x42d   :  { %4564 = vmatpush1.bf16.msra.mxu1 %v9370_v16 }
 0x42e   :  { %4565 = vmatprep.subr.bf16.mxu1 %v9378_v19  ;;  %v9387_v19 = vld [vmem:[%s9933_s14 + $0x44] ss:$8 sps:$4 sm:$0xff]  }
 0x431   :  { %4566 = vmatpush1.bf16.msra.mxu1 %v9376_v32  ;;  %v9379_v32 = vld [vmem:[%s9933_s14 + $0x50] ss:$8 sps:$4 sm:$0xff]  }
 0x432   :  { %4567 = vmatprep.subr.bf16.mxu1 %v9384_v34  ;;  %v9393_v34 = vld [vmem:[%s9933_s14 + $0x34] ss:$8 sps:$4 sm:$0xff]  }
 0x435   :  { %4568 = vmatpush1.bf16.msra.mxu1 %v9382_v33  ;;  %v9385_v33 = vld [vmem:[%s9933_s14 + $0x40] ss:$8 sps:$4 sm:$0xff]  }
 0x436   :  { %4569 = vmatprep.subr.bf16.mxu1 %v9390_v36  ;;  %v9399_v36 = vld [vmem:[%s9933_s14 + $0x24] ss:$8 sps:$4 sm:$0xff]  }
 0x439   :  { %4570 = vmatpush1.bf16.msra.mxu1 %v9388_v35  ;;  %v9391_v35 = vld [vmem:[%s9933_s14 + $0x30] ss:$8 sps:$4 sm:$0xff]  }
 0x43a   :  { %4571 = vmatprep.subr.bf16.mxu1 %v9396_v38  ;;  %v9405_v38 = vld [vmem:[%s9933_s14 + $0x14] ss:$8 sps:$4 sm:$0xff]  }
 0x43d   :  { %4572 = vmatpush1.bf16.msra.mxu1 %v9394_v37  ;;  %v9397_v37 = vld [vmem:[%s9933_s14 + $0x20] ss:$8 sps:$4 sm:$0xff]  }
 0x43e   :  { %4573 = vmatprep.subr.bf16.mxu1 %v9402_v40  ;;  %v9411_v40 = vld [vmem:[%s9933_s14 + $0x4] ss:$8 sps:$4 sm:$0xff]  }
 0x441   :  { %4574 = vmatpush1.bf16.msra.mxu1 %v9400_v39  ;;  %v9403_v39 = vld [vmem:[%s9933_s14 + $0x10] ss:$8 sps:$4 sm:$0xff]  }
 0x442   :  { %4575 = vmatprep.subr.bf16.mxu1 %v9408_v43  ;;  %v9417_v43 = vld [vmem:[%s9933_s14 + $0xf4] ss:$8 sps:$4 sm:$0xff]  }
 0x445   :  { %4576 = vmatpush1.bf16.msra.mxu1 %v9406_v41  ;;  %v9409_v41 = vld [vmem:[%s9933_s14] ss:$8 sps:$4 sm:$0xff]  }
 0x446   :  { %4577 = vmatprep.subr.bf16.mxu1 %v9414_v45  ;;  %v9423_v45 = vld [vmem:[%s9933_s14 + $0xe4] ss:$8 sps:$4 sm:$0xff]  }
 0x449   :  { %4578 = vmatpush2.bf16.msra.mxu1 %v9412_v44  ;;  %v9415_v44 = vld [vmem:[%s9933_s14 + $0xf0] ss:$8 sps:$4 sm:$0xff]  }
 0x44a   :  { %4579 = vmatprep.subr.bf16.mxu1 %v9420_v47  ;;  %v9429_v47 = vld [vmem:[%s9933_s14 + $0xd4] ss:$8 sps:$4 sm:$0xff]  }
 0x44d   :  { %4580 = vmatpush2.bf16.msra.mxu1 %v9418_v46  ;;  %v9421_v46 = vld [vmem:[%s9933_s14 + $0xe0] ss:$8 sps:$4 sm:$0xff]  }
 0x44e   :  { %4581 = vmatprep.subr.bf16.mxu1 %v9426_v49  ;;  %v9435_v49 = vld [vmem:[%s9933_s14 + $0xc4] ss:$8 sps:$4 sm:$0xff]  }
 0x451   :  { %4582 = vmatpush2.bf16.msra.mxu1 %v9424_v48  ;;  %v9427_v48 = vld [vmem:[%s9933_s14 + $0xd0] ss:$8 sps:$4 sm:$0xff]  }
 0x452   :  { %4583 = vmatprep.subr.bf16.mxu1 %v9432_v51  ;;  %v9441_v51 = vld [vmem:[%s9933_s14 + $0xb4] ss:$8 sps:$4 sm:$0xff]  }
 0x455   :  { %4584 = vmatpush2.bf16.msra.mxu1 %v9430_v50  ;;  %v9433_v50 = vld [vmem:[%s9933_s14 + $0xc0] ss:$8 sps:$4 sm:$0xff]  }
 0x456   :  { %4585 = vmatprep.subr.bf16.mxu1 %v9438_v53  ;;  %v9447_v53 = vld [vmem:[%s9933_s14 + $0xa4] ss:$8 sps:$4 sm:$0xff]  }
 0x459   :  { %4586 = vmatpush2.bf16.msra.mxu1 %v9436_v52  ;;  %v9439_v52 = vld [vmem:[%s9933_s14 + $0xb0] ss:$8 sps:$4 sm:$0xff]  }
 0x45a   :  { %4587 = vmatprep.subr.bf16.mxu1 %v9444_v56  ;;  %v3303_v56 = vrot.slane %v10821_v5, %v10381_v4 }
 0x45d   :  { %4588 = vmatpush2.bf16.msra.mxu1 %v9442_v55  ;;  %v3299_v55 = vrot.slane %v10821_v5, %v10377_v2  ;;  %v9459_v2 = vld [vmem:[%s9933_s14 + $0x84] ss:$8 sps:$4 sm:$0xff]  }
 0x45e   :  { %4589 = vmatprep.subr.bf16.mxu1 %v9450_v58  ;;  %v9453_v58 = vld [vmem:[%s9933_s14 + $0x94] ss:$8 sps:$4 sm:$0xff]  }
 0x461   :  { %4590 = vmatpush2.bf16.msra.mxu1 %v9448_v61 }
 0x462   :  { %4591 = vmatprep.subr.bf16.mxu1 %v9456_v63 }
 0x465   :  { %4592 = vmatpush2.bf16.msra.mxu1 %v9454_v1 }
 0x466   :  { %5039 = vmatprep.subr.bf16.mxu1 %v9462_v3 }
 0x468   :  { %v3982_v57 = vpop.f32.mrf.mxu0 }
 0x469   :  { %v3983_v10 = vadd.f32 %v3982_v57, %v3291_v6  ;;  %v9445_v57 = vld [vmem:[%s9933_s14 + $0xa0] ss:$8 sps:$4 sm:$0xff]  }
 0x46a   :  { %v3984_v59 = vpop.f32.mrf.mxu0 }
 0x46b   :  { %v3985_v11 = vadd.f32 %v3984_v59, %v3295_v7  ;;  %v9457_v7 = vld [vmem:[%s9933_s14 + $0x80] ss:$8 sps:$4 sm:$0xff]  }
 0x46c   :  { %v3986_v62 = vpop.f32.mrf.mxu0 }
 0x46e   :  { %v3987_v0 = vpop.f32.mrf.mxu0 }
 0x46f   :  { %v9451_v0 = vld [vmem:[%s9933_s14 + $0x90] ss:$8 sps:$4 sm:$0xff]  }
 0x4a8   :  { %v4023_v8 = vpop.f32.mrf.mxu1  ;;  %v10827_v12 = vpop.f32.mrf.mxu0 }
 0x4a9   :  { %v4024_v9 = vadd.f32 %v4023_v8, %v3983_v10  ;;  %v4065_v59 = vadd.f32 %v10827_v12, %v3299_v55  ;;  %v9525_v55 = vld [vmem:[%s11315_s5 + $0x24] ss:$8 sps:$4 sm:$0xff]  }
 0x4aa   :  { %v4025_v13 = vpop.f32.mrf.mxu1  ;;  %v10829_v14 = vpop.f32.mrf.mxu0 }
 0x4ab   :  { %v4112_v15 = vadd.f32 %v4024_v9, %v10508_v25  ;;  %v4026_v21 = vadd.f32 %v4025_v13, %v3985_v11  ;;  %v9375_v25 = vld [vmem:[%s9933_s14 + $0x64] ss:$8 sps:$4 sm:$0xff]   ;;  %v4067_v62 = vadd.f32 %v10829_v14, %v3303_v56  ;;  %v9460_v9 = vld [vmem:[%s9933_s14 + $0x170] ss:$8 sps:$4 sm:$0xff]   ;;  %v9468_v14 = vld [vmem:[%s9933_s14 + $0x154] ss:$8 sps:$4 sm:$0xff]  }
 0x4ac   :  { %v4027_v22 = vpop.f32.mrf.mxu1  ;;  %v4068_v23 = vpop.f32.mrf.mxu0  ;;  %v9523_v56 = vld [vmem:[%s11315_s5 + $0x20] ss:$8 sps:$4 sm:$0xff]  }
 0x4ad   :  { %v4113_v54 = vadd.f32 %v4026_v21, %v10510_v29  ;;  %v4116_v60 = vmax.f32 %v4112_v15, 0.0  ;;  %v9373_v29 = vld [vmem:[%s9933_s14 + $0x60] ss:$8 sps:$4 sm:$0xff]   ;;  %v9466_v15 = vld [vmem:[%s9933_s14 + $0x150] ss:$8 sps:$4 sm:$0xff]  }
 0x4ae   :  { %v4028_v24 = vpop.f32.mrf.mxu1  ;;  %v4069_v26 = vpop.f32.mrf.mxu0  ;;  %v9471_v21 = vld [vmem:[%s9933_s14 + $0x144] ss:$8 sps:$4 sm:$0xff]   ;;  %v9469_v22 = vld [vmem:[%s9933_s14 + $0x140] ss:$8 sps:$4 sm:$0xff]   ;;  %v9474_v23 = vld [vmem:[%s9933_s14 + $0x134] ss:$8 sps:$4 sm:$0xff]  }
 0x4af   :  { %v4117_v28 = vmax.f32 %v4113_v54, 0.0  ;;  %v10834_v16 = vpack.c.bf16 %v4116_v60, %v4116_v60  ;;  %v9472_v54 = vld [vmem:[%s9933_s14 + $0x130] ss:$8 sps:$4 sm:$0xff]   ;;  %v9477_v60 = vld [vmem:[%s9933_s14 + $0x124] ss:$8 sps:$4 sm:$0xff]  }
 0x4b0   :  { %v9475_v24 = vld [vmem:[%s9933_s14 + $0x120] ss:$8 sps:$4 sm:$0xff]   ;;  %v9480_v26 = vld [vmem:[%s9933_s14 + $0x114] ss:$8 sps:$4 sm:$0xff]  }
 0x4b1   :  { %v4121_v30 = vpack.c.bf16 %v4117_v28, %v4117_v28  ;;  %v9478_v28 = vld [vmem:[%s9933_s14 + $0x110] ss:$8 sps:$4 sm:$0xff]  }
 0x4b3   :  { %4552 = vmatprep.mubr.bf16.mxu0 %v4121_v30 }
 0x4b4   :  { %4553 = vmatmul.mubr.bf16.vlgmr.msra.gmra.mxu0 %v10834_v16 }
 0x4b5   :  { %4999 = vmatpush1.bf16.msra.mxu0 %v9367_v31  ;;  %5030 = vmatprep.mubr.bf16.mxu0 %v4121_v30  ;;  %v9483_v30 = vld [vmem:[%s9933_s14 + $0x104] ss:$8 sps:$4 sm:$0xff]   ;;  %v9481_v31 = vld [vmem:[%s9933_s14 + $0x100] ss:$8 sps:$4 sm:$0xff]  }
 0x4b6   :  { %5000 = vmatprep.subr.bf16.mxu0 %v9375_v25  ;;  %v9484_v25 = vld [vmem:[%s9933_s14 + $0x1f0] ss:$8 sps:$4 sm:$0xff]  }
 0x4b9   :  { %5001 = vmatpush1.bf16.msra.mxu0 %v9373_v29  ;;  %v9489_v29 = vld [vmem:[%s9933_s14 + $0x1e4] ss:$8 sps:$4 sm:$0xff]  }
 0x4ba   :  { %5002 = vmatprep.subr.bf16.mxu0 %v9381_v27  ;;  %v9487_v27 = vld [vmem:[%s9933_s14 + $0x1e0] ss:$8 sps:$4 sm:$0xff]  }
 0x4bd   :  { %5003 = vmatpush1.bf16.msra.mxu0 %v9379_v32  ;;  %v9492_v32 = vld [vmem:[%s9933_s14 + $0x1d4] ss:$8 sps:$4 sm:$0xff]  }
 0x4be   :  { %5004 = vmatprep.subr.bf16.mxu0 %v9387_v19  ;;  %v9490_v19 = vld [vmem:[%s9933_s14 + $0x1d0] ss:$8 sps:$4 sm:$0xff]  }
 0x4c1   :  { %5005 = vmatpush1.bf16.msra.mxu0 %v9385_v33  ;;  %v9495_v33 = vld [vmem:[%s9933_s14 + $0x1c4] ss:$8 sps:$4 sm:$0xff]  }
 0x4c2   :  { %5006 = vmatprep.subr.bf16.mxu0 %v9393_v34  ;;  %v9493_v34 = vld [vmem:[%s9933_s14 + $0x1c0] ss:$8 sps:$4 sm:$0xff]  }
 0x4c5   :  { %5007 = vmatpush1.bf16.msra.mxu0 %v9391_v35  ;;  %v9498_v35 = vld [vmem:[%s9933_s14 + $0x1b4] ss:$8 sps:$4 sm:$0xff]  }
 0x4c6   :  { %5008 = vmatprep.subr.bf16.mxu0 %v9399_v36  ;;  %v9496_v36 = vld [vmem:[%s9933_s14 + $0x1b0] ss:$8 sps:$4 sm:$0xff]  }
 0x4c9   :  { %5009 = vmatpush1.bf16.msra.mxu0 %v9397_v37  ;;  %v9501_v37 = vld [vmem:[%s9933_s14 + $0x1a4] ss:$8 sps:$4 sm:$0xff]  }
 0x4ca   :  { %5010 = vmatprep.subr.bf16.mxu0 %v9405_v38  ;;  %v9499_v38 = vld [vmem:[%s9933_s14 + $0x1a0] ss:$8 sps:$4 sm:$0xff]  }
 0x4cd   :  { %5011 = vmatpush1.bf16.msra.mxu0 %v9403_v39  ;;  %v9504_v39 = vld [vmem:[%s9933_s14 + $0x194] ss:$8 sps:$4 sm:$0xff]  }
 0x4ce   :  { %5012 = vmatprep.subr.bf16.mxu0 %v9411_v40  ;;  %v9502_v40 = vld [vmem:[%s9933_s14 + $0x190] ss:$8 sps:$4 sm:$0xff]  }
 0x4d1   :  { %5013 = vmatpush1.bf16.msra.mxu0 %v9409_v41  ;;  %v9507_v41 = vld [vmem:[%s9933_s14 + $0x184] ss:$8 sps:$4 sm:$0xff]  }
 0x4d2   :  { %5014 = vmatprep.subr.bf16.mxu0 %v9417_v43  ;;  %v9505_v43 = vld [vmem:[%s9933_s14 + $0x180] ss:$8 sps:$4 sm:$0xff]  }
 0x4d5   :  { %5015 = vmatpush2.bf16.msra.mxu0 %v9415_v44  ;;  %v9508_v44 = vld [vmem:[%s11315_s5 + $0x70] ss:$8 sps:$4 sm:$0xff]  }
 0x4d6   :  { %5016 = vmatprep.subr.bf16.mxu0 %v9423_v45  ;;  %v9510_v45 = vld [vmem:[%s11315_s5 + $0x74] ss:$8 sps:$4 sm:$0xff]  }
 0x4d9   :  { %5017 = vmatpush2.bf16.msra.mxu0 %v9421_v46  ;;  %v9513_v46 = vld [vmem:[%s11315_s5 + $0x64] ss:$8 sps:$4 sm:$0xff]  }
 0x4da   :  { %5018 = vmatprep.subr.bf16.mxu0 %v9429_v47  ;;  %v9511_v47 = vld [vmem:[%s11315_s5 + $0x60] ss:$8 sps:$4 sm:$0xff]  }
 0x4dd   :  { %5019 = vmatpush2.bf16.msra.mxu0 %v9427_v48  ;;  %v9516_v48 = vld [vmem:[%s11315_s5 + $0x54] ss:$8 sps:$4 sm:$0xff]  }
 0x4de   :  { %5020 = vmatprep.subr.bf16.mxu0 %v9435_v49  ;;  %v9514_v49 = vld [vmem:[%s11315_s5 + $0x50] ss:$8 sps:$4 sm:$0xff]  }
 0x4e1   :  { %5021 = vmatpush2.bf16.msra.mxu0 %v9433_v50  ;;  %v9519_v50 = vld [vmem:[%s11315_s5 + $0x44] ss:$8 sps:$4 sm:$0xff]  }
 0x4e2   :  { %5022 = vmatprep.subr.bf16.mxu0 %v9441_v51  ;;  %v9517_v51 = vld [vmem:[%s11315_s5 + $0x40] ss:$8 sps:$4 sm:$0xff]  }
 0x4e5   :  { %5023 = vmatpush2.bf16.msra.mxu0 %v9439_v52  ;;  %v9522_v52 = vld [vmem:[%s11315_s5 + $0x34] ss:$8 sps:$4 sm:$0xff]  }
 0x4e6   :  { %5024 = vmatprep.subr.bf16.mxu0 %v9447_v53  ;;  %v9520_v53 = vld [vmem:[%s11315_s5 + $0x30] ss:$8 sps:$4 sm:$0xff]  }
 0x4e8   :  { %v4105_v61 = vpop.f32.mrf.mxu1 }
 0x4e9   :  { %v4106_v63 = vadd.f32 %v4105_v61, %v4065_v59  ;;  %5025 = vmatpush2.bf16.msra.mxu0 %v9445_v57  ;;  %v9528_v57 = vld [vmem:[%s11315_s5 + $0x14] ss:$8 sps:$4 sm:$0xff]   ;;  %v9531_v59 = vld [vmem:[%s11315_s5 + $0x4] ss:$8 sps:$4 sm:$0xff]   ;;  %v9529_v61 = vld [vmem:[%s11315_s5] ss:$8 sps:$4 sm:$0xff]  }
 0x4ea   :  { %v4107_v1 = vpop.f32.mrf.mxu1  ;;  %5026 = vmatprep.subr.bf16.mxu0 %v9453_v58  ;;  %v9526_v58 = vld [vmem:[%s11315_s5 + $0x10] ss:$8 sps:$4 sm:$0xff]  }
 0x4eb   :  { %v4114_v4 = vadd.f32 %v4106_v63, %v10557_v42  ;;  %v4108_v3 = vadd.f32 %v4107_v1, %v4067_v62  ;;  %v9465_v42 = vld [vmem:[%s9933_s14 + $0x164] ss:$8 sps:$4 sm:$0xff]   ;;  %v9534_v62 = vld [vmem:[%s11315_s5 + $0xf4] ss:$8 sps:$4 sm:$0xff]   ;;  %v9532_v63 = vld [vmem:[%s11315_s5 + $0xf0] ss:$8 sps:$4 sm:$0xff]  }
 0x4ec   :  { %v4109_v5 = vpop.f32.mrf.mxu1  ;;  %v9535_v1 = vld [vmem:[%s11315_s5 + $0xe0] ss:$8 sps:$4 sm:$0xff]  }
 0x4ed   :  { %v4115_v6 = vadd.f32 %v4108_v3, %v10559_v17  ;;  %5027 = vmatpush2.bf16.msra.mxu0 %v9451_v0  ;;  %v4118_v10 = vmax.f32 %v4114_v4, 0.0  ;;  %v9463_v17 = vld [vmem:[%s9933_s14 + $0x160] ss:$8 sps:$4 sm:$0xff]   ;;  %v9537_v0 = vld [vmem:[%s11315_s5 + $0xe4] ss:$8 sps:$4 sm:$0xff]  }
 0x4ee   :  { %v4110_v8 = vpop.f32.mrf.mxu1  ;;  %5028 = vmatprep.subr.bf16.mxu0 %v9459_v2  ;;  %v9540_v2 = vld [vmem:[%s11315_s5 + $0xd4] ss:$8 sps:$4 sm:$0xff]   ;;  %v9538_v4 = vld [vmem:[%s11315_s5 + $0xd0] ss:$8 sps:$4 sm:$0xff]   ;;  %v9543_v3 = vld [vmem:[%s11315_s5 + $0xc4] ss:$8 sps:$4 sm:$0xff]  }
 0x4ef   :  { %v4119_v12 = vmax.f32 %v4115_v6, 0.0  ;;  %v10876_v13 = vpack.c.bf16 %v4118_v10, %v4118_v10  ;;  %v9541_v5 = vld [vmem:[%s11315_s5 + $0xc0] ss:$8 sps:$4 sm:$0xff]   ;;  %v9546_v6 = vld [vmem:[%s11315_s5 + $0xb4] ss:$8 sps:$4 sm:$0xff]  }
 0x4f0   :  { %v9549_v10 = vld [vmem:[%s11315_s5 + $0xa4] ss:$8 sps:$4 sm:$0xff]   ;;  %v9547_v8 = vld [vmem:[%s11315_s5 + $0xa0] ss:$8 sps:$4 sm:$0xff]  }
 0x4f1   :  { %v4123_v11 = vpack.c.bf16 %v4119_v12, %v4119_v12  ;;  %5029 = vmatpush2.bf16.msra.mxu0 %v9457_v7  ;;  %v9544_v7 = vld [vmem:[%s11315_s5 + $0xb0] ss:$8 sps:$4 sm:$0xff]  }
 0x4f2   :  { %5288 = vmatprep.subr.bf16.mxu0 %v9510_v45 }
 0x4f3   :  { %4593 = vmatprep.mubr.bf16.mxu1 %v4123_v11 }
 0x4f4   :  { %4594 = vmatmul.mubr.bf16.vlgmr.msra.gmra.mxu1 %v10876_v13  ;;  %5031 = vmatmul.mubr.bf16.vlgmr.msra.gmra.mxu0 %v10834_v16  ;;  %v9486_v16 = vld [vmem:[%s9933_s14 + $0x1f4] ss:$8 sps:$4 sm:$0xff]   ;;  %s11324_s14 = sld [smem:[#allocation19_spill]] }
 0x4f5   :  { %5040 = vmatpush1.bf16.msra.mxu1 %v9460_v9  ;;  %5071 = vmatprep.mubr.bf16.mxu1 %v4123_v11  ;;  %v9552_v11 = vld [vmem:[%s11315_s5 + $0x94] ss:$8 sps:$4 sm:$0xff]   ;;  %v9550_v9 = vld [vmem:[%s11315_s5 + $0x90] ss:$8 sps:$4 sm:$0xff]  }
 0x4f6   :  { %5041 = vmatprep.subr.bf16.mxu1 %v9465_v42  ;;  %5289 = vmatpush1.bf16.msra.mxu0 %v9508_v44  ;;  %v9592_v44 = vld [vmem:[%s11316_s9 + $0xb0] ss:$8 sps:$4 sm:$0xff]  }
 0x4f7   :  { %5290 = vmatprep.subr.bf16.mxu0 %v9513_v46 }
 0x4f9   :  { %5042 = vmatpush1.bf16.msra.mxu1 %v9463_v17  ;;  %v9555_v17 = vld [vmem:[%s11315_s5 + $0x84] ss:$8 sps:$4 sm:$0xff]  }
 0x4fa   :  { %5043 = vmatprep.subr.bf16.mxu1 %v9468_v14  ;;  %5291 = vmatpush1.bf16.msra.mxu0 %v9511_v47  ;;  %v9553_v14 = vld [vmem:[%s11315_s5 + $0x80] ss:$8 sps:$4 sm:$0xff]   ;;  %s11343_s5 = sld [smem:[#allocation40_spill]] }
 0x4fb   :  { %5292 = vmatprep.subr.bf16.mxu0 %v9516_v48 }
 0x4fd   :  { %5044 = vmatpush1.bf16.msra.mxu1 %v9466_v15 }
 0x4fe   :  { %5045 = vmatprep.subr.bf16.mxu1 %v9471_v21  ;;  %5293 = vmatpush1.bf16.msra.mxu0 %v9514_v49  ;;  %v9556_v21 = vld [vmem:[%s11316_s9 + $0x70] ss:$8 sps:$4 sm:$0xff]  }
 0x4ff   :  { %5294 = vmatprep.subr.bf16.mxu0 %v9519_v50 }
 0x501   :  { %5046 = vmatpush1.bf16.msra.mxu1 %v9469_v22  ;;  %v9558_v22 = vld [vmem:[%s11316_s9 + $0x74] ss:$8 sps:$4 sm:$0xff]  }
 0x502   :  { %5047 = vmatprep.subr.bf16.mxu1 %v9474_v23  ;;  %5295 = vmatpush1.bf16.msra.mxu0 %v9517_v51  ;;  %v9561_v23 = vld [vmem:[%s11316_s9 + $0x64] ss:$8 sps:$4 sm:$0xff]  }
 0x503   :  { %5296 = vmatprep.subr.bf16.mxu0 %v9522_v52 }
 0x505   :  { %5048 = vmatpush1.bf16.msra.mxu1 %v9472_v54  ;;  %v9559_v54 = vld [vmem:[%s11316_s9 + $0x60] ss:$8 sps:$4 sm:$0xff]  }
 0x506   :  { %5049 = vmatprep.subr.bf16.mxu1 %v9477_v60  ;;  %5297 = vmatpush1.bf16.msra.mxu0 %v9520_v53  ;;  %v9564_v60 = vld [vmem:[%s11316_s9 + $0x54] ss:$8 sps:$4 sm:$0xff]  }
 0x507   :  { %5298 = vmatprep.subr.bf16.mxu0 %v9525_v55 }
 0x509   :  { %5050 = vmatpush1.bf16.msra.mxu1 %v9475_v24  ;;  %v9562_v24 = vld [vmem:[%s11316_s9 + $0x50] ss:$8 sps:$4 sm:$0xff]  }
 0x50a   :  { %5051 = vmatprep.subr.bf16.mxu1 %v9480_v26  ;;  %5299 = vmatpush1.bf16.msra.mxu0 %v9523_v56  ;;  %v9567_v26 = vld [vmem:[%s11316_s9 + $0x44] ss:$8 sps:$4 sm:$0xff]  }
 0x50b   :  { %5300 = vmatprep.subr.bf16.mxu0 %v9528_v57 }
 0x50d   :  { %5052 = vmatpush1.bf16.msra.mxu1 %v9478_v28  ;;  %v9565_v28 = vld [vmem:[%s11316_s9 + $0x40] ss:$8 sps:$4 sm:$0xff]  }
 0x50e   :  { %5053 = vmatprep.subr.bf16.mxu1 %v9483_v30  ;;  %5301 = vmatpush1.bf16.msra.mxu0 %v9526_v58  ;;  %v9570_v30 = vld [vmem:[%s11316_s9 + $0x34] ss:$8 sps:$4 sm:$0xff]  }
 0x50f   :  { %5302 = vmatprep.subr.bf16.mxu0 %v9531_v59 }
 0x511   :  { %5054 = vmatpush1.bf16.msra.mxu1 %v9481_v31  ;;  %v9568_v31 = vld [vmem:[%s11316_s9 + $0x30] ss:$8 sps:$4 sm:$0xff]  }
 0x512   :  { %5055 = vmatprep.subr.bf16.mxu1 %v9486_v16  ;;  %5303 = vmatpush1.bf16.msra.mxu0 %v9529_v61  ;;  %v9573_v16 = vld [vmem:[%s11316_s9 + $0x24] ss:$8 sps:$4 sm:$0xff]   ;;  %v4666_v61 = vld [vmem:[%s11318_s17] sm:$0x3] }
 0x513   :  { %5304 = vmatprep.subr.bf16.mxu0 %v9534_v62  ;;  %v4671_v62 = vrot.slane %v4666_v61, %v10335_v18 }
 0x515   :  { %5056 = vmatpush2.bf16.msra.mxu1 %v9484_v25  ;;  %v9571_v25 = vld [vmem:[%s11316_s9 + $0x20] ss:$8 sps:$4 sm:$0xff]  }
 0x516   :  { %5057 = vmatprep.subr.bf16.mxu1 %v9489_v29  ;;  %5305 = vmatpush2.bf16.msra.mxu0 %v9532_v63  ;;  %v9576_v29 = vld [vmem:[%s11316_s9 + $0x14] ss:$8 sps:$4 sm:$0xff]   ;;  %v4675_v63 = vrot.slane %v4666_v61, %v10341_v20 }
 0x517   :  { %5306 = vmatprep.subr.bf16.mxu0 %v9537_v0 }
 0x519   :  { %5058 = vmatpush2.bf16.msra.mxu1 %v9487_v27  ;;  %v9574_v27 = vld [vmem:[%s11316_s9 + $0x10] ss:$8 sps:$4 sm:$0xff]  }
 0x51a   :  { %5059 = vmatprep.subr.bf16.mxu1 %v9492_v32  ;;  %5307 = vmatpush2.bf16.msra.mxu0 %v9535_v1  ;;  %v9579_v32 = vld [vmem:[%s11316_s9 + $0x4] ss:$8 sps:$4 sm:$0xff]  }
 0x51b   :  { %5308 = vmatprep.subr.bf16.mxu0 %v9540_v2 }
 0x51d   :  { %5060 = vmatpush2.bf16.msra.mxu1 %v9490_v19  ;;  %v9577_v19 = vld [vmem:[%s11316_s9] ss:$8 sps:$4 sm:$0xff]  }
 0x51e   :  { %5061 = vmatprep.subr.bf16.mxu1 %v9495_v33  ;;  %5309 = vmatpush2.bf16.msra.mxu0 %v9538_v4  ;;  %v9582_v33 = vld [vmem:[%s11316_s9 + $0xf4] ss:$8 sps:$4 sm:$0xff]  }
 0x51f   :  { %5310 = vmatprep.subr.bf16.mxu0 %v9543_v3 }
 0x521   :  { %5062 = vmatpush2.bf16.msra.mxu1 %v9493_v34  ;;  %v9580_v34 = vld [vmem:[%s11316_s9 + $0xf0] ss:$8 sps:$4 sm:$0xff]  }
 0x522   :  { %5063 = vmatprep.subr.bf16.mxu1 %v9498_v35  ;;  %5311 = vmatpush2.bf16.msra.mxu0 %v9541_v5  ;;  %v9585_v35 = vld [vmem:[%s11316_s9 + $0xe4] ss:$8 sps:$4 sm:$0xff]  }
 0x523   :  { %5312 = vmatprep.subr.bf16.mxu0 %v9546_v6 }
 0x525   :  { %5064 = vmatpush2.bf16.msra.mxu1 %v9496_v36  ;;  %v9583_v36 = vld [vmem:[%s11316_s9 + $0xe0] ss:$8 sps:$4 sm:$0xff]  }
 0x526   :  { %5065 = vmatprep.subr.bf16.mxu1 %v9501_v37  ;;  %5313 = vmatpush2.bf16.msra.mxu0 %v9544_v7  ;;  %v9588_v37 = vld [vmem:[%s11316_s9 + $0xd4] ss:$8 sps:$4 sm:$0xff]  }
 0x527   :  { %5314 = vmatprep.subr.bf16.mxu0 %v9549_v10 }
 0x529   :  { %5066 = vmatpush2.bf16.msra.mxu1 %v9499_v38  ;;  %v9586_v38 = vld [vmem:[%s11316_s9 + $0xd0] ss:$8 sps:$4 sm:$0xff]  }
 0x52a   :  { %5067 = vmatprep.subr.bf16.mxu1 %v9504_v39  ;;  %5315 = vmatpush2.bf16.msra.mxu0 %v9547_v8  ;;  %v9591_v39 = vld [vmem:[%s11316_s9 + $0xc4] ss:$8 sps:$4 sm:$0xff]  }
 0x52b   :  { %5316 = vmatprep.subr.bf16.mxu0 %v9552_v11 }
 0x52d   :  { %5068 = vmatpush2.bf16.msra.mxu1 %v9502_v40  ;;  %v9589_v40 = vld [vmem:[%s11316_s9 + $0xc0] ss:$8 sps:$4 sm:$0xff]  }
 0x52e   :  { %5069 = vmatprep.subr.bf16.mxu1 %v9507_v41  ;;  %5317 = vmatpush2.bf16.msra.mxu0 %v9550_v9  ;;  %v9594_v41 = vld [vmem:[%s11316_s9 + $0xb4] ss:$8 sps:$4 sm:$0xff]   ;;  %v9597_v9 = vld [vmem:[%s11316_s9 + $0xa4] ss:$8 sps:$4 sm:$0xff]  }
 0x52f   :  { %5318 = vmatprep.subr.bf16.mxu0 %v9555_v17  ;;  %v9598_v17 = vld [vmem:[%s11316_s9 + $0x90] ss:$8 sps:$4 sm:$0xff]  }
 0x531   :  { %5070 = vmatpush2.bf16.msra.mxu1 %v9505_v43  ;;  %v4188_v43 = vld [vmem:[%s11317_s13] sm:$0x3] }
 0x532   :  { %5319 = vmatpush2.bf16.msra.mxu0 %v9553_v14  ;;  %5539 = vmatprep.subr.bf16.mxu1 %v9558_v22  ;;  %v4193_v45 = vrot.slane %v4188_v43, %v10335_v18  ;;  %v4197_v46 = vrot.slane %v4188_v43, %v10341_v20  ;;  %v9603_v14 = vld [vmem:[%s11316_s9 + $0x84] ss:$8 sps:$4 sm:$0xff]   ;;  %v9606_v22 = vld [vmem:[%s11319_s21 + $0x74] ss:$8 sps:$4 sm:$0xff]   ;;  %v9640_v43 = vld [vmem:[%s11319_s21 + $0xb0] ss:$8 sps:$4 sm:$0xff]  }
 0x533   :  { %5788 = vmatprep.subr.bf16.mxu0 %v9606_v22 }
 0x534   :  { %5072 = vmatmul.mubr.bf16.vlgmr.msra.gmra.mxu1 %v10876_v13 }
 0x535   :  { %5540 = vmatpush1.bf16.msra.mxu1 %v9556_v21  ;;  %v9604_v21 = vld [vmem:[%s11319_s21 + $0x70] ss:$8 sps:$4 sm:$0xff]  }
 0x536   :  { %5541 = vmatprep.subr.bf16.mxu1 %v9561_v23  ;;  %v9609_v23 = vld [vmem:[%s11319_s21 + $0x64] ss:$8 sps:$4 sm:$0xff]  }
 0x539   :  { %5542 = vmatpush1.bf16.msra.mxu1 %v9559_v54  ;;  %v9607_v54 = vld [vmem:[%s11319_s21 + $0x60] ss:$8 sps:$4 sm:$0xff]  }
 0x53a   :  { %5543 = vmatprep.subr.bf16.mxu1 %v9564_v60  ;;  %v9612_v60 = vld [vmem:[%s11319_s21 + $0x54] ss:$8 sps:$4 sm:$0xff]  }
 0x53d   :  { %5544 = vmatpush1.bf16.msra.mxu1 %v9562_v24  ;;  %v9610_v24 = vld [vmem:[%s11319_s21 + $0x50] ss:$8 sps:$4 sm:$0xff]  }
 0x53e   :  { %5545 = vmatprep.subr.bf16.mxu1 %v9567_v26  ;;  %v9615_v26 = vld [vmem:[%s11319_s21 + $0x44] ss:$8 sps:$4 sm:$0xff]  }
 0x541   :  { %5546 = vmatpush1.bf16.msra.mxu1 %v9565_v28  ;;  %v9613_v28 = vld [vmem:[%s11319_s21 + $0x40] ss:$8 sps:$4 sm:$0xff]  }
 0x542   :  { %5547 = vmatprep.subr.bf16.mxu1 %v9570_v30  ;;  %v9618_v30 = vld [vmem:[%s11319_s21 + $0x34] ss:$8 sps:$4 sm:$0xff]  }
 0x545   :  { %5548 = vmatpush1.bf16.msra.mxu1 %v9568_v31  ;;  %v9616_v31 = vld [vmem:[%s11319_s21 + $0x30] ss:$8 sps:$4 sm:$0xff]  }
 0x546   :  { %5549 = vmatprep.subr.bf16.mxu1 %v9573_v16  ;;  %v9621_v16 = vld [vmem:[%s11319_s21 + $0x24] ss:$8 sps:$4 sm:$0xff]  }
 0x549   :  { %5550 = vmatpush1.bf16.msra.mxu1 %v9571_v25  ;;  %v9619_v25 = vld [vmem:[%s11319_s21 + $0x20] ss:$8 sps:$4 sm:$0xff]  }
 0x54a   :  { %5551 = vmatprep.subr.bf16.mxu1 %v9576_v29  ;;  %v9624_v29 = vld [vmem:[%s11319_s21 + $0x14] ss:$8 sps:$4 sm:$0xff]  }
 0x54d   :  { %5552 = vmatpush1.bf16.msra.mxu1 %v9574_v27  ;;  %v9622_v27 = vld [vmem:[%s11319_s21 + $0x10] ss:$8 sps:$4 sm:$0xff]  }
 0x54e   :  { %5553 = vmatprep.subr.bf16.mxu1 %v9579_v32  ;;  %v9627_v32 = vld [vmem:[%s11319_s21 + $0x4] ss:$8 sps:$4 sm:$0xff]  }
 0x551   :  { %5554 = vmatpush1.bf16.msra.mxu1 %v9577_v19  ;;  %v9625_v19 = vld [vmem:[%s11319_s21] ss:$8 sps:$4 sm:$0xff]  }
 0x552   :  { %5555 = vmatprep.subr.bf16.mxu1 %v9582_v33  ;;  %v9630_v33 = vld [vmem:[%s11319_s21 + $0xf4] ss:$8 sps:$4 sm:$0xff]  }
 0x555   :  { %5556 = vmatpush2.bf16.msra.mxu1 %v9580_v34  ;;  %v9628_v34 = vld [vmem:[%s11319_s21 + $0xf0] ss:$8 sps:$4 sm:$0xff]  }
 0x556   :  { %5557 = vmatprep.subr.bf16.mxu1 %v9585_v35  ;;  %v9633_v35 = vld [vmem:[%s11319_s21 + $0xe4] ss:$8 sps:$4 sm:$0xff]  }
 0x559   :  { %5558 = vmatpush2.bf16.msra.mxu1 %v9583_v36  ;;  %v9631_v36 = vld [vmem:[%s11319_s21 + $0xe0] ss:$8 sps:$4 sm:$0xff]  }
 0x55a   :  { %5559 = vmatprep.subr.bf16.mxu1 %v9588_v37  ;;  %v9636_v37 = vld [vmem:[%s11319_s21 + $0xd4] ss:$8 sps:$4 sm:$0xff]  }
 0x55d   :  { %5560 = vmatpush2.bf16.msra.mxu1 %v9586_v38  ;;  %v9634_v38 = vld [vmem:[%s11319_s21 + $0xd0] ss:$8 sps:$4 sm:$0xff]  }
 0x55e   :  { %5561 = vmatprep.subr.bf16.mxu1 %v9591_v39  ;;  %v9639_v39 = vld [vmem:[%s11319_s21 + $0xc4] ss:$8 sps:$4 sm:$0xff]  }
 0x561   :  { %5562 = vmatpush2.bf16.msra.mxu1 %v9589_v40  ;;  %v9637_v40 = vld [vmem:[%s11319_s21 + $0xc0] ss:$8 sps:$4 sm:$0xff]  }
 0x562   :  { %5563 = vmatprep.subr.bf16.mxu1 %v9594_v41  ;;  %v9642_v41 = vld [vmem:[%s11319_s21 + $0xb4] ss:$8 sps:$4 sm:$0xff]  }
 0x565   :  { %5564 = vmatpush2.bf16.msra.mxu1 %v9592_v44  ;;  %v9645_v44 = vld [vmem:[%s11319_s21 + $0xa4] ss:$8 sps:$4 sm:$0xff]  }
 0x566   :  { %5565 = vmatprep.subr.bf16.mxu1 %v9597_v9  ;;  %v9661_v9 = vld [vmem:[%s11321_s29 + $0x18] sm:$0xff]  }
 0x574   :  { %v10939_v12 = vpop.f32.mrf.mxu0 }
 0x575   :  { %v4555_v47 = vadd.f32 %v10939_v12, %v4193_v45  ;;  %v9643_v45 = vld [vmem:[%s11319_s21 + $0xa0] ss:$8 sps:$4 sm:$0xff]  }
 0x576   :  { %v10943_v13 = vpop.f32.mrf.mxu0 }
 0x577   :  { %v4557_v50 = vadd.f32 %v10943_v13, %v4197_v46  ;;  %v9595_v13 = vld [vmem:[%s11316_s9 + $0xa0] ss:$8 sps:$4 sm:$0xff]  }
 0x578   :  { %v4558_v42 = vpop.f32.mrf.mxu0  ;;  %5566 = vmatpush2.bf16.msra.mxu1 %v9595_v13  ;;  %v5116_v46 = vld [vmem:[%s11320_s25] sm:$0x3]  ;;  %v9662_v13 = vld [vmem:[%s11321_s29 + $0x50] sm:$0xff]  }
 0x579   :  { %v9600_v42 = vld [vmem:[%s11316_s9 + $0x94] ss:$8 sps:$4 sm:$0xff]  }
 0x57a   :  { %v4559_v15 = vpop.f32.mrf.mxu0  ;;  %5567 = vmatprep.subr.bf16.mxu1 %v9600_v42  ;;  %v5367_v42 = vld [vmem:[%s11322_s3] sm:$0x3] }
 0x57b   :  { %v9601_v15 = vld [vmem:[%s11316_s9 + $0x80] ss:$8 sps:$4 sm:$0xff]  }
 0x57c   :  { %5568 = vmatpush2.bf16.msra.mxu1 %v9598_v17  ;;  %v5372_v17 = vrot.slane %v5367_v42, %v10335_v18 }
 0x57d   :  { %5569 = vmatprep.subr.bf16.mxu1 %v9603_v14  ;;  %v5376_v14 = vrot.slane %v5367_v42, %v10341_v20 }
 0x580   :  { %5570 = vmatpush2.bf16.msra.mxu1 %v9601_v15 }
 0x5b4   :  { %v4595_v48 = vpop.f32.mrf.mxu1  ;;  %v5032_v49 = vpop.f32.mrf.mxu0 }
 0x5b5   :  { %v10978_v51 = vadd.f32 %v4595_v48, %v4555_v47  ;;  %v5033_v0 = vadd.f32 %v5032_v49, %v4671_v62  ;;  %v5121_v47 = vrot.slane %v5116_v46, %v10335_v18  ;;  %v5125_v48 = vrot.slane %v5116_v46, %v10341_v20 }
 0x5b6   :  { %v4597_v52 = vpop.f32.mrf.mxu1  ;;  %v5034_v53 = vpop.f32.mrf.mxu0 }
 0x5b7   :  { %v10980_v55 = vadd.f32 %v4597_v52, %v4557_v50  ;;  %v5035_v2 = vadd.f32 %v5034_v53, %v4675_v63 }
 0x5b8   :  { %v4599_v56 = vpop.f32.mrf.mxu1  ;;  %v5036_v57 = vpop.f32.mrf.mxu0 }
 0x5ba   :  { %v4600_v58 = vpop.f32.mrf.mxu1  ;;  %v5037_v59 = vpop.f32.mrf.mxu0 }
 0x5f4   :  { %v5073_v1 = vpop.f32.mrf.mxu1 }
 0x5f5   :  { %v5074_v4 = vadd.f32 %v5073_v1, %v5033_v0  ;;  %v9651_v1 = vld [vmem:[%s11319_s21 + $0x84] ss:$8 sps:$4 sm:$0xff]  }
 0x5f6   :  { %v5075_v3 = vpop.f32.mrf.mxu1 }
 0x5f7   :  { %v5076_v5 = vadd.f32 %v5075_v3, %v5035_v2  ;;  %v5080_v6 = vmax.f32 %v5074_v4, 0.0  ;;  %v9649_v2 = vld [vmem:[%s11319_s21 + $0x80] ss:$8 sps:$4 sm:$0xff]   ;;  %v9652_v4 = vld [vmem:[%s11321_s29 + $0x78] sm:$0xff]  }
 0x5f8   :  { %v5077_v7 = vpop.f32.mrf.mxu1  ;;  %v9653_v3 = vld [vmem:[%s11321_s29 + $0x38] sm:$0xff]   ;;  %8182 = vmatprep.subr.bf16.mxu1 %v9652_v4  ;;  %v9687_v4 = vld [vmem:[%s11325_s30 + $0x20] sm:$0xff]  }
 0x5f9   :  { %v5081_v10 = vmax.f32 %v5076_v5, 0.0  ;;  %v5082_v11 = vpack.c.bf16 %v5080_v6, %v5080_v6  ;;  %v9654_v5 = vld [vmem:[%s11321_s29 + $0x70] sm:$0xff]   ;;  %v9656_v7 = vld [vmem:[%s11321_s29 + $0x68] sm:$0xff]  }
 0x5fa   :  { %v5078_v8 = vpop.f32.mrf.mxu1  ;;  %v9655_v6 = vld [vmem:[%s11321_s29 + $0x30] sm:$0xff]  }
 0x5fb   :  { %v5083_v12 = vpack.c.bf16 %v5081_v10, %v5081_v10  ;;  %v9657_v10 = vld [vmem:[%s11321_s29 + $0x28] sm:$0xff]   ;;  %v9658_v8 = vld [vmem:[%s11321_s29 + $0x60] sm:$0xff]  }
 0x5fd   :  { %5320 = vmatprep.mubr.bf16.mxu0 %v5083_v12  ;;  %v9659_v12 = vld [vmem:[%s11321_s29 + $0x20] sm:$0xff]  }
 0x5fe   :  { %5321 = vmatmul.mubr.bf16.vlgmr.msra.gmra.mxu0 %v5082_v11  ;;  %v9660_v11 = vld [vmem:[%s11321_s29 + $0x58] sm:$0xff]  }
 0x5ff   :  { %5789 = vmatpush1.bf16.msra.mxu0 %v9604_v21 }
 0x600   :  { %5790 = vmatprep.subr.bf16.mxu0 %v9609_v23 }
 0x603   :  { %5791 = vmatpush1.bf16.msra.mxu0 %v9607_v54 }
 0x604   :  { %5792 = vmatprep.subr.bf16.mxu0 %v9612_v60 }
 0x607   :  { %5793 = vmatpush1.bf16.msra.mxu0 %v9610_v24 }
 0x608   :  { %5794 = vmatprep.subr.bf16.mxu0 %v9615_v26 }
 0x60b   :  { %5795 = vmatpush1.bf16.msra.mxu0 %v9613_v28 }
 0x60c   :  { %5796 = vmatprep.subr.bf16.mxu0 %v9618_v30 }
 0x60f   :  { %5797 = vmatpush1.bf16.msra.mxu0 %v9616_v31  ;;  %v9663_v31 = vld [vmem:[%s11321_s29 + $0x10] sm:$0xff]  }
 0x610   :  { %5798 = vmatprep.subr.bf16.mxu0 %v9621_v16  ;;  %v9664_v16 = vld [vmem:[%s11321_s29 + $0x48] sm:$0xff]  }
 0x613   :  { %5799 = vmatpush1.bf16.msra.mxu0 %v9619_v25  ;;  %v9665_v25 = vld [vmem:[%s11321_s29 + $0x8] sm:$0xff]  }
 0x614   :  { %5800 = vmatprep.subr.bf16.mxu0 %v9624_v29  ;;  %v9666_v29 = vld [vmem:[%s11321_s29 + $0x40] sm:$0xff]  }
 0x617   :  { %5801 = vmatpush1.bf16.msra.mxu0 %v9622_v27  ;;  %v9667_v27 = vld [vmem:[%s11321_s29] sm:$0xff]  }
 0x618   :  { %5802 = vmatprep.subr.bf16.mxu0 %v9627_v32  ;;  %v9668_v32 = vld [vmem:[%s11323_s8 + $0x78] sm:$0xff]  }
 0x61b   :  { %5803 = vmatpush1.bf16.msra.mxu0 %v9625_v19  ;;  %v5616_v19 = vld [vmem:[%s11324_s14] sm:$0x3] }
 0x61c   :  { %5804 = vmatprep.subr.bf16.mxu0 %v9630_v33  ;;  %v5621_v33 = vrot.slane %v5616_v19, %v10335_v18  ;;  %v9669_v18 = vld [vmem:[%s11323_s8 + $0x38] sm:$0xff]  }
 0x61f   :  { %5805 = vmatpush2.bf16.msra.mxu0 %v9628_v34  ;;  %v5625_v34 = vrot.slane %v5616_v19, %v10341_v20  ;;  %v9703_v19 = vld [vmem:[%s11328_s20 + $0x20] sm:$0xff]  }
 0x620   :  { %5806 = vmatprep.subr.bf16.mxu0 %v9633_v35 }
 0x623   :  { %5807 = vmatpush2.bf16.msra.mxu0 %v9631_v36 }
 0x624   :  { %5808 = vmatprep.subr.bf16.mxu0 %v9636_v37 }
 0x627   :  { %5809 = vmatpush2.bf16.msra.mxu0 %v9634_v38 }
 0x628   :  { %5810 = vmatprep.subr.bf16.mxu0 %v9639_v39 }
 0x62b   :  { %5811 = vmatpush2.bf16.msra.mxu0 %v9637_v40 }
 0x62c   :  { %5812 = vmatprep.subr.bf16.mxu0 %v9642_v41 }
 0x62f   :  { %5813 = vmatpush2.bf16.msra.mxu0 %v9640_v43 }
 0x630   :  { %5814 = vmatprep.subr.bf16.mxu0 %v9645_v44 }
 0x633   :  { %5815 = vmatpush2.bf16.msra.mxu0 %v9643_v45 }
 0x6be   :  { %v5322_v49 = vpop.f32.mrf.mxu0 }
 0x6bf   :  { %v5323_v50 = vadd.f32 %v5322_v49, %v5121_v47  ;;  %v9670_v47 = vld [vmem:[%s11323_s8 + $0x70] sm:$0xff]   ;;  %v9672_v49 = vld [vmem:[%s11323_s8 + $0x68] sm:$0xff]  }
 0x6c0   :  { %v5324_v52 = vpop.f32.mrf.mxu0 }
 0x6c1   :  { %v5329_v53 = vadd.f32 %v5323_v50, %v10978_v51  ;;  %v5325_v56 = vadd.f32 %v5324_v52, %v5125_v48  ;;  %v9648_v51 = vld [vmem:[%s11319_s21 + $0x94] ss:$8 sps:$4 sm:$0xff]   ;;  %v9673_v50 = vld [vmem:[%s11323_s8 + $0x28] sm:$0xff]   ;;  %v9674_v52 = vld [vmem:[%s11323_s8 + $0x60] sm:$0xff]  }
 0x6c2   :  { %v5326_v57 = vpop.f32.mrf.mxu0  ;;  %5816 = vmatprep.subr.bf16.mxu0 %v9648_v51  ;;  %v9671_v48 = vld [vmem:[%s11323_s8 + $0x30] sm:$0xff]   ;;  %v9684_v51 = vld [vmem:[%s11325_s30 + $0x38] sm:$0xff]  }
 0x6c3   :  { %v5330_v58 = vadd.f32 %v5325_v56, %v10980_v55  ;;  %v11024_v59 = vmax.f32 %v5329_v53, 0.0  ;;  %v9646_v55 = vld [vmem:[%s11319_s21 + $0x90] ss:$8 sps:$4 sm:$0xff]   ;;  %v9675_v53 = vld [vmem:[%s11323_s8 + $0x20] sm:$0xff]  }
 0x6c4   :  { %v5327_v61 = vpop.f32.mrf.mxu0  ;;  %5817 = vmatpush2.bf16.msra.mxu0 %v9646_v55  ;;  %v9676_v56 = vld [vmem:[%s11323_s8 + $0x58] sm:$0xff]   ;;  %v9878_v55 = vmov 0.0  }
 0x6c5   :  { %v11026_v62 = vmax.f32 %v5330_v58, 0.0  ;;  %v5333_v0 = vpack.c.bf16 %v11024_v59, %v11024_v59  ;;  %5818 = vmatprep.subr.bf16.mxu0 %v9651_v1  ;;  %v9677_v57 = vld [vmem:[%s11323_s8 + $0x18] sm:$0xff]   ;;  %v9678_v58 = vld [vmem:[%s11323_s8 + $0x50] sm:$0xff]   ;;  %v9680_v61 = vld [vmem:[%s11323_s8 + $0x48] sm:$0xff]  }
 0x6c6   :  { %v9685_v1 = vld [vmem:[%s11325_s30 + $0x30] sm:$0xff]  }
 0x6c7   :  { %v5334_v63 = vpack.c.bf16 %v11026_v62, %v11026_v62 }
 0x6c8   :  { %5819 = vmatpush2.bf16.msra.mxu0 %v9649_v2  ;;  %v9686_v2 = vld [vmem:[%s11325_s30 + $0x28] sm:$0xff]  }
 0x6c9   :  { %5571 = vmatprep.mubr.bf16.mxu1 %v5334_v63  ;;  %v9682_v63 = vld [vmem:[%s11323_s8 + $0x40] sm:$0xff]   ;;  %8309 = vmatprep.subr.bf16.mxu0 %v9878_v55 }
 0x6ca   :  { %5572 = vmatmul.mubr.bf16.vlgmr.msra.gmra.mxu1 %v5333_v0  ;;  %v9683_v0 = vld [vmem:[%s11323_s8] sm:$0xff]  }
 0x6cb   :  { %8183 = vmatpush3.bf16.msra.mxu1 %v9653_v3  ;;  %v9688_v3 = vld [vmem:[%s11325_s30 + $0x18] sm:$0xff]  }
 0x6cc   :  { %8184 = vmatprep.subr.bf16.mxu1 %v9654_v5  ;;  %v9689_v5 = vld [vmem:[%s11325_s30 + $0x10] sm:$0xff]  }
 0x6cf   :  { %8185 = vmatpush3.bf16.msra.mxu1 %v9655_v6  ;;  %v9690_v6 = vld [vmem:[%s11325_s30 + $0x8] sm:$0xff]  }
 0x6d0   :  { %8186 = vmatprep.subr.bf16.mxu1 %v9656_v7  ;;  %v9691_v7 = vld [vmem:[%s11325_s30] sm:$0xff]  }
 0x6d3   :  { %8187 = vmatpush3.bf16.msra.mxu1 %v9657_v10  ;;  %v9692_v10 = vld [vmem:[%s11326_s6 + $0x38] sm:$0xff]  }
 0x6d4   :  { %8188 = vmatprep.subr.bf16.mxu1 %v9658_v8  ;;  %v9693_v8 = vld [vmem:[%s11326_s6 + $0x30] sm:$0xff]  }
 0x6d7   :  { %8189 = vmatpush3.bf16.msra.mxu1 %v9659_v12  ;;  %v9694_v12 = vld [vmem:[%s11326_s6 + $0x28] sm:$0xff]  }
 0x6d8   :  { %8190 = vmatprep.subr.bf16.mxu1 %v9660_v11  ;;  %v9695_v11 = vld [vmem:[%s11326_s6 + $0x20] sm:$0xff]  }
 0x6db   :  { %8191 = vmatpush3.bf16.msra.mxu1 %v9661_v9  ;;  %v9696_v9 = vld [vmem:[%s11326_s6 + $0x18] sm:$0xff]  }
 0x6dc   :  { %8192 = vmatprep.subr.bf16.mxu1 %v9662_v13  ;;  %v9697_v13 = vld [vmem:[%s11326_s6 + $0x10] sm:$0xff]  }
 0x6df   :  { %8193 = vmatpush3.bf16.msra.mxu1 %v9663_v31 }
 0x6e0   :  { %8194 = vmatprep.subr.bf16.mxu1 %v9664_v16  ;;  %v9698_v16 = vld [vmem:[%s11326_s6 + $0x8] sm:$0xff]  }
 0x6e3   :  { %8195 = vmatpush3.bf16.msra.mxu1 %v9665_v25  ;;  %v9699_v25 = vld [vmem:[%s11326_s6] sm:$0xff]  }
 0x6e4   :  { %8196 = vmatprep.subr.bf16.mxu1 %v9666_v29  ;;  %v9700_v29 = vld [vmem:[%s11328_s20 + $0x38] sm:$0xff]  }
 0x6e7   :  { %8197 = vmatpush3.bf16.msra.mxu1 %v9667_v27  ;;  %v9701_v27 = vld [vmem:[%s11328_s20 + $0x30] sm:$0xff]  }
 0x6e8   :  { %8204 = vmatprep.subr.bf16.mxu1 %v9668_v32  ;;  %v9702_v32 = vld [vmem:[%s11328_s20 + $0x28] sm:$0xff]  }
 0x78a   :  { %v5573_v15 = vpop.f32.mrf.mxu1 }
 0x78b   :  { %v5574_v21 = vadd.f32 %v5573_v15, %v5372_v17 }
 0x78c   :  { %v5575_v22 = vpop.f32.mrf.mxu1 }
 0x78d   :  { %v5576_v23 = vadd.f32 %v5575_v22, %v5376_v14  ;;  %v5580_v54 = vmax.f32 %v5574_v21, 0.0 }
 0x78e   :  { %v5577_v60 = vpop.f32.mrf.mxu1 }
 0x78f   :  { %v5581_v24 = vmax.f32 %v5576_v23, 0.0  ;;  %v5582_v30 = vpack.c.bf16 %v5580_v54, %v5580_v54  ;;  %v8096_v23 = vld [vmem:[%s11327_s12] ss:$0 sm:$0xff] }
 0x790   :  { %v5578_v26 = vpop.f32.mrf.mxu1 }
 0x791   :  { %v5583_v28 = vpack.c.bf16 %v5581_v24, %v5581_v24 }
 0x793   :  { %5820 = vmatprep.mubr.bf16.mxu0 %v5583_v28 }
 0x794   :  { %5821 = vmatmul.mubr.bf16.vlgmr.msra.gmra.mxu0 %v5582_v30 }
 0x795   :  { %8310 = vmatpush3.bf16.msra.mxu0 %v9684_v51  ;;  %8325 = vmatprep.mubr.msk.bf16.mxu0 %vm9879_vm0, %v9878_v55 }
 0x796   :  { %8311 = vmatprep.subr.bf16.mxu0 %v9878_v55 }
 0x799   :  { %8312 = vmatpush3.bf16.msra.mxu0 %v9685_v1  ;;  %v9711_v1 = vld [vmem:[%s11333_s0 + $0x30] sm:$0xff]  }
 0x79a   :  { %8313 = vmatprep.subr.bf16.mxu0 %v9878_v55 }
 0x79d   :  { %8314 = vmatpush3.bf16.msra.mxu0 %v9686_v2  ;;  %v9713_v2 = vld [vmem:[%s11333_s0 + $0x28] sm:$0xff]  }
 0x79e   :  { %8315 = vmatprep.subr.bf16.mxu0 %v9878_v55 }
 0x7a1   :  { %8316 = vmatpush3.bf16.msra.mxu0 %v9687_v4  ;;  %v9715_v4 = vld [vmem:[%s11333_s0 + $0x20] sm:$0xff]  }
 0x7a2   :  { %8317 = vmatprep.subr.bf16.mxu0 %v9878_v55 }
 0x7a5   :  { %8318 = vmatpush3.bf16.msra.mxu0 %v9688_v3  ;;  %v9717_v3 = vld [vmem:[%s11333_s0 + $0x18] sm:$0xff]  }
 0x7a6   :  { %8319 = vmatprep.subr.bf16.mxu0 %v9878_v55 }
 0x7a9   :  { %8320 = vmatpush3.bf16.msra.mxu0 %v9689_v5  ;;  %v9719_v5 = vld [vmem:[%s11333_s0 + $0x10] sm:$0xff]  }
 0x7aa   :  { %8321 = vmatprep.subr.bf16.mxu0 %v9878_v55 }
 0x7ad   :  { %8322 = vmatpush3.bf16.msra.mxu0 %v9690_v6  ;;  %v9720_v6 = vld [vmem:[%s11331_s23 + $0x8] sm:$0xff]  }
 0x7ae   :  { %8323 = vmatprep.subr.bf16.mxu0 %v9878_v55 }
 0x7b1   :  { %8324 = vmatpush3.bf16.msra.mxu0 %v9691_v7  ;;  %v9721_v7 = vld [vmem:[%s11333_s0 + $0x8] sm:$0xff]  }
 0x7b2   :  { %8349 = vmatprep.subr.bf16.mxu0 %v9878_v55 }
 0x854   :  { %v5822_v35 = vpop.f32.mrf.mxu0 }
 0x855   :  { %v5823_v36 = vadd.f32 %v5822_v35, %v5621_v33  ;;  %v9704_v33 = vld [vmem:[%s11328_s20 + $0x18] sm:$0xff]   ;;  %v8079_v35 = vld [vmem:[%s11329_s18] ss:$0 sm:$0xff] }
 0x856   :  { %v5824_v37 = vpop.f32.mrf.mxu0 }
 0x857   :  { %v5829_v38 = vadd.f32 %v5823_v36, %v11024_v59  ;;  %v5825_v39 = vadd.f32 %v5824_v37, %v5625_v34  ;;  %v9679_v59 = vld [vmem:[%s11323_s8 + $0x10] sm:$0xff]   ;;  %v8113_v36 = vld [vmem:[%s11330_s22] ss:$0 sm:$0xff] }
 0x858   :  { %v5826_v40 = vpop.f32.mrf.mxu0  ;;  %v9705_v34 = vld [vmem:[%s11328_s20 + $0x10] sm:$0xff]  }
 0x859   :  { %v5830_v41 = vadd.f32 %v5825_v39, %v11026_v62  ;;  %v5831_v43 = vmax.f32 %v5829_v38, 0.0  ;;  %v9681_v62 = vld [vmem:[%s11323_s8 + $0x8] sm:$0xff]  }
 0x85a   :  { %v5827_v44 = vpop.f32.mrf.mxu0 }
 0x85b   :  { %v5832_v45 = vmax.f32 %v5830_v41, 0.0  ;;  %v5833_v20 = vpack.c.bf16 %v5831_v43, %v5831_v43 }
 0x85d   :  { %v5834_v46 = vpack.c.bf16 %v5832_v45, %v5832_v45 }
 0x85f   :  { %6002 = vmatprep.mubr.bf16.mxu1 %v5834_v46 }
 0x860   :  { %6003 = vmatmul.mubr.bf16.vlgmr.msra.gmra.mxu1 %v5833_v20 }
 0x861   :  { %8205 = vmatpush3.bf16.msra.mxu1 %v9669_v18  ;;  %6177 = vmatprep.mubr.bf16.mxu1 %v5834_v46  ;;  %v9706_v18 = vld [vmem:[%s11328_s20 + $0x8] sm:$0xff]  }
 0x862   :  { %8206 = vmatprep.subr.bf16.mxu1 %v9670_v47  ;;  %v9708_v47 = vld [vmem:[%s11331_s23 + $0x38] sm:$0xff]  }
 0x865   :  { %8207 = vmatpush3.bf16.msra.mxu1 %v9671_v48  ;;  %v9710_v48 = vld [vmem:[%s11331_s23 + $0x30] sm:$0xff]  }
 0x866   :  { %8208 = vmatprep.subr.bf16.mxu1 %v9672_v49  ;;  %v9712_v49 = vld [vmem:[%s11331_s23 + $0x28] sm:$0xff]  }
 0x869   :  { %8209 = vmatpush3.bf16.msra.mxu1 %v9673_v50  ;;  %v9714_v50 = vld [vmem:[%s11331_s23 + $0x20] sm:$0xff]  }
 0x86a   :  { %8210 = vmatprep.subr.bf16.mxu1 %v9674_v52  ;;  %v9716_v52 = vld [vmem:[%s11331_s23 + $0x18] sm:$0xff]  }
 0x86d   :  { %8211 = vmatpush3.bf16.msra.mxu1 %v9675_v53  ;;  %v9718_v53 = vld [vmem:[%s11331_s23 + $0x10] sm:$0xff]  }
 0x86e   :  { %8212 = vmatprep.subr.bf16.mxu1 %v9676_v56  ;;  %v8122_v56 = vld [vmem:[%s11332_s26] ss:$0 sm:$0xff] }
 0x871   :  { %8213 = vmatpush3.bf16.msra.mxu1 %v9677_v57 }
 0x872   :  { %8214 = vmatprep.subr.bf16.mxu1 %v9678_v58 }
 0x875   :  { %8215 = vmatpush3.bf16.msra.mxu1 %v9679_v59 }
 0x876   :  { %8216 = vmatprep.subr.bf16.mxu1 %v9680_v61 }
 0x879   :  { %8217 = vmatpush3.bf16.msra.mxu1 %v9681_v62 }
 0x87a   :  { %8218 = vmatprep.subr.bf16.mxu1 %v9682_v63  ;;  %v9709_v63 = vld [vmem:[%s11333_s0 + $0x38] sm:$0xff]  }
 0x87d   :  { %8219 = vmatpush3.bf16.msra.mxu1 %v9683_v0 }
 0x87e   :  { %8329 = vmatprep.subr.bf16.mxu1 %v9878_v55 }
 0x880   :  { %6178 = vmatmul.mubr.bf16.vlgmr.msra.gmra.mxu1 %v5833_v20  ;;  %v9707_v20 = vld [vmem:[%s11328_s20] sm:$0xff]  }
 0x881   :  { %8345 = vmatprep.mubr.msk.bf16.mxu1 %vm9879_vm0, %v9878_v55  ;;  %8330 = vmatpush3.bf16.msra.mxu1 %v9692_v10  ;;  %v9722_v10 = vld [vmem:[%s11331_s23] sm:$0xff]  }
 0x882   :  { %8331 = vmatprep.subr.bf16.mxu1 %v9878_v55 }
 0x885   :  { %8332 = vmatpush3.bf16.msra.mxu1 %v9693_v8  ;;  %v9723_v8 = vld [vmem:[%s11333_s0] sm:$0xff]  }
 0x886   :  { %8333 = vmatprep.subr.bf16.mxu1 %v9878_v55 }
 0x889   :  { %8334 = vmatpush3.bf16.msra.mxu1 %v9694_v12  ;;  %v8131_v12 = vld [vmem:[%s11334_s28] ss:$0 sm:$0xff] }
 0x88a   :  { %8335 = vmatprep.subr.bf16.mxu1 %v9878_v55 }
 0x88d   :  { %8336 = vmatpush3.bf16.msra.mxu1 %v9695_v11 }
 0x88e   :  { %8337 = vmatprep.subr.bf16.mxu1 %v9878_v55 }
 0x891   :  { %8338 = vmatpush3.bf16.msra.mxu1 %v9696_v9 }
 0x892   :  { %8339 = vmatprep.subr.bf16.mxu1 %v9878_v55 }
 0x895   :  { %8340 = vmatpush3.bf16.msra.mxu1 %v9697_v13 }
 0x896   :  { %8341 = vmatprep.subr.bf16.mxu1 %v9878_v55 }
 0x899   :  { %8342 = vmatpush3.bf16.msra.mxu1 %v9698_v16 }
 0x89a   :  { %8343 = vmatprep.subr.bf16.mxu1 %v9878_v55 }
 0x89d   :  { %8344 = vmatpush3.bf16.msra.mxu1 %v9699_v25 }
 0x89e   :  { %8369 = vmatprep.subr.bf16.mxu1 %v9878_v55 }
 0x920   :  { %v8198_v42 = vpop.f32.mrf.mxu1 }
 0x922   :  { %v8199_v17 = vpop.f32.mrf.mxu1 }
 0x923   :  { %v8200_v14 = vadd.f32 %v8199_v17, %v8198_v42 }
 0x924   :  { %v8201_v15 = vpop.f32.mrf.mxu1 }
 0x925   :  { %v6005_v38 = vadd.f32 %v8200_v14, %v8079_v35  ;;  %v9729_v35 = vld [vmem:[%s11337_s7 + $0x10] sm:$0xff]  }
 0x926   :  { %v8202_v21 = vpop.f32.mrf.mxu1 }
 0x927   :  { %v9724_v21 = vld [vmem:[%s11335_s1 + $0x18] sm:$0xff]  }
 0x940   :  { %v8220_v22 = vpop.f32.mrf.mxu1 }
 0x942   :  { %v8221_v54 = vpop.f32.mrf.mxu1 }
 0x943   :  { %v8222_v60 = vadd.f32 %v8221_v54, %v8220_v22  ;;  %v9726_v54 = vld [vmem:[%s11335_s1 + $0x8] sm:$0xff]  }
 0x944   :  { %v8223_v24 = vpop.f32.mrf.mxu1 }
 0x945   :  { %v6180_v26 = vadd.f32 %v8222_v60, %v8096_v23  ;;  %v9725_v23 = vld [vmem:[%s11335_s1 + $0x10] sm:$0xff]   ;;  %v9727_v60 = vld [vmem:[%s11335_s1] sm:$0xff]  }
 0x946   :  { %v8224_v28 = vpop.f32.mrf.mxu1  ;;  %v8149_v24 = vld [vmem:[%s11336_s2] ss:$0 sm:$0xff] }
 0x947   :  { %v6185_v30 = vmax.f32 %v6180_v26, 0.0 }
 0x949   :  { %v6186_v31 = vpack.c.bf16 %v6185_v30, %v6185_v30 }
 0x94b   :  { %8326 = vmatmul.mubr.bf16.vlgmr.msra.gmra.mxu0 %v6186_v31 }
 0x94c   :  { %8365 = vmatprep.mubr.msk.bf16.mxu0 %vm9879_vm0, %v9878_v55  ;;  %8350 = vmatpush3.bf16.msra.mxu0 %v9700_v29 }
 0x94d   :  { %8351 = vmatprep.subr.bf16.mxu0 %v9878_v55 }
 0x950   :  { %8352 = vmatpush3.bf16.msra.mxu0 %v9701_v27 }
 0x951   :  { %8353 = vmatprep.subr.bf16.mxu0 %v9878_v55 }
 0x954   :  { %8354 = vmatpush3.bf16.msra.mxu0 %v9702_v32  ;;  %v9728_v32 = vld [vmem:[%s11337_s7 + $0x18] sm:$0xff]  }
 0x955   :  { %8355 = vmatprep.subr.bf16.mxu0 %v9878_v55 }
 0x958   :  { %8356 = vmatpush3.bf16.msra.mxu0 %v9703_v19 }
 0x959   :  { %8357 = vmatprep.subr.bf16.mxu0 %v9878_v55 }
 0x95c   :  { %8358 = vmatpush3.bf16.msra.mxu0 %v9704_v33 }
 0x95d   :  { %8359 = vmatprep.subr.bf16.mxu0 %v9878_v55 }
 0x960   :  { %8360 = vmatpush3.bf16.msra.mxu0 %v9705_v34 }
 0x961   :  { %8361 = vmatprep.subr.bf16.mxu0 %v9878_v55 }
 0x964   :  { %8362 = vmatpush3.bf16.msra.mxu0 %v9706_v18 }
 0x965   :  { %8363 = vmatprep.subr.bf16.mxu0 %v9878_v55 }
 0x968   :  { %8364 = vmatpush3.bf16.msra.mxu0 %v9707_v20 }
 0x969   :  { %8389 = vmatprep.subr.bf16.mxu0 %v9878_v55 }
 0xa0b   :  { %v6292_v37 = vpop.f32.mrf.mxu0 }
 0xa0c   :  { %v6293_v39 = vadd.f32 %v8113_v36, %v6292_v37  ;;  %v9730_v36 = vld [vmem:[%s11337_s7 + $0x8] sm:$0xff]   ;;  %v9731_v37 = vld [vmem:[%s11337_s7] sm:$0xff]  }
 0xa0d   :  { %v8327_v40 = vpop.f32.mrf.mxu0 }
 0xa0e   :  { %v6298_v41 = vadd.f32 %v6293_v39, %v6005_v38  ;;  %v9732_v38 = vld [vmem:[%s11338_s10 + $0x18] sm:$0xff]   ;;  %v9733_v39 = vld [vmem:[%s11338_s10 + $0x10] sm:$0xff]   ;;  %v8140_v40 = vld [vmem:[%s11339_s11] ss:$0 sm:$0xff] }
 0xa0f   :  { %v6295_v43 = vpop.f32.mrf.mxu0 }
 0xa10   :  { %v11131_v44 = vmax.f32 %v6298_v41, 0.0  ;;  %v8158_v41 = vld [vmem:[%s11340_s15] ss:$0 sm:$0xff] }
 0xa11   :  { %v8328_v45 = vpop.f32.mrf.mxu0 }
 0xa12   :  { %v6300_v46 = vpack.c.bf16 %v11131_v44, %v11131_v44 }
 0xa14   :  { %8346 = vmatmul.mubr.bf16.vlgmr.msra.gmra.mxu1 %v6300_v46 }
 0xa15   :  { %8385 = vmatprep.mubr.msk.bf16.mxu1 %vm9879_vm0, %v9878_v55  ;;  %8370 = vmatpush3.bf16.msra.mxu1 %v9708_v47 }
 0xa16   :  { %8371 = vmatprep.subr.bf16.mxu1 %v9878_v55 }
 0xa19   :  { %8372 = vmatpush3.bf16.msra.mxu1 %v9710_v48 }
 0xa1a   :  { %8373 = vmatprep.subr.bf16.mxu1 %v9878_v55 }
 0xa1d   :  { %8374 = vmatpush3.bf16.msra.mxu1 %v9712_v49 }
 0xa1e   :  { %8375 = vmatprep.subr.bf16.mxu1 %v9878_v55 }
 0xa21   :  { %8376 = vmatpush3.bf16.msra.mxu1 %v9714_v50  ;;  %v9734_v50 = vld [vmem:[%s11338_s10 + $0x8] sm:$0xff]  }
 0xa22   :  { %8377 = vmatprep.subr.bf16.mxu1 %v9878_v55 }
 0xa25   :  { %8378 = vmatpush3.bf16.msra.mxu1 %v9716_v52  ;;  %v9735_v52 = vld [vmem:[%s11338_s10] sm:$0xff]  }
 0xa26   :  { %8379 = vmatprep.subr.bf16.mxu1 %v9878_v55 }
 0xa29   :  { %8380 = vmatpush3.bf16.msra.mxu1 %v9718_v53  ;;  %v7013_v53 = vld [vmem:[%s11341_s27 + $0x38] sm:$0xff] }
 0xa2a   :  { %8381 = vmatprep.subr.bf16.mxu1 %v9878_v55 }
 0xa2d   :  { %8382 = vmatpush3.bf16.msra.mxu1 %v9720_v6  ;;  %v7006_v6 = vld [vmem:[%s11341_s27] sm:$0xff] }
 0xa2e   :  { %8383 = vmatprep.subr.bf16.mxu1 %v9878_v55 }
 0xa31   :  { %8384 = vmatpush3.bf16.msra.mxu1 %v9722_v10  ;;  %v7102_v10 = vld [vmem:[%s11343_s5 + $0x30] sm:$0xff] }
 0xa32   :  { %8409 = vmatprep.subr.bf16.mxu1 %v9878_v55 }
 0xad4   :  { %v6406_v57 = vpop.f32.mrf.mxu1 }
 0xad5   :  { %v6407_v58 = vadd.f32 %v8122_v56, %v6406_v57  ;;  %v7012_v56 = vld [vmem:[%s11341_s27 + $0x30] sm:$0xff]  ;;  %v7011_v57 = vld [vmem:[%s11341_s27 + $0x28] sm:$0xff] }
 0xad6   :  { %v8347_v59 = vpop.f32.mrf.mxu1 }
 0xad7   :  { %v6412_v61 = vmax.f32 %v6407_v58, 0.0  ;;  %v7010_v58 = vld [vmem:[%s11341_s27 + $0x20] sm:$0xff] }
 0xad8   :  { %v6409_v62 = vpop.f32.mrf.mxu1  ;;  %v8164_v59 = vld [vmem:[%s11342_s16] ss:$0 sm:$0xff] }
 0xad9   :  { %v6413_v0 = vpack.c.bf16 %v6412_v61, %v6412_v61 }
 0xada   :  { %v8348_v51 = vpop.f32.mrf.mxu1 }
 0xadb   :  { %8366 = vmatmul.mubr.bf16.vlgmr.msra.gmra.mxu0 %v6413_v0 }
 0xadc   :  { %8390 = vmatpush3.bf16.msra.mxu0 %v9709_v63  ;;  %8405 = vmatprep.mubr.msk.bf16.mxu0 %vm9879_vm0, %v9878_v55 }
 0xadd   :  { %8391 = vmatprep.subr.bf16.mxu0 %v9878_v55 }
 0xae0   :  { %8392 = vmatpush3.bf16.msra.mxu0 %v9711_v1 }
 0xae1   :  { %8393 = vmatprep.subr.bf16.mxu0 %v9878_v55 }
 0xae4   :  { %8394 = vmatpush3.bf16.msra.mxu0 %v9713_v2 }
 0xae5   :  { %8395 = vmatprep.subr.bf16.mxu0 %v9878_v55 }
 0xae8   :  { %8396 = vmatpush3.bf16.msra.mxu0 %v9715_v4  ;;  %v7009_v4 = vld [vmem:[%s11341_s27 + $0x18] sm:$0xff] }
 0xae9   :  { %8397 = vmatprep.subr.bf16.mxu0 %v9878_v55 }
 0xaec   :  { %8398 = vmatpush3.bf16.msra.mxu0 %v9717_v3  ;;  %v7008_v3 = vld [vmem:[%s11341_s27 + $0x10] sm:$0xff] }
 0xaed   :  { %8399 = vmatprep.subr.bf16.mxu0 %v9878_v55 }
 0xaf0   :  { %8400 = vmatpush3.bf16.msra.mxu0 %v9719_v5  ;;  %v7007_v5 = vld [vmem:[%s11341_s27 + $0x8] sm:$0xff] }
 0xaf1   :  { %8401 = vmatprep.subr.bf16.mxu0 %v9878_v55 }
 0xaf4   :  { %8402 = vmatpush3.bf16.msra.mxu0 %v9721_v7  ;;  %v7103_v7 = vld [vmem:[%s11343_s5 + $0x38] sm:$0xff] }
 0xaf5   :  { %8403 = vmatprep.subr.bf16.mxu0 %v9878_v55 }
 0xaf8   :  { %8404 = vmatpush3.bf16.msra.mxu0 %v9723_v8  ;;  %v7101_v8 = vld [vmem:[%s11343_s5 + $0x28] sm:$0xff] }
 0xaf9   :  { %8433 = vmatprep.subr.bf16.mxu0 %v9878_v55 }
 0xb9b   :  { %v6519_v11 = vpop.f32.mrf.mxu0 }
 0xb9c   :  { %v6520_v9 = vadd.f32 %v8131_v12, %v6519_v11  ;;  %v7100_v12 = vld [vmem:[%s11343_s5 + $0x20] sm:$0xff]  ;;  %v7099_v11 = vld [vmem:[%s11343_s5 + $0x18] sm:$0xff] }
 0xb9d   :  { %v8367_v13 = vpop.f32.mrf.mxu0 }
 0xb9e   :  { %v6525_v42 = vadd.f32 %v6520_v9, %v11131_v44  ;;  %v7098_v9 = vld [vmem:[%s11343_s5 + $0x10] sm:$0xff]  ;;  %v8170_v13 = vld [vmem:[#allocation2] ss:$0 sm:$0xff] }
 0xb9f   :  { %v6522_v17 = vpop.f32.mrf.mxu0 }
 0xba0   :  { %v6526_v14 = vmax.f32 %v6525_v42, 0.0 }
 0xba1   :  { %v8368_v15 = vpop.f32.mrf.mxu0 }
 0xba2   :  { %v6527_v22 = vpack.c.bf16 %v6526_v14, %v6526_v14 }
 0xba4   :  { %8386 = vmatmul.mubr.bf16.vlgmr.msra.gmra.mxu1 %v6527_v22  ;;  %8406 = vmatmul.mubr.bf16.vlgmr.msra.gmra.mxu0 %v6527_v22 }
 0xba5   :  { %8410 = vmatpush3.bf16.msra.mxu1 %v9724_v21  ;;  %8417 = vmatprep.mubr.msk.bf16.mxu1 %vm9879_vm0, %v9878_v55 }
 0xba6   :  { %8411 = vmatprep.subr.bf16.mxu1 %v9878_v55  ;;  %8441 = vmatprep.mubr.msk.bf16.mxu0 %vm9879_vm0, %v9878_v55 }
 0xba7   :  { %8434 = vmatpush3.bf16.msra.mxu0 %v9732_v38 }
 0xba8   :  { %8435 = vmatprep.subr.bf16.mxu0 %v9878_v55 }
 0xba9   :  { %8412 = vmatpush3.bf16.msra.mxu1 %v9725_v23 }
 0xbaa   :  { %8413 = vmatprep.subr.bf16.mxu1 %v9878_v55 }
 0xbab   :  { %8436 = vmatpush3.bf16.msra.mxu0 %v9733_v39 }
 0xbac   :  { %8437 = vmatprep.subr.bf16.mxu0 %v9878_v55 }
 0xbad   :  { %8414 = vmatpush3.bf16.msra.mxu1 %v9726_v54  ;;  %v7097_v54 = vld [vmem:[%s11343_s5 + $0x8] sm:$0xff] }
 0xbae   :  { %8415 = vmatprep.subr.bf16.mxu1 %v9878_v55 }
 0xbaf   :  { %8438 = vmatpush3.bf16.msra.mxu0 %v9734_v50 }
 0xbb0   :  { %8439 = vmatprep.subr.bf16.mxu0 %v9878_v55 }
 0xbb1   :  { %8416 = vmatpush3.bf16.msra.mxu1 %v9727_v60  ;;  %v7096_v60 = vld [vmem:[%s11343_s5] sm:$0xff] }
 0xbb2   :  { %8421 = vmatprep.subr.bf16.mxu1 %v9878_v55 }
 0xbb3   :  { %8440 = vmatpush3.bf16.msra.mxu0 %v9735_v52 }
 0xbb4   :  { %8464 = vmatprep.subr.mxu0 %v9878_v55 }
 0xc64   :  { %v6633_v26 = vpop.f32.mrf.mxu1  ;;  %v6744_v28 = vpop.f32.mrf.mxu0 }
 0xc65   :  { %v6745_v30 = vadd.f32 %v8149_v24, %v6744_v28  ;;  %v6634_v44 = vadd.f32 %v8140_v40, %v6633_v26  ;;  %v7188_v24 = vld [vmem:[%s10103_s19 + $0x18] sm:$0xff]  ;;  %v8176_v26 = vld [vmem:[#allocation4] ss:$0 sm:$0xff] }
 0xc66   :  { %v8387_v31 = vpop.f32.mrf.mxu1  ;;  %v8407_v16 = vpop.f32.mrf.mxu0 }
 0xc67   :  { %v6750_v25 = vmax.f32 %v6745_v30, 0.0  ;;  %v7187_v16 = vld [vmem:[%s10103_s19 + $0x10] sm:$0xff] }
 0xc68   :  { %v6636_v29 = vpop.f32.mrf.mxu1  ;;  %v6747_v27 = vpop.f32.mrf.mxu0 }
 0xc69   :  { %v6751_v19 = vpack.c.bf16 %v6750_v25, %v6750_v25  ;;  %v7186_v25 = vld [vmem:[%s10103_s19 + $0x8] sm:$0xff]  ;;  %v7185_v29 = vld [vmem:[%s10103_s19] sm:$0xff] }
 0xc6a   :  { %v8388_v33 = vpop.f32.mrf.mxu1  ;;  %v8408_v34 = vpop.f32.mrf.mxu0  ;;  %v8178_v27 = vld [vmem:[#allocation6] ss:$0 sm:$0xff] }
 0xc6b   :  { %8418 = vmatmul.mubr.msk.bf16.vlgmr.msra.gmra.mxu1 %vm6791_vm1, %v6751_v19 }
 0xc6c   :  { %8422 = vmatpush3.bf16.msra.mxu1 %v9728_v32  ;;  %8429 = vmatprep.mubr.msk.bf16.mxu1 %vm9879_vm0, %v9878_v55 }
 0xc6d   :  { %8423 = vmatprep.subr.bf16.mxu1 %v9878_v55 }
 0xc70   :  { %8424 = vmatpush3.bf16.msra.mxu1 %v9729_v35  ;;  %v8180_v35 = vld [vmem:[#allocation7] ss:$0 sm:$0xff] }
 0xc71   :  { %8425 = vmatprep.subr.bf16.mxu1 %v9878_v55 }
 0xc74   :  { %8426 = vmatpush3.bf16.msra.mxu1 %v9730_v36 }
 0xc75   :  { %8427 = vmatprep.subr.bf16.mxu1 %v9878_v55 }
 0xc78   :  { %8428 = vmatpush3.bf16.msra.mxu1 %v9731_v37 }
 0xc79   :  { %8445 = vmatprep.subr.mxu1 %v9878_v55 }
 0xd2b   :  { %v6829_v43 = vpop.f32.mrf.mxu1 }
 0xd2c   :  { %v6830_v45 = vadd.f32 %v8158_v41, %v6829_v43 }
 0xd2d   :  { %v8419_v46 = vpop.f32.mrf.mxu1 }
 0xd2e   :  { %v6835_v18 = vadd.f32 %v6830_v45, %v6634_v44 }
 0xd2f   :  { %v6832_v20 = vpop.f32.mrf.mxu1 }
 0xd30   :  { %v11208_v47 = vmax.f32 %v6835_v18, 0.0 }
 0xd31   :  { %v8420_v48 = vpop.f32.mrf.mxu1 }
 0xd32   :  { %v6837_v49 = vpack.c.bf16 %v11208_v47, %v11208_v47 }
 0xd34   :  { %8430 = vmatmul.mubr.msk.bf16.vlgmr.msra.gmra.mxu1 %vm6791_vm1, %v6837_v49 }
 0xd35   :  { %8461 = vmatprep.mubr.msk.f32.mxu1 %vm9879_vm0, %v9878_v55  ;;  %8446 = vmatpush3.msra.mxu1 %v7013_v53 }
 0xd36   :  { %8447 = vmatprep.subr.mxu1 %v9878_v55 }
 0xd37   :  { %8448 = vmatpush3.msra.mxu1 %v7012_v56 }
 0xd38   :  { %8449 = vmatprep.subr.mxu1 %v9878_v55 }
 0xd39   :  { %8450 = vmatpush3.msra.mxu1 %v7011_v57 }
 0xd3a   :  { %8451 = vmatprep.subr.mxu1 %v9878_v55 }
 0xd3b   :  { %8452 = vmatpush3.msra.mxu1 %v7010_v58 }
 0xd3c   :  { %8453 = vmatprep.subr.mxu1 %v9878_v55 }
 0xd3d   :  { %8454 = vmatpush3.msra.mxu1 %v7009_v4 }
 0xd3e   :  { %8455 = vmatprep.subr.mxu1 %v9878_v55 }
 0xd3f   :  { %8456 = vmatpush3.msra.mxu1 %v7008_v3 }
 0xd40   :  { %8457 = vmatprep.subr.mxu1 %v9878_v55 }
 0xd41   :  { %8458 = vmatpush3.msra.mxu1 %v7007_v5 }
 0xd42   :  { %8459 = vmatprep.subr.mxu1 %v9878_v55 }
 0xd43   :  { %8460 = vmatpush3.msra.mxu1 %v7006_v6 }
 0xd44   :  { %8483 = vmatprep.subr.mxu1 %v9878_v55 }
 0xdf4   :  { %v6914_v61 = vpop.f32.mrf.mxu1 }
 0xdf5   :  { %v6915_v62 = vadd.f32 %v8164_v59, %v6914_v61 }
 0xdf6   :  { %v8431_v63 = vpop.f32.mrf.mxu1 }
 0xdf7   :  { %v6920_v0 = vmax.f32 %v6915_v62, 0.0 }
 0xdf8   :  { %v6917_v51 = vpop.f32.mrf.mxu1 }
 0xdf9   :  { %v6921_v1 = vpack.c.bf16 %v6920_v0, %v6920_v0 }
 0xdfa   :  { %v8432_v2 = vpop.f32.mrf.mxu1 }
 0xdfb   :  { %8442 = vmatmul.mubr.msk.bf16.vlgmr.msra.gmra.mxu0 %vm6791_vm1, %v6921_v1 }
 0xdfc   :  { %8480 = vmatprep.mubr.msk.f32.mxu0 %vm9879_vm0, %v9878_v55  ;;  %8465 = vmatpush3.msra.mxu0 %v7103_v7 }
 0xdfd   :  { %8466 = vmatprep.subr.mxu0 %v9878_v55 }
 0xdfe   :  { %8467 = vmatpush3.msra.mxu0 %v7102_v10 }
 0xdff   :  { %8468 = vmatprep.subr.mxu0 %v9878_v55 }
 0xe00   :  { %8469 = vmatpush3.msra.mxu0 %v7101_v8 }
 0xe01   :  { %8470 = vmatprep.subr.mxu0 %v9878_v55 }
 0xe02   :  { %8471 = vmatpush3.msra.mxu0 %v7100_v12 }
 0xe03   :  { %8472 = vmatprep.subr.mxu0 %v9878_v55 }
 0xe04   :  { %8473 = vmatpush3.msra.mxu0 %v7099_v11 }
 0xe05   :  { %8474 = vmatprep.subr.mxu0 %v9878_v55 }
 0xe06   :  { %8475 = vmatpush3.msra.mxu0 %v7098_v9 }
 0xe07   :  { %8476 = vmatprep.subr.mxu0 %v9878_v55 }
 0xe08   :  { %8477 = vmatpush3.msra.mxu0 %v7097_v54 }
 0xe09   :  { %8478 = vmatprep.subr.mxu0 %v9878_v55 }
 0xe0a   :  { %8479 = vmatpush3.msra.mxu0 %v7096_v60 }
 0xebb   :  { %v6998_v42 = vpop.f32.mrf.mxu0 }
 0xebc   :  { %v6999_v17 = vadd.f32 %v8170_v13, %v6998_v42 }
 0xebd   :  { %v8443_v14 = vpop.f32.mrf.mxu0 }
 0xebe   :  { %v7004_v15 = vadd.f32 %v6999_v17, %v11208_v47 }
 0xebf   :  { %v7001_v21 = vpop.f32.mrf.mxu0 }
 0xec0   :  { %v7005_v22 = vmax.f32 %v7004_v15, 0.0 }
 0xec1   :  { %v8444_v23 = vpop.f32.mrf.mxu0 }
 0xec2   :  { %8462 = vmatmul.mubr.msk.f32.vlgmr.msra.gmra.mxu1 %vm6791_vm1, %v7005_v22 }
 0xec3   :  { %8491 = vmatprep.mubr.msk.f32.mxu1 %vm9879_vm0, %v9878_v55  ;;  %8484 = vmatpush3.msra.mxu1 %v7188_v24 }
 0xec4   :  { %8485 = vmatprep.subr.mxu1 %v9878_v55 }
 0xec5   :  { %8486 = vmatpush3.msra.mxu1 %v7187_v16 }
 0xec6   :  { %8487 = vmatprep.subr.mxu1 %v9878_v55 }
 0xec7   :  { %8488 = vmatpush3.msra.mxu1 %v7186_v25 }
 0xec8   :  { %8489 = vmatprep.subr.mxu1 %v9878_v55 }
 0xec9   :  { %8490 = vmatpush3.msra.mxu1 %v7185_v29 }
 0xf82   :  { %v7090_v28 = vpop.f32.mrf.mxu1 }
 0xf83   :  { %v7091_v30 = vadd.f32 %v8176_v26, %v7090_v28 }
 0xf84   :  { %v8463_v31 = vpop.f32.mrf.mxu1 }
 0xf85   :  { %7095 = vst.msk [vmem:[%s10113_s4] sm:$0xf] %vm7094_vm2, %v7091_v30  ;;  %8481 = vmatmul.mubr.msk.f32.vlgmr.msra.gmra.mxu0 %vm6791_vm1, %v7091_v30 }
0x1045   :  { %v7180_v32 = vpop.f32.mrf.mxu0 }
0x1046   :  { %v7181_v19 = vadd.f32 %v8178_v27, %v7180_v32 }
0x1047   :  { %v8482_v33 = vpop.f32.mrf.mxu0 }
0x1048   :  { %v7184_v34 = vmax.f32 %v7181_v19, 0.0 }
0x104a   :  { %8492 = vmatmul.mubr.msk.f32.vlgmr.msra.gmra.mxu1 %vm7196_vm3, %v7184_v34 }
0x110a   :  { %v7266_v36 = vpop.f32.mrf.mxu1 }
0x110b   :  { %v7267_v37 = vadd.f32 %v8180_v35, %v7266_v36 }
0x110c   :  { %v8493_v38 = vpop.f32.mrf.mxu1 }
0x110d   :  { %v7270_v39 = vmul.f32 %v7267_v37, %v7267_v37 }
0x110f   :  { %v7272_v40 = vsel %vm7271_vm4, %v7270_v39, 0.0 }
0x1110   :  { %7273 = vadd.xlane.f32.xlu0 %v7272_v40 }
0x1199   :  { %v7274_v55 = vpop.xlane.xlu0 %7273 }
0x119a   :  { %9736 = vrsqrt.f32 %v7274_v55  ;;  %vm7277_vm5 = vcmp.eq.f32.partialorder %v7274_v55, inf  ;;  %v7280_v44 = vand.u32 2147483648, %v7274_v55  ;;  %vm7279_vm6 = vcmp.eq.f32.partialorder %v7274_v55, 0.0 }
0x11a7   :  { %v9737_v41 = vpop.eup %9736 }
0x11a8   :  { %v7276_v43 = vmul.f32 %v9737_v41, %v7274_v55 }
0x11aa   :  { %v7278_v45 = vsel %vm7277_vm5, %v7274_v55, %v7276_v43 }
0x11ab   :  { %v7281_v46 = vsel %vm7279_vm6, %v7280_v44, %v7278_v45 }
0x11ac   :  { %v7282_v18 = vmax.f32 %v7281_v46, 1e-12 }
0x11ae   :  { %9738 = vrcp.f32 %v7282_v18 }
0x11bb   :  { %v9739_v20 = vpop.eup %9738 }
0x11bc   :  { %v7284_v47 = vmul.f32 %v9739_v20, %v7267_v37 }
0x11be   :  { %7285 = vst.msk [vmem:[%s10118_s24] sm:$0xf] %vm7271_vm4, %v7284_v47 }
0x11bf   :  { %7294 = vsyncpa [#allocation3], 1 }
0x11c0   :  { %7295 = vsyncpa [#allocation5], 1 }
0x11c1   :  { %7296 = vsyncpa [#allocation8], 1 }

</bundles_post_ra>
